<compile_context>
chip_gen: v7x
topology: tpu7x:2x2x1
jax: 0.10.0
libtpu: 0.0.40
codegen_flags: <defaults>
</compile_context>

<pallas_src>
import functools
import math

import jax
import jax.numpy as jnp
from jax import lax
from jax.experimental import pallas as pl
from jax.experimental.pallas import tpu as pltpu


STACKED_PARAM_ORDER = [
    "w_qkv_sa", "b_qkv_sa", "w_o_sa", "b_o_sa",
    "w_q_ca", "b_q_ca", "w_kv_ca", "b_kv_ca", "w_o_ca", "b_o_ca",
    "w1", "b1", "w2", "b2",
    "ln_w", "ln_b",
]


# ----------------------------- Pallas kernel -------------------------------

def _decoder_stack_kernel(tgt_ref, mem_ref, tgt_mask_ref, tgt_kpm_ref, mem_kpm_ref,
                          w_qkv_sa_ref, b_qkv_sa_ref, w_o_sa_ref, b_o_sa_ref,
                          w_q_ca_ref, b_q_ca_ref, w_kv_ca_ref, b_kv_ca_ref,
                          w_o_ca_ref, b_o_ca_ref,
                          w1_ref, b1_ref, w2_ref, b2_ref,
                          ln_w_ref, ln_b_ref,
                          out_ref, x_scr, ctx_scr, bias_scr,
                          *, nhead, d_model, bb, tq, s_len):
    D = d_model
    HD = D // nhead
    N = bb * tq
    bf16 = jnp.bfloat16
    f32 = jnp.float32
    layer = pl.program_id(1)          # inner ("arbitrary") grid axis = layer index

    # Layer 0: seed the VMEM-resident activation carry and hoist the layer-invariant
    # self-attention bias (tgt_mask + per-batch key-padding) into a VMEM scratch.
    @pl.when(layer == 0)
    def _():
        x_scr[...] = tgt_ref[...].reshape(N, D).astype(f32)
        bias_scr[...] = tgt_mask_ref[...][None, :, :] + tgt_kpm_ref[...]

    x = x_scr[...]                                   # (N, D) f32, carried across layers
    mem = mem_ref[...].reshape(bb * s_len, D)        # (BB*S, D) bf16 (cast wrapper-side)

    def layer_norm(v, idx):
        w = ln_w_ref[idx:idx + 1, :]                 # (1, D)
        b = ln_b_ref[idx:idx + 1, :]                 # (1, D)
        mu = jnp.mean(v, axis=-1, keepdims=True)
        var = jnp.mean((v - mu) ** 2, axis=-1, keepdims=True)
        return (v - mu) * lax.rsqrt(var + 1e-5) * w + b

    def softmax(s):
        # NOTE: fully-masked rows yield a uniform distribution (PyTorch yields NaN).
        s = s - jnp.max(s, axis=-1, keepdims=True)
        p = jnp.exp(s)
        return p * pl.reciprocal(jnp.sum(p, axis=-1, keepdims=True), approx=True)

    def attend(q_all, k_all, v_all, w_o, b_o, bias_fn, tk):
        # q_all: (N, D) bf16 (1/sqrt(HD) already folded into the Q weights)
        # k_all, v_all: (BB*tk, D) bf16 ; w_o: (D, D) bf16 pre-transposed ; b_o: (1, D) f32
        #
        # Per (batch elem, head) score/softmax/PV; each head's context is written
        # IMMEDIATELY into lane offset h*HD of the VMEM ctx scratch (no hoarding of
        # contexts, bounded live ranges), then the output projection runs as a single
        # (N, D) @ (D, D) MXU matmul with a full K=D contraction.
        # TODO(synk): convert the bi loop to lax.fori_loop for very large batch blocks.
        for bi in range(bb):                         # static, typically small
            bias_b = bias_fn(bi)                     # hoisted out of the head loop
            q_b = q_all[bi * tq:(bi + 1) * tq, :]
            k_b = k_all[bi * tk:(bi + 1) * tk, :]
            v_b = v_all[bi * tk:(bi + 1) * tk, :]
            for h in range(nhead):                   # static, tiny head loop
                c0 = h * HD
                s = jnp.einsum("qc,kc->qk", q_b[:, c0:c0 + HD], k_b[:, c0:c0 + HD],
                               preferred_element_type=f32)
                p = softmax(s + bias_b).astype(bf16)
                ctx_scr[bi, :, c0:c0 + HD] = jnp.dot(p, v_b[:, c0:c0 + HD],
                                                     preferred_element_type=f32)
        ctx = ctx_scr[...].reshape(N, D).astype(bf16)
        return jnp.dot(ctx, w_o, preferred_element_type=f32) + b_o

    # ---- self attention (+ residual + norm1) ----
    xb = x.astype(bf16)
    qkv = (jnp.dot(xb, w_qkv_sa_ref[...], preferred_element_type=f32)
           + b_qkv_sa_ref[...]).astype(bf16)                        # fused (N, 3D) projection
    sa = attend(qkv[:, 0:D], qkv[:, D:2 * D], qkv[:, 2 * D:3 * D],
                w_o_sa_ref[...], b_o_sa_ref[...],
                lambda bi: bias_scr[bi], tq)
    x = layer_norm(x + sa, 0)

    # ---- cross attention (+ residual + norm2) ----
    xb = x.astype(bf16)
    q_ca = (jnp.dot(xb, w_q_ca_ref[...], preferred_element_type=f32)
            + b_q_ca_ref[...]).astype(bf16)                         # (N, D)
    kv = (jnp.dot(mem, w_kv_ca_ref[...], preferred_element_type=f32)
          + b_kv_ca_ref[...]).astype(bf16)                          # fused (BB*S, 2D)
    ca = attend(q_ca, kv[:, 0:D], kv[:, D:2 * D],
                w_o_ca_ref[...], b_o_ca_ref[...],
                lambda bi: mem_kpm_ref[bi], s_len)
    x = layer_norm(x + ca, 1)

    # ---- feed-forward (+ residual + norm3) ----
    xb = x.astype(bf16)
    h1 = jnp.maximum(jnp.dot(xb, w1_ref[...], preferred_element_type=f32) + b1_ref[...], 0.0)
    ff = jnp.dot(h1.astype(bf16), w2_ref[...], preferred_element_type=f32) + b2_ref[...]
    x = layer_norm(x + ff, 2)

    # Carry the activation to the next layer step; emit output on the last layer only.
    x_scr[...] = x

    @pl.when(layer == pl.num_programs(1) - 1)
    def _():
        out_ref[...] = x.reshape(bb, tq, D).astype(out_ref.dtype)


# ----------------------- generation-aware tuning helpers ---------------------

def _device_kind():
    try:
        return jax.devices()[0].device_kind.lower()
    except Exception:
        return ""


def _num_tensorcores_per_chip():
    kind = _device_kind()
    # v7x exposes 2 TensorCores per chip; v5e / v6e have 1.
    return 2 if ("v7" in kind or "7x" in kind) else 1


def _vmem_limit_bytes():
    cap = None
    try:
        cap = getattr(pltpu.get_tpu_info(), "vmem_capacity_bytes", None)
    except Exception:
        cap = None
    if not cap:
        kind = _device_kind()
        if "v7" in kind or "7x" in kind:
            cap = 64 * 1024 * 1024
        elif "v5" in kind or "v6" in kind:
            cap = 128 * 1024 * 1024
        else:
            cap = 64 * 1024 * 1024          # conservative default
    # leave headroom for Mosaic-internal scratch: ~48 MiB on v7x, ~112 MiB on v5e/v6e
    return int(max(cap - 16 * 1024 * 1024, cap * 3 // 4))


def _default_block_b(batch):
    """Largest batch block: full batch on 1-TC chips (maximal weight reuse);
    keep >= 2 batch blocks on 2-TC chips so both TensorCores get work."""
    n_tc = _num_tensorcores_per_chip()
    divisors = [d for d in range(1, batch + 1) if batch % d == 0]
    if n_tc >= 2:
        multi = [d for d in divisors if batch // d >= n_tc]
        if multi:
            divisors = multi
    return max(divisors)


# ------------------------- wrapper-side param packing ------------------------

def pack_decoder_params(layer_params, nhead):
    """Pre-transpose, fuse, pre-scale and stack per-layer params (weights in bf16)."""
    D = layer_params[0]["w_sa_out"].shape[0]
    scale = 1.0 / math.sqrt(D // nhead)
    wdt = jnp.bfloat16

    def pack_one(p):
        w_sa_in_t = p["w_sa_in"].T                       # (D, 3D), columns [q | k | v]
        w_qkv_sa = jnp.concatenate([w_sa_in_t[:, :D] * scale, w_sa_in_t[:, D:]], axis=1)
        b_qkv_sa = jnp.concatenate([p["b_sa_in"][:, :D] * scale, p["b_sa_in"][:, D:]], axis=1)
        w_ca_in_t = p["w_ca_in"].T                       # (D, 3D)
        return {
            "w_qkv_sa": w_qkv_sa.astype(wdt),
            "b_qkv_sa": b_qkv_sa.astype(jnp.float32),
            "w_o_sa":   p["w_sa_out"].T.astype(wdt),
            "b_o_sa":   p["b_sa_out"].astype(jnp.float32),
            "w_q_ca":   (w_ca_in_t[:, :D] * scale).astype(wdt),
            "b_q_ca":   (p["b_ca_in"][:, :D] * scale).astype(jnp.float32),
            "w_kv_ca":  w_ca_in_t[:, D:].astype(wdt),
            "b_kv_ca":  p["b_ca_in"][:, D:].astype(jnp.float32),
            "w_o_ca":   p["w_ca_out"].T.astype(wdt),
            "b_o_ca":   p["b_ca_out"].astype(jnp.float32),
            "w1":       p["w1"].T.astype(wdt),
            "b1":       p["b1"].astype(jnp.float32),
            "w2":       p["w2"].T.astype(wdt),
            "b2":       p["b2"].astype(jnp.float32),
            "ln_w":     p["ln_w"].astype(jnp.float32),
            "ln_b":     p["ln_b"].astype(jnp.float32),
        }

    per_layer = [pack_one(p) for p in layer_params]
    return {k: jnp.stack([lp[k] for lp in per_layer], axis=0) for k in STACKED_PARAM_ORDER}


def custom_transformer_decoder(tgt, memory, layer_params, tgt_mask, tgt_kpm, mem_kpm,
                               nhead, *, block_b=None):
    """Mirrors CustomTransformerDecoder.forward: the whole layer stack in one pallas_call."""
    B, T, D = tgt.shape
    S = memory.shape[1]
    L = len(layer_params)
    bb = _default_block_b(B) if block_b is None else block_b
    assert B % bb == 0, "block_b must divide the batch size"
    packed = pack_decoder_params(layer_params, nhead)
    FF = packed["w1"].shape[-1]

    kernel = functools.partial(_decoder_stack_kernel, nhead=nhead, d_model=D,
                               bb=bb, tq=T, s_len=S)

    def batch_spec(shape):
        return pl.BlockSpec(shape, lambda b, l: (b, 0, 0))

    def layer_spec(shape):
        return pl.BlockSpec((None,) + shape, lambda b, l: (l, 0, 0))

    in_specs = [
        batch_spec((bb, T, D)),                       # tgt (f32)
        batch_spec((bb, S, D)),                       # memory (bf16)
        pl.BlockSpec((T, T), lambda b, l: (0, 0)),    # tgt_mask (shared)
        batch_spec((bb, 1, T)),                       # tgt key-padding bias
        batch_spec((bb, 1, S)),                       # memory key-padding bias
        layer_spec((D, 3 * D)),                       # w_qkv_sa
        layer_spec((1, 3 * D)),                       # b_qkv_sa
        layer_spec((D, D)),                           # w_o_sa
        layer_spec((1, D)),                           # b_o_sa
        layer_spec((D, D)),                           # w_q_ca
        layer_spec((1, D)),                           # b_q_ca
        layer_spec((D, 2 * D)),                       # w_kv_ca
        layer_spec((1, 2 * D)),                       # b_kv_ca
        layer_spec((D, D)),                           # w_o_ca
        layer_spec((1, D)),                           # b_o_ca
        layer_spec((D, FF)),                          # w1
        layer_spec((1, FF)),                          # b1
        layer_spec((FF, D)),                          # w2
        layer_spec((1, D)),                           # b2
        layer_spec((3, D)),                           # ln_w
        layer_spec((3, D)),                           # ln_b
    ]

    return pl.pallas_call(
        kernel,
        out_shape=jax.ShapeDtypeStruct((B, T, D), tgt.dtype),
        grid=(B // bb, L),                            # (batch blocks, layers)
        in_specs=in_specs,
        out_specs=pl.BlockSpec((bb, T, D), lambda b, l: (b, 0, 0)),
        scratch_shapes=[
            pltpu.VMEM((bb * T, D), jnp.float32),     # activation carry
            pltpu.VMEM((bb, T, D), jnp.float32),      # per-head context (lane-packed)
            pltpu.VMEM((bb, T, T), jnp.float32),      # hoisted self-attn bias
        ],
        compiler_params=pltpu.CompilerParams(
            dimension_semantics=("parallel", "arbitrary"),
            vmem_limit_bytes=_vmem_limit_bytes()),
    )(tgt, memory.astype(jnp.bfloat16), tgt_mask, tgt_kpm, mem_kpm,
      *[packed[k] for k in STACKED_PARAM_ORDER])


# ------------------------- deterministic parameters --------------------------

def init_layer_params(key, d_model, dim_ff):
    ks = jax.random.split(key, 12)
    s = 0.02
    f32 = jnp.float32
    return {
        "w_sa_in":  jax.random.normal(ks[0], (3 * d_model, d_model), f32) * s,
        "b_sa_in":  jax.random.normal(ks[1], (1, 3 * d_model), f32) * s,
        "w_sa_out": jax.random.normal(ks[2], (d_model, d_model), f32) * s,
        "b_sa_out": jax.random.normal(ks[3], (1, d_model), f32) * s,
        "w_ca_in":  jax.random.normal(ks[4], (3 * d_model, d_model), f32) * s,
        "b_ca_in":  jax.random.normal(ks[5], (1, 3 * d_model), f32) * s,
        "w_ca_out": jax.random.normal(ks[6], (d_model, d_model), f32) * s,
        "b_ca_out": jax.random.normal(ks[7], (1, d_model), f32) * s,
        "w1":       jax.random.normal(ks[8], (dim_ff, d_model), f32) * s,
        "b1":       jax.random.normal(ks[9], (1, dim_ff), f32) * s,
        "w2":       jax.random.normal(ks[10], (d_model, dim_ff), f32) * s,
        "b2":       jax.random.normal(ks[11], (1, d_model), f32) * s,
        "ln_w":     jnp.ones((3, d_model), f32),
        "ln_b":     jnp.zeros((3, d_model), f32),
    }


# ----------------------------- pure-JAX reference ----------------------------

def ref_layer(tgt, memory, tgt_mask, tgt_kpm, mem_kpm, p, nhead):
    D = tgt.shape[-1]
    HD = D // nhead

    def ln(v, w, b):
        mu = v.mean(-1, keepdims=True)
        var = ((v - mu) ** 2).mean(-1, keepdims=True)
        return (v - mu) / jnp.sqrt(var + 1e-5) * w + b

    def mha(q_in, kv_in, w_in, b_in, w_out, b_out, bias):
        B, Tq, _ = q_in.shape
        Tk = kv_in.shape[1]
        q = q_in @ w_in[:D].T + b_in[0, :D]
        k = kv_in @ w_in[D:2 * D].T + b_in[0, D:2 * D]
        v = kv_in @ w_in[2 * D:].T + b_in[0, 2 * D:]
        qh = q.reshape(B, Tq, nhead, HD).transpose(0, 2, 1, 3)
        kh = k.reshape(B, Tk, nhead, HD).transpose(0, 2, 1, 3)
        vh = v.reshape(B, Tk, nhead, HD).transpose(0, 2, 1, 3)
        s = qh @ kh.transpose(0, 1, 3, 2) / math.sqrt(HD) + bias[:, None, :, :]
        pattn = jax.nn.softmax(s, axis=-1)
        o = (pattn @ vh).transpose(0, 2, 1, 3).reshape(B, Tq, D)
        return o @ w_out.T + b_out[0]

    B, T, _ = tgt.shape
    S = memory.shape[1]
    bias_self = tgt_mask[None] + tgt_kpm
    bias_cross = jnp.zeros((B, T, S), jnp.float32) + mem_kpm

    x = tgt
    sa = mha(x, x, p["w_sa_in"], p["b_sa_in"], p["w_sa_out"], p["b_sa_out"], bias_self)
    x = ln(x + sa, p["ln_w"][0], p["ln_b"][0])
    ca = mha(x, memory, p["w_ca_in"], p["b_ca_in"], p["w_ca_out"], p["b_ca_out"], bias_cross)
    x = ln(x + ca, p["ln_w"][1], p["ln_b"][1])
    ff = jnp.maximum(x @ p["w1"].T + p["b1"][0], 0.0) @ p["w2"].T + p["b2"][0]
    x = ln(x + ff, p["ln_w"][2], p["ln_b"][2])
    return x


# ----------------------------------- main ------------------------------------

if __name__ == "__main__":
    B, T, S, D, FF, H, L = 2, 8, 8, 32, 64, 4, 2

    key = jax.random.PRNGKey(0)
    k_tgt, k_mem, k_p = jax.random.split(key, 3)

    tgt = jax.random.normal(k_tgt, (B, T, D), jnp.float32)
    memory = jax.random.normal(k_mem, (B, S, D), jnp.float32)

    # causal tgt_mask (additive), no key padding (zeros)
    tgt_mask = jnp.where(jnp.triu(jnp.ones((T, T), bool), k=1), -1e9, 0.0).astype(jnp.float32)
    tgt_kpm = jnp.zeros((B, 1, T), jnp.float32)
    mem_kpm = jnp.zeros((B, 1, S), jnp.float32)

    layer_params = [init_layer_params(k, D, FF) for k in jax.random.split(k_p, L)]

    out = custom_transformer_decoder(tgt, memory, layer_params, tgt_mask, tgt_kpm,
                                     mem_kpm, H)
    out = jax.block_until_ready(out)

    # sanity check against the pure-JAX f32 reference (kernel uses bf16 matmul operands)
    ref = tgt
    for p in layer_params:
        ref = ref_layer(ref, memory, tgt_mask, tgt_kpm, mem_kpm, p, H)
    err = float(jnp.max(jnp.abs(out - ref)))
    assert jnp.allclose(out, ref, rtol=2e-2, atol=2e-2), f"max abs err = {err}"

    print("KERNEL_OK")
</pallas_src>

<mosaic_0001>
module attributes {stable_mosaic.version = 11 : i64} {
  func.func @_decoder_stack_kernel(%arg0: i32, %arg1: i32, %arg2: memref<2x8x32xf32, #tpu.memory_space<vmem>>, %arg3: memref<2x8x32xbf16, #tpu.memory_space<vmem>>, %arg4: memref<8x8xf32, #tpu.memory_space<vmem>>, %arg5: memref<2x1x8xf32, #tpu.memory_space<vmem>>, %arg6: memref<2x1x8xf32, #tpu.memory_space<vmem>>, %arg7: memref<1x32x96xbf16, #tpu.memory_space<vmem>>, %arg8: memref<1x1x96xf32, #tpu.memory_space<vmem>>, %arg9: memref<1x32x32xbf16, #tpu.memory_space<vmem>>, %arg10: memref<1x1x32xf32, #tpu.memory_space<vmem>>, %arg11: memref<1x32x32xbf16, #tpu.memory_space<vmem>>, %arg12: memref<1x1x32xf32, #tpu.memory_space<vmem>>, %arg13: memref<1x32x64xbf16, #tpu.memory_space<vmem>>, %arg14: memref<1x1x64xf32, #tpu.memory_space<vmem>>, %arg15: memref<1x32x32xbf16, #tpu.memory_space<vmem>>, %arg16: memref<1x1x32xf32, #tpu.memory_space<vmem>>, %arg17: memref<1x32x64xbf16, #tpu.memory_space<vmem>>, %arg18: memref<1x1x64xf32, #tpu.memory_space<vmem>>, %arg19: memref<1x64x32xbf16, #tpu.memory_space<vmem>>, %arg20: memref<1x1x32xf32, #tpu.memory_space<vmem>>, %arg21: memref<1x3x32xf32, #tpu.memory_space<vmem>>, %arg22: memref<1x3x32xf32, #tpu.memory_space<vmem>>, %arg23: memref<2x8x32xf32, #tpu.memory_space<vmem>>, %arg24: memref<16x32xf32, #tpu.memory_space<vmem>>, %arg25: memref<2x8x32xf32, #tpu.memory_space<vmem>>, %arg26: memref<2x8x8xf32, #tpu.memory_space<vmem>>) attributes {dimension_semantics = [#tpu.dimension_semantics<parallel>, #tpu.dimension_semantics<arbitrary>], iteration_bounds = array<i64: 1, 2>, scalar_prefetch = 0 : i64, scratch_operands = 3 : i64, tpu.core_type = #tpu.core_type<tc>, window_params = [{transform_indices = @transform_0, window_bounds = array<i64: 2, 8, 32>}, {transform_indices = @transform_1, window_bounds = array<i64: 2, 8, 32>}, {pipeline_mode = #tpu.pipeline_mode<synchronous>, transform_indices = @transform_2, window_bounds = array<i64: 8, 8>}, {transform_indices = @transform_3, window_bounds = array<i64: 2, 1, 8>}, {transform_indices = @transform_4, window_bounds = array<i64: 2, 1, 8>}, {transform_indices = @transform_5, window_bounds = array<i64: 1, 32, 96>}, {transform_indices = @transform_6, window_bounds = array<i64: 1, 1, 96>}, {transform_indices = @transform_7, window_bounds = array<i64: 1, 32, 32>}, {transform_indices = @transform_8, window_bounds = array<i64: 1, 1, 32>}, {transform_indices = @transform_9, window_bounds = array<i64: 1, 32, 32>}, {transform_indices = @transform_10, window_bounds = array<i64: 1, 1, 32>}, {transform_indices = @transform_11, window_bounds = array<i64: 1, 32, 64>}, {transform_indices = @transform_12, window_bounds = array<i64: 1, 1, 64>}, {transform_indices = @transform_13, window_bounds = array<i64: 1, 32, 32>}, {transform_indices = @transform_14, window_bounds = array<i64: 1, 1, 32>}, {transform_indices = @transform_15, window_bounds = array<i64: 1, 32, 64>}, {transform_indices = @transform_16, window_bounds = array<i64: 1, 1, 64>}, {transform_indices = @transform_17, window_bounds = array<i64: 1, 64, 32>}, {transform_indices = @transform_18, window_bounds = array<i64: 1, 1, 32>}, {transform_indices = @transform_19, window_bounds = array<i64: 1, 3, 32>}, {transform_indices = @transform_20, window_bounds = array<i64: 1, 3, 32>}, {transform_indices = @transform_21, window_bounds = array<i64: 2, 8, 32>}]} {
    %c0_i32 = arith.constant 0 : i32
    %0 = arith.cmpi eq, %arg1, %c0_i32 : i32
    %1 = arith.extui %0 : i1 to i32
    %c0_i32_0 = arith.constant 0 : i32
    %2 = arith.cmpi ne, %1, %c0_i32_0 : i32
    scf.if %2 {
      %c0_215 = arith.constant 0 : index
      %c0_216 = arith.constant 0 : index
      %c0_217 = arith.constant 0 : index
      %508 = vector.load %arg2[%c0_215, %c0_216, %c0_217] : memref<2x8x32xf32, #tpu.memory_space<vmem>>, vector<2x8x32xf32>
      %509 = vector.shape_cast %508 : vector<2x8x32xf32> to vector<16x32xf32>
      %c0_218 = arith.constant 0 : index
      %c0_219 = arith.constant 0 : index
      %510 = vector.load %arg24[%c0_218, %c0_219] : memref<16x32xf32, #tpu.memory_space<vmem>>, vector<16x32xf32>
      tpu.vector_store %arg24[%c0_218, %c0_219], %509 {strides = array<i32>} : memref<16x32xf32, #tpu.memory_space<vmem>>, vector<16x32xf32>,
      %c0_220 = arith.constant 0 : index
      %c0_221 = arith.constant 0 : index
      %511 = vector.load %arg4[%c0_220, %c0_221] : memref<8x8xf32, #tpu.memory_space<vmem>>, vector<8x8xf32>
      %512 = vector.shape_cast %511 : vector<8x8xf32> to vector<1x8x8xf32>
      %c0_222 = arith.constant 0 : index
      %c0_223 = arith.constant 0 : index
      %c0_224 = arith.constant 0 : index
      %513 = vector.load %arg5[%c0_222, %c0_223, %c0_224] : memref<2x1x8xf32, #tpu.memory_space<vmem>>, vector<2x1x8xf32>
      %514 = vector.broadcast %512 : vector<1x8x8xf32> to vector<2x8x8xf32>
      %515 = vector.broadcast %513 : vector<2x1x8xf32> to vector<2x8x8xf32>
      %516 = arith.addf %514, %515 : vector<2x8x8xf32>
      %c0_225 = arith.constant 0 : index
      %c0_226 = arith.constant 0 : index
      %c0_227 = arith.constant 0 : index
      %517 = vector.load %arg26[%c0_225, %c0_226, %c0_227] : memref<2x8x8xf32, #tpu.memory_space<vmem>>, vector<2x8x8xf32>
      tpu.vector_store %arg26[%c0_225, %c0_226, %c0_227], %516 {strides = array<i32>} : memref<2x8x8xf32, #tpu.memory_space<vmem>>, vector<2x8x8xf32>,
    } else {
    }
    %c0 = arith.constant 0 : index
    %c0_1 = arith.constant 0 : index
    %3 = vector.load %arg24[%c0, %c0_1] : memref<16x32xf32, #tpu.memory_space<vmem>>, vector<16x32xf32>
    %c0_2 = arith.constant 0 : index
    %c0_3 = arith.constant 0 : index
    %c0_4 = arith.constant 0 : index
    %4 = vector.load %arg3[%c0_2, %c0_3, %c0_4] : memref<2x8x32xbf16, #tpu.memory_space<vmem>>, vector<2x8x32xbf16>
    %5 = vector.shape_cast %4 : vector<2x8x32xbf16> to vector<16x32xbf16>
    %6 = arith.truncf %3 : vector<16x32xf32> to vector<16x32xbf16>
    %c0_5 = arith.constant 0 : index
    %c0_6 = arith.constant 0 : index
    %c0_7 = arith.constant 0 : index
    %7 = vector.load %arg7[%c0_5, %c0_6, %c0_7] : memref<1x32x96xbf16, #tpu.memory_space<vmem>>, vector<1x32x96xbf16>
    %8 = vector.shape_cast %7 : vector<1x32x96xbf16> to vector<32x96xbf16>
    %cst = arith.constant dense<0.000000e+00> : vector<16x96xf32>
    %9 = tpu.matmul %6, %8, %cst {dimension_numbers = #tpu.dot_dimension_numbers<[1], [0], [0], [1], [0, 0, 1, 1], [], []>} : vector<16x32xbf16>, vector<32x96xbf16>, vector<16x96xf32> -> vector<16x96xf32>
    %c0_8 = arith.constant 0 : index
    %c0_9 = arith.constant 0 : index
    %c0_10 = arith.constant 0 : index
    %10 = vector.load %arg8[%c0_8, %c0_9, %c0_10] : memref<1x1x96xf32, #tpu.memory_space<vmem>>, vector<1x1x96xf32>
    %11 = vector.shape_cast %10 : vector<1x1x96xf32> to vector<1x96xf32>
    %12 = vector.broadcast %11 : vector<1x96xf32> to vector<16x96xf32>
    %13 = arith.addf %9, %12 : vector<16x96xf32>
    %14 = arith.truncf %13 : vector<16x96xf32> to vector<16x96xbf16>
    %15 = vector.extract_strided_slice %14 {offsets = [0, 0], sizes = [16, 32], strides = [1, 1]} : vector<16x96xbf16> to vector<16x32xbf16>
    %16 = vector.extract_strided_slice %14 {offsets = [0, 32], sizes = [16, 32], strides = [1, 1]} : vector<16x96xbf16> to vector<16x32xbf16>
    %17 = vector.extract_strided_slice %14 {offsets = [0, 64], sizes = [16, 32], strides = [1, 1]} : vector<16x96xbf16> to vector<16x32xbf16>
    %c0_11 = arith.constant 0 : index
    %c0_12 = arith.constant 0 : index
    %c0_13 = arith.constant 0 : index
    %18 = vector.load %arg9[%c0_11, %c0_12, %c0_13] : memref<1x32x32xbf16, #tpu.memory_space<vmem>>, vector<1x32x32xbf16>
    %19 = vector.shape_cast %18 : vector<1x32x32xbf16> to vector<32x32xbf16>
    %c0_14 = arith.constant 0 : index
    %c0_15 = arith.constant 0 : index
    %c0_16 = arith.constant 0 : index
    %20 = vector.load %arg10[%c0_14, %c0_15, %c0_16] : memref<1x1x32xf32, #tpu.memory_space<vmem>>, vector<1x1x32xf32>
    %21 = vector.shape_cast %20 : vector<1x1x32xf32> to vector<1x32xf32>
    %c0_17 = arith.constant 0 : index
    %c0_18 = arith.constant 0 : index
    %c0_19 = arith.constant 0 : index
    %22 = vector.load %arg26[%c0_17, %c0_18, %c0_19] : memref<2x8x8xf32, #tpu.memory_space<vmem>>, vector<1x8x8xf32>
    %23 = vector.shape_cast %22 : vector<1x8x8xf32> to vector<8x8xf32>
    %24 = vector.extract_strided_slice %15 {offsets = [0, 0], sizes = [8, 32], strides = [1, 1]} : vector<16x32xbf16> to vector<8x32xbf16>
    %25 = vector.extract_strided_slice %16 {offsets = [0, 0], sizes = [8, 32], strides = [1, 1]} : vector<16x32xbf16> to vector<8x32xbf16>
    %26 = vector.extract_strided_slice %17 {offsets = [0, 0], sizes = [8, 32], strides = [1, 1]} : vector<16x32xbf16> to vector<8x32xbf16>
    %27 = vector.extract_strided_slice %24 {offsets = [0, 0], sizes = [8, 8], strides = [1, 1]} : vector<8x32xbf16> to vector<8x8xbf16>
    %28 = vector.extract_strided_slice %25 {offsets = [0, 0], sizes = [8, 8], strides = [1, 1]} : vector<8x32xbf16> to vector<8x8xbf16>
    "tpu.trace_start"() <{level = 10 : i32, message = "qc,kc->qk"}> : () -> ()
    %cst_20 = arith.constant dense<0.000000e+00> : vector<8x8xf32>
    %29 = tpu.matmul %27, %28, %cst_20 {dimension_numbers = #tpu.dot_dimension_numbers<[1], [1], [0], [0], [0, 0, 1, 0], [], []>} : vector<8x8xbf16>, vector<8x8xbf16>, vector<8x8xf32> -> vector<8x8xf32>
    "tpu.trace_stop"() : () -> ()
    %30 = arith.addf %29, %23 : vector<8x8xf32>
    %cst_21 = arith.constant dense<0xFF800000> : vector<8xf32>
    %31 = vector.multi_reduction <maximumf>, %30, %cst_21 [1] : vector<8x8xf32> to vector<8xf32>
    %32 = vector.shape_cast %31 : vector<8xf32> to vector<8x1xf32>
    %33 = vector.broadcast %32 : vector<8x1xf32> to vector<8x8xf32>
    %34 = arith.subf %30, %33 : vector<8x8xf32>
    %35 = math.exp %34 : vector<8x8xf32>
    %cst_22 = arith.constant dense<0.000000e+00> : vector<8xf32>
    %36 = vector.multi_reduction <add>, %35, %cst_22 [1] : vector<8x8xf32> to vector<8xf32>
    %37 = vector.shape_cast %36 : vector<8xf32> to vector<8x1xf32>
    %38 = tpu.reciprocal %37 {approx = true} : vector<8x1xf32> -> vector<8x1xf32>
    %39 = vector.broadcast %38 : vector<8x1xf32> to vector<8x8xf32>
    %40 = arith.mulf %35, %39 : vector<8x8xf32>
    %41 = arith.truncf %40 : vector<8x8xf32> to vector<8x8xbf16>
    %42 = vector.extract_strided_slice %26 {offsets = [0, 0], sizes = [8, 8], strides = [1, 1]} : vector<8x32xbf16> to vector<8x8xbf16>
    %cst_23 = arith.constant dense<0.000000e+00> : vector<8x8xf32>
    %43 = tpu.matmul %41, %42, %cst_23 {dimension_numbers = #tpu.dot_dimension_numbers<[1], [0], [0], [1], [0, 0, 1, 1], [], []>} : vector<8x8xbf16>, vector<8x8xbf16>, vector<8x8xf32> -> vector<8x8xf32>
    %c0_24 = arith.constant 0 : index
    %c0_25 = arith.constant 0 : index
    %c0_26 = arith.constant 0 : index
    %44 = vector.load %arg25[%c0_24, %c0_25, %c0_26] : memref<2x8x32xf32, #tpu.memory_space<vmem>>, vector<1x8x8xf32>
    %45 = vector.shape_cast %44 : vector<1x8x8xf32> to vector<8x8xf32>
    %46 = vector.shape_cast %43 : vector<8x8xf32> to vector<1x8x8xf32>
    tpu.vector_store %arg25[%c0_24, %c0_25, %c0_26], %46 {strides = array<i32>} : memref<2x8x32xf32, #tpu.memory_space<vmem>>, vector<1x8x8xf32>,
    %47 = vector.extract_strided_slice %24 {offsets = [0, 8], sizes = [8, 8], strides = [1, 1]} : vector<8x32xbf16> to vector<8x8xbf16>
    %48 = vector.extract_strided_slice %25 {offsets = [0, 8], sizes = [8, 8], strides = [1, 1]} : vector<8x32xbf16> to vector<8x8xbf16>
    "tpu.trace_start"() <{level = 10 : i32, message = "qc,kc->qk"}> : () -> ()
    %cst_27 = arith.constant dense<0.000000e+00> : vector<8x8xf32>
    %49 = tpu.matmul %47, %48, %cst_27 {dimension_numbers = #tpu.dot_dimension_numbers<[1], [1], [0], [0], [0, 0, 1, 0], [], []>} : vector<8x8xbf16>, vector<8x8xbf16>, vector<8x8xf32> -> vector<8x8xf32>
    "tpu.trace_stop"() : () -> ()
    %50 = arith.addf %49, %23 : vector<8x8xf32>
    %cst_28 = arith.constant dense<0xFF800000> : vector<8xf32>
    %51 = vector.multi_reduction <maximumf>, %50, %cst_28 [1] : vector<8x8xf32> to vector<8xf32>
    %52 = vector.shape_cast %51 : vector<8xf32> to vector<8x1xf32>
    %53 = vector.broadcast %52 : vector<8x1xf32> to vector<8x8xf32>
    %54 = arith.subf %50, %53 : vector<8x8xf32>
    %55 = math.exp %54 : vector<8x8xf32>
    %cst_29 = arith.constant dense<0.000000e+00> : vector<8xf32>
    %56 = vector.multi_reduction <add>, %55, %cst_29 [1] : vector<8x8xf32> to vector<8xf32>
    %57 = vector.shape_cast %56 : vector<8xf32> to vector<8x1xf32>
    %58 = tpu.reciprocal %57 {approx = true} : vector<8x1xf32> -> vector<8x1xf32>
    %59 = vector.broadcast %58 : vector<8x1xf32> to vector<8x8xf32>
    %60 = arith.mulf %55, %59 : vector<8x8xf32>
    %61 = arith.truncf %60 : vector<8x8xf32> to vector<8x8xbf16>
    %62 = vector.extract_strided_slice %26 {offsets = [0, 8], sizes = [8, 8], strides = [1, 1]} : vector<8x32xbf16> to vector<8x8xbf16>
    %cst_30 = arith.constant dense<0.000000e+00> : vector<8x8xf32>
    %63 = tpu.matmul %61, %62, %cst_30 {dimension_numbers = #tpu.dot_dimension_numbers<[1], [0], [0], [1], [0, 0, 1, 1], [], []>} : vector<8x8xbf16>, vector<8x8xbf16>, vector<8x8xf32> -> vector<8x8xf32>
    %c0_31 = arith.constant 0 : index
    %c0_32 = arith.constant 0 : index
    %c8 = arith.constant 8 : index
    %64 = vector.load %arg25[%c0_31, %c0_32, %c8] : memref<2x8x32xf32, #tpu.memory_space<vmem>>, vector<1x8x8xf32>
    %65 = vector.shape_cast %64 : vector<1x8x8xf32> to vector<8x8xf32>
    %66 = vector.shape_cast %63 : vector<8x8xf32> to vector<1x8x8xf32>
    tpu.vector_store %arg25[%c0_31, %c0_32, %c8], %66 {strides = array<i32>} : memref<2x8x32xf32, #tpu.memory_space<vmem>>, vector<1x8x8xf32>,
    %67 = vector.extract_strided_slice %24 {offsets = [0, 16], sizes = [8, 8], strides = [1, 1]} : vector<8x32xbf16> to vector<8x8xbf16>
    %68 = vector.extract_strided_slice %25 {offsets = [0, 16], sizes = [8, 8], strides = [1, 1]} : vector<8x32xbf16> to vector<8x8xbf16>
    "tpu.trace_start"() <{level = 10 : i32, message = "qc,kc->qk"}> : () -> ()
    %cst_33 = arith.constant dense<0.000000e+00> : vector<8x8xf32>
    %69 = tpu.matmul %67, %68, %cst_33 {dimension_numbers = #tpu.dot_dimension_numbers<[1], [1], [0], [0], [0, 0, 1, 0], [], []>} : vector<8x8xbf16>, vector<8x8xbf16>, vector<8x8xf32> -> vector<8x8xf32>
    "tpu.trace_stop"() : () -> ()
    %70 = arith.addf %69, %23 : vector<8x8xf32>
    %cst_34 = arith.constant dense<0xFF800000> : vector<8xf32>
    %71 = vector.multi_reduction <maximumf>, %70, %cst_34 [1] : vector<8x8xf32> to vector<8xf32>
    %72 = vector.shape_cast %71 : vector<8xf32> to vector<8x1xf32>
    %73 = vector.broadcast %72 : vector<8x1xf32> to vector<8x8xf32>
    %74 = arith.subf %70, %73 : vector<8x8xf32>
    %75 = math.exp %74 : vector<8x8xf32>
    %cst_35 = arith.constant dense<0.000000e+00> : vector<8xf32>
    %76 = vector.multi_reduction <add>, %75, %cst_35 [1] : vector<8x8xf32> to vector<8xf32>
    %77 = vector.shape_cast %76 : vector<8xf32> to vector<8x1xf32>
    %78 = tpu.reciprocal %77 {approx = true} : vector<8x1xf32> -> vector<8x1xf32>
    %79 = vector.broadcast %78 : vector<8x1xf32> to vector<8x8xf32>
    %80 = arith.mulf %75, %79 : vector<8x8xf32>
    %81 = arith.truncf %80 : vector<8x8xf32> to vector<8x8xbf16>
    %82 = vector.extract_strided_slice %26 {offsets = [0, 16], sizes = [8, 8], strides = [1, 1]} : vector<8x32xbf16> to vector<8x8xbf16>
    %cst_36 = arith.constant dense<0.000000e+00> : vector<8x8xf32>
    %83 = tpu.matmul %81, %82, %cst_36 {dimension_numbers = #tpu.dot_dimension_numbers<[1], [0], [0], [1], [0, 0, 1, 1], [], []>} : vector<8x8xbf16>, vector<8x8xbf16>, vector<8x8xf32> -> vector<8x8xf32>
    %c0_37 = arith.constant 0 : index
    %c0_38 = arith.constant 0 : index
    %c16 = arith.constant 16 : index
    %84 = vector.load %arg25[%c0_37, %c0_38, %c16] : memref<2x8x32xf32, #tpu.memory_space<vmem>>, vector<1x8x8xf32>
    %85 = vector.shape_cast %84 : vector<1x8x8xf32> to vector<8x8xf32>
    %86 = vector.shape_cast %83 : vector<8x8xf32> to vector<1x8x8xf32>
    tpu.vector_store %arg25[%c0_37, %c0_38, %c16], %86 {strides = array<i32>} : memref<2x8x32xf32, #tpu.memory_space<vmem>>, vector<1x8x8xf32>,
    %87 = vector.extract_strided_slice %24 {offsets = [0, 24], sizes = [8, 8], strides = [1, 1]} : vector<8x32xbf16> to vector<8x8xbf16>
    %88 = vector.extract_strided_slice %25 {offsets = [0, 24], sizes = [8, 8], strides = [1, 1]} : vector<8x32xbf16> to vector<8x8xbf16>
    "tpu.trace_start"() <{level = 10 : i32, message = "qc,kc->qk"}> : () -> ()
    %cst_39 = arith.constant dense<0.000000e+00> : vector<8x8xf32>
    %89 = tpu.matmul %87, %88, %cst_39 {dimension_numbers = #tpu.dot_dimension_numbers<[1], [1], [0], [0], [0, 0, 1, 0], [], []>} : vector<8x8xbf16>, vector<8x8xbf16>, vector<8x8xf32> -> vector<8x8xf32>
    "tpu.trace_stop"() : () -> ()
    %90 = arith.addf %89, %23 : vector<8x8xf32>
    %cst_40 = arith.constant dense<0xFF800000> : vector<8xf32>
    %91 = vector.multi_reduction <maximumf>, %90, %cst_40 [1] : vector<8x8xf32> to vector<8xf32>
    %92 = vector.shape_cast %91 : vector<8xf32> to vector<8x1xf32>
    %93 = vector.broadcast %92 : vector<8x1xf32> to vector<8x8xf32>
    %94 = arith.subf %90, %93 : vector<8x8xf32>
    %95 = math.exp %94 : vector<8x8xf32>
    %cst_41 = arith.constant dense<0.000000e+00> : vector<8xf32>
    %96 = vector.multi_reduction <add>, %95, %cst_41 [1] : vector<8x8xf32> to vector<8xf32>
    %97 = vector.shape_cast %96 : vector<8xf32> to vector<8x1xf32>
    %98 = tpu.reciprocal %97 {approx = true} : vector<8x1xf32> -> vector<8x1xf32>
    %99 = vector.broadcast %98 : vector<8x1xf32> to vector<8x8xf32>
    %100 = arith.mulf %95, %99 : vector<8x8xf32>
    %101 = arith.truncf %100 : vector<8x8xf32> to vector<8x8xbf16>
    %102 = vector.extract_strided_slice %26 {offsets = [0, 24], sizes = [8, 8], strides = [1, 1]} : vector<8x32xbf16> to vector<8x8xbf16>
    %cst_42 = arith.constant dense<0.000000e+00> : vector<8x8xf32>
    %103 = tpu.matmul %101, %102, %cst_42 {dimension_numbers = #tpu.dot_dimension_numbers<[1], [0], [0], [1], [0, 0, 1, 1], [], []>} : vector<8x8xbf16>, vector<8x8xbf16>, vector<8x8xf32> -> vector<8x8xf32>
    %c0_43 = arith.constant 0 : index
    %c0_44 = arith.constant 0 : index
    %c24 = arith.constant 24 : index
    %104 = vector.load %arg25[%c0_43, %c0_44, %c24] : memref<2x8x32xf32, #tpu.memory_space<vmem>>, vector<1x8x8xf32>
    %105 = vector.shape_cast %104 : vector<1x8x8xf32> to vector<8x8xf32>
    %106 = vector.shape_cast %103 : vector<8x8xf32> to vector<1x8x8xf32>
    tpu.vector_store %arg25[%c0_43, %c0_44, %c24], %106 {strides = array<i32>} : memref<2x8x32xf32, #tpu.memory_space<vmem>>, vector<1x8x8xf32>,
    %c1 = arith.constant 1 : index
    %c0_45 = arith.constant 0 : index
    %c0_46 = arith.constant 0 : index
    %107 = vector.load %arg26[%c1, %c0_45, %c0_46] : memref<2x8x8xf32, #tpu.memory_space<vmem>>, vector<1x8x8xf32>
    %108 = vector.shape_cast %107 : vector<1x8x8xf32> to vector<8x8xf32>
    %109 = vector.extract_strided_slice %15 {offsets = [8, 0], sizes = [8, 32], strides = [1, 1]} : vector<16x32xbf16> to vector<8x32xbf16>
    %110 = vector.extract_strided_slice %16 {offsets = [8, 0], sizes = [8, 32], strides = [1, 1]} : vector<16x32xbf16> to vector<8x32xbf16>
    %111 = vector.extract_strided_slice %17 {offsets = [8, 0], sizes = [8, 32], strides = [1, 1]} : vector<16x32xbf16> to vector<8x32xbf16>
    %112 = vector.extract_strided_slice %109 {offsets = [0, 0], sizes = [8, 8], strides = [1, 1]} : vector<8x32xbf16> to vector<8x8xbf16>
    %113 = vector.extract_strided_slice %110 {offsets = [0, 0], sizes = [8, 8], strides = [1, 1]} : vector<8x32xbf16> to vector<8x8xbf16>
    "tpu.trace_start"() <{level = 10 : i32, message = "qc,kc->qk"}> : () -> ()
    %cst_47 = arith.constant dense<0.000000e+00> : vector<8x8xf32>
    %114 = tpu.matmul %112, %113, %cst_47 {dimension_numbers = #tpu.dot_dimension_numbers<[1], [1], [0], [0], [0, 0, 1, 0], [], []>} : vector<8x8xbf16>, vector<8x8xbf16>, vector<8x8xf32> -> vector<8x8xf32>
    "tpu.trace_stop"() : () -> ()
    %115 = arith.addf %114, %108 : vector<8x8xf32>
    %cst_48 = arith.constant dense<0xFF800000> : vector<8xf32>
    %116 = vector.multi_reduction <maximumf>, %115, %cst_48 [1] : vector<8x8xf32> to vector<8xf32>
    %117 = vector.shape_cast %116 : vector<8xf32> to vector<8x1xf32>
    %118 = vector.broadcast %117 : vector<8x1xf32> to vector<8x8xf32>
    %119 = arith.subf %115, %118 : vector<8x8xf32>
    %120 = math.exp %119 : vector<8x8xf32>
    %cst_49 = arith.constant dense<0.000000e+00> : vector<8xf32>
    %121 = vector.multi_reduction <add>, %120, %cst_49 [1] : vector<8x8xf32> to vector<8xf32>
    %122 = vector.shape_cast %121 : vector<8xf32> to vector<8x1xf32>
    %123 = tpu.reciprocal %122 {approx = true} : vector<8x1xf32> -> vector<8x1xf32>
    %124 = vector.broadcast %123 : vector<8x1xf32> to vector<8x8xf32>
    %125 = arith.mulf %120, %124 : vector<8x8xf32>
    %126 = arith.truncf %125 : vector<8x8xf32> to vector<8x8xbf16>
    %127 = vector.extract_strided_slice %111 {offsets = [0, 0], sizes = [8, 8], strides = [1, 1]} : vector<8x32xbf16> to vector<8x8xbf16>
    %cst_50 = arith.constant dense<0.000000e+00> : vector<8x8xf32>
    %128 = tpu.matmul %126, %127, %cst_50 {dimension_numbers = #tpu.dot_dimension_numbers<[1], [0], [0], [1], [0, 0, 1, 1], [], []>} : vector<8x8xbf16>, vector<8x8xbf16>, vector<8x8xf32> -> vector<8x8xf32>
    %c1_51 = arith.constant 1 : index
    %c0_52 = arith.constant 0 : index
    %c0_53 = arith.constant 0 : index
    %129 = vector.load %arg25[%c1_51, %c0_52, %c0_53] : memref<2x8x32xf32, #tpu.memory_space<vmem>>, vector<1x8x8xf32>
    %130 = vector.shape_cast %129 : vector<1x8x8xf32> to vector<8x8xf32>
    %131 = vector.shape_cast %128 : vector<8x8xf32> to vector<1x8x8xf32>
    tpu.vector_store %arg25[%c1_51, %c0_52, %c0_53], %131 {strides = array<i32>} : memref<2x8x32xf32, #tpu.memory_space<vmem>>, vector<1x8x8xf32>,
    %132 = vector.extract_strided_slice %109 {offsets = [0, 8], sizes = [8, 8], strides = [1, 1]} : vector<8x32xbf16> to vector<8x8xbf16>
    %133 = vector.extract_strided_slice %110 {offsets = [0, 8], sizes = [8, 8], strides = [1, 1]} : vector<8x32xbf16> to vector<8x8xbf16>
    "tpu.trace_start"() <{level = 10 : i32, message = "qc,kc->qk"}> : () -> ()
    %cst_54 = arith.constant dense<0.000000e+00> : vector<8x8xf32>
    %134 = tpu.matmul %132, %133, %cst_54 {dimension_numbers = #tpu.dot_dimension_numbers<[1], [1], [0], [0], [0, 0, 1, 0], [], []>} : vector<8x8xbf16>, vector<8x8xbf16>, vector<8x8xf32> -> vector<8x8xf32>
    "tpu.trace_stop"() : () -> ()
    %135 = arith.addf %134, %108 : vector<8x8xf32>
    %cst_55 = arith.constant dense<0xFF800000> : vector<8xf32>
    %136 = vector.multi_reduction <maximumf>, %135, %cst_55 [1] : vector<8x8xf32> to vector<8xf32>
    %137 = vector.shape_cast %136 : vector<8xf32> to vector<8x1xf32>
    %138 = vector.broadcast %137 : vector<8x1xf32> to vector<8x8xf32>
    %139 = arith.subf %135, %138 : vector<8x8xf32>
    %140 = math.exp %139 : vector<8x8xf32>
    %cst_56 = arith.constant dense<0.000000e+00> : vector<8xf32>
    %141 = vector.multi_reduction <add>, %140, %cst_56 [1] : vector<8x8xf32> to vector<8xf32>
    %142 = vector.shape_cast %141 : vector<8xf32> to vector<8x1xf32>
    %143 = tpu.reciprocal %142 {approx = true} : vector<8x1xf32> -> vector<8x1xf32>
    %144 = vector.broadcast %143 : vector<8x1xf32> to vector<8x8xf32>
    %145 = arith.mulf %140, %144 : vector<8x8xf32>
    %146 = arith.truncf %145 : vector<8x8xf32> to vector<8x8xbf16>
    %147 = vector.extract_strided_slice %111 {offsets = [0, 8], sizes = [8, 8], strides = [1, 1]} : vector<8x32xbf16> to vector<8x8xbf16>
    %cst_57 = arith.constant dense<0.000000e+00> : vector<8x8xf32>
    %148 = tpu.matmul %146, %147, %cst_57 {dimension_numbers = #tpu.dot_dimension_numbers<[1], [0], [0], [1], [0, 0, 1, 1], [], []>} : vector<8x8xbf16>, vector<8x8xbf16>, vector<8x8xf32> -> vector<8x8xf32>
    %c1_58 = arith.constant 1 : index
    %c0_59 = arith.constant 0 : index
    %c8_60 = arith.constant 8 : index
    %149 = vector.load %arg25[%c1_58, %c0_59, %c8_60] : memref<2x8x32xf32, #tpu.memory_space<vmem>>, vector<1x8x8xf32>
    %150 = vector.shape_cast %149 : vector<1x8x8xf32> to vector<8x8xf32>
    %151 = vector.shape_cast %148 : vector<8x8xf32> to vector<1x8x8xf32>
    tpu.vector_store %arg25[%c1_58, %c0_59, %c8_60], %151 {strides = array<i32>} : memref<2x8x32xf32, #tpu.memory_space<vmem>>, vector<1x8x8xf32>,
    %152 = vector.extract_strided_slice %109 {offsets = [0, 16], sizes = [8, 8], strides = [1, 1]} : vector<8x32xbf16> to vector<8x8xbf16>
    %153 = vector.extract_strided_slice %110 {offsets = [0, 16], sizes = [8, 8], strides = [1, 1]} : vector<8x32xbf16> to vector<8x8xbf16>
    "tpu.trace_start"() <{level = 10 : i32, message = "qc,kc->qk"}> : () -> ()
    %cst_61 = arith.constant dense<0.000000e+00> : vector<8x8xf32>
    %154 = tpu.matmul %152, %153, %cst_61 {dimension_numbers = #tpu.dot_dimension_numbers<[1], [1], [0], [0], [0, 0, 1, 0], [], []>} : vector<8x8xbf16>, vector<8x8xbf16>, vector<8x8xf32> -> vector<8x8xf32>
    "tpu.trace_stop"() : () -> ()
    %155 = arith.addf %154, %108 : vector<8x8xf32>
    %cst_62 = arith.constant dense<0xFF800000> : vector<8xf32>
    %156 = vector.multi_reduction <maximumf>, %155, %cst_62 [1] : vector<8x8xf32> to vector<8xf32>
    %157 = vector.shape_cast %156 : vector<8xf32> to vector<8x1xf32>
    %158 = vector.broadcast %157 : vector<8x1xf32> to vector<8x8xf32>
    %159 = arith.subf %155, %158 : vector<8x8xf32>
    %160 = math.exp %159 : vector<8x8xf32>
    %cst_63 = arith.constant dense<0.000000e+00> : vector<8xf32>
    %161 = vector.multi_reduction <add>, %160, %cst_63 [1] : vector<8x8xf32> to vector<8xf32>
    %162 = vector.shape_cast %161 : vector<8xf32> to vector<8x1xf32>
    %163 = tpu.reciprocal %162 {approx = true} : vector<8x1xf32> -> vector<8x1xf32>
    %164 = vector.broadcast %163 : vector<8x1xf32> to vector<8x8xf32>
    %165 = arith.mulf %160, %164 : vector<8x8xf32>
    %166 = arith.truncf %165 : vector<8x8xf32> to vector<8x8xbf16>
    %167 = vector.extract_strided_slice %111 {offsets = [0, 16], sizes = [8, 8], strides = [1, 1]} : vector<8x32xbf16> to vector<8x8xbf16>
    %cst_64 = arith.constant dense<0.000000e+00> : vector<8x8xf32>
    %168 = tpu.matmul %166, %167, %cst_64 {dimension_numbers = #tpu.dot_dimension_numbers<[1], [0], [0], [1], [0, 0, 1, 1], [], []>} : vector<8x8xbf16>, vector<8x8xbf16>, vector<8x8xf32> -> vector<8x8xf32>
    %c1_65 = arith.constant 1 : index
    %c0_66 = arith.constant 0 : index
    %c16_67 = arith.constant 16 : index
    %169 = vector.load %arg25[%c1_65, %c0_66, %c16_67] : memref<2x8x32xf32, #tpu.memory_space<vmem>>, vector<1x8x8xf32>
    %170 = vector.shape_cast %169 : vector<1x8x8xf32> to vector<8x8xf32>
    %171 = vector.shape_cast %168 : vector<8x8xf32> to vector<1x8x8xf32>
    tpu.vector_store %arg25[%c1_65, %c0_66, %c16_67], %171 {strides = array<i32>} : memref<2x8x32xf32, #tpu.memory_space<vmem>>, vector<1x8x8xf32>,
    %172 = vector.extract_strided_slice %109 {offsets = [0, 24], sizes = [8, 8], strides = [1, 1]} : vector<8x32xbf16> to vector<8x8xbf16>
    %173 = vector.extract_strided_slice %110 {offsets = [0, 24], sizes = [8, 8], strides = [1, 1]} : vector<8x32xbf16> to vector<8x8xbf16>
    "tpu.trace_start"() <{level = 10 : i32, message = "qc,kc->qk"}> : () -> ()
    %cst_68 = arith.constant dense<0.000000e+00> : vector<8x8xf32>
    %174 = tpu.matmul %172, %173, %cst_68 {dimension_numbers = #tpu.dot_dimension_numbers<[1], [1], [0], [0], [0, 0, 1, 0], [], []>} : vector<8x8xbf16>, vector<8x8xbf16>, vector<8x8xf32> -> vector<8x8xf32>
    "tpu.trace_stop"() : () -> ()
    %175 = arith.addf %174, %108 : vector<8x8xf32>
    %cst_69 = arith.constant dense<0xFF800000> : vector<8xf32>
    %176 = vector.multi_reduction <maximumf>, %175, %cst_69 [1] : vector<8x8xf32> to vector<8xf32>
    %177 = vector.shape_cast %176 : vector<8xf32> to vector<8x1xf32>
    %178 = vector.broadcast %177 : vector<8x1xf32> to vector<8x8xf32>
    %179 = arith.subf %175, %178 : vector<8x8xf32>
    %180 = math.exp %179 : vector<8x8xf32>
    %cst_70 = arith.constant dense<0.000000e+00> : vector<8xf32>
    %181 = vector.multi_reduction <add>, %180, %cst_70 [1] : vector<8x8xf32> to vector<8xf32>
    %182 = vector.shape_cast %181 : vector<8xf32> to vector<8x1xf32>
    %183 = tpu.reciprocal %182 {approx = true} : vector<8x1xf32> -> vector<8x1xf32>
    %184 = vector.broadcast %183 : vector<8x1xf32> to vector<8x8xf32>
    %185 = arith.mulf %180, %184 : vector<8x8xf32>
    %186 = arith.truncf %185 : vector<8x8xf32> to vector<8x8xbf16>
    %187 = vector.extract_strided_slice %111 {offsets = [0, 24], sizes = [8, 8], strides = [1, 1]} : vector<8x32xbf16> to vector<8x8xbf16>
    %cst_71 = arith.constant dense<0.000000e+00> : vector<8x8xf32>
    %188 = tpu.matmul %186, %187, %cst_71 {dimension_numbers = #tpu.dot_dimension_numbers<[1], [0], [0], [1], [0, 0, 1, 1], [], []>} : vector<8x8xbf16>, vector<8x8xbf16>, vector<8x8xf32> -> vector<8x8xf32>
    %c1_72 = arith.constant 1 : index
    %c0_73 = arith.constant 0 : index
    %c24_74 = arith.constant 24 : index
    %189 = vector.load %arg25[%c1_72, %c0_73, %c24_74] : memref<2x8x32xf32, #tpu.memory_space<vmem>>, vector<1x8x8xf32>
    %190 = vector.shape_cast %189 : vector<1x8x8xf32> to vector<8x8xf32>
    %191 = vector.shape_cast %188 : vector<8x8xf32> to vector<1x8x8xf32>
    tpu.vector_store %arg25[%c1_72, %c0_73, %c24_74], %191 {strides = array<i32>} : memref<2x8x32xf32, #tpu.memory_space<vmem>>, vector<1x8x8xf32>,
    %c0_75 = arith.constant 0 : index
    %c0_76 = arith.constant 0 : index
    %c0_77 = arith.constant 0 : index
    %192 = vector.load %arg25[%c0_75, %c0_76, %c0_77] : memref<2x8x32xf32, #tpu.memory_space<vmem>>, vector<2x8x32xf32>
    %193 = vector.shape_cast %192 : vector<2x8x32xf32> to vector<16x32xf32>
    %194 = arith.truncf %193 : vector<16x32xf32> to vector<16x32xbf16>
    %cst_78 = arith.constant dense<0.000000e+00> : vector<16x32xf32>
    %195 = tpu.matmul %194, %19, %cst_78 {dimension_numbers = #tpu.dot_dimension_numbers<[1], [0], [0], [1], [0, 0, 1, 1], [], []>} : vector<16x32xbf16>, vector<32x32xbf16>, vector<16x32xf32> -> vector<16x32xf32>
    %196 = vector.broadcast %21 : vector<1x32xf32> to vector<16x32xf32>
    %197 = arith.addf %195, %196 : vector<16x32xf32>
    %198 = arith.addf %3, %197 : vector<16x32xf32>
    %c0_79 = arith.constant 0 : index
    %c0_80 = arith.constant 0 : index
    %c0_81 = arith.constant 0 : index
    %199 = vector.load %arg21[%c0_79, %c0_80, %c0_81] : memref<1x3x32xf32, #tpu.memory_space<vmem>>, vector<1x1x32xf32>
    %200 = vector.shape_cast %199 : vector<1x1x32xf32> to vector<1x32xf32>
    %c0_82 = arith.constant 0 : index
    %c0_83 = arith.constant 0 : index
    %c0_84 = arith.constant 0 : index
    %201 = vector.load %arg22[%c0_82, %c0_83, %c0_84] : memref<1x3x32xf32, #tpu.memory_space<vmem>>, vector<1x1x32xf32>
    %202 = vector.shape_cast %201 : vector<1x1x32xf32> to vector<1x32xf32>
    %cst_85 = arith.constant dense<0.000000e+00> : vector<16xf32>
    %203 = vector.multi_reduction <add>, %198, %cst_85 [1] : vector<16x32xf32> to vector<16xf32>
    %204 = vector.shape_cast %203 : vector<16xf32> to vector<16x1xf32>
    %cst_86 = arith.constant 3.200000e+01 : f32
    %205 = vector.broadcast %cst_86 : f32 to vector<16x1xf32>
    %206 = arith.divf %204, %205 : vector<16x1xf32>
    %207 = vector.broadcast %206 : vector<16x1xf32> to vector<16x32xf32>
    %208 = arith.subf %198, %207 : vector<16x32xf32>
    %209 = arith.mulf %208, %208 : vector<16x32xf32>
    %cst_87 = arith.constant dense<0.000000e+00> : vector<16xf32>
    %210 = vector.multi_reduction <add>, %209, %cst_87 [1] : vector<16x32xf32> to vector<16xf32>
    %211 = vector.shape_cast %210 : vector<16xf32> to vector<16x1xf32>
    %cst_88 = arith.constant 3.200000e+01 : f32
    %212 = vector.broadcast %cst_88 : f32 to vector<16x1xf32>
    %213 = arith.divf %211, %212 : vector<16x1xf32>
    %214 = vector.broadcast %206 : vector<16x1xf32> to vector<16x32xf32>
    %215 = arith.subf %198, %214 : vector<16x32xf32>
    %cst_89 = arith.constant 9.99999974E-6 : f32
    %216 = vector.broadcast %cst_89 : f32 to vector<16x1xf32>
    %217 = arith.addf %213, %216 : vector<16x1xf32>
    %218 = math.rsqrt %217 : vector<16x1xf32>
    %219 = vector.broadcast %218 : vector<16x1xf32> to vector<16x32xf32>
    %220 = arith.mulf %215, %219 : vector<16x32xf32>
    %221 = vector.broadcast %200 : vector<1x32xf32> to vector<16x32xf32>
    %222 = arith.mulf %220, %221 : vector<16x32xf32>
    %223 = vector.broadcast %202 : vector<1x32xf32> to vector<16x32xf32>
    %224 = arith.addf %222, %223 : vector<16x32xf32>
    %225 = arith.truncf %224 : vector<16x32xf32> to vector<16x32xbf16>
    %c0_90 = arith.constant 0 : index
    %c0_91 = arith.constant 0 : index
    %c0_92 = arith.constant 0 : index
    %226 = vector.load %arg11[%c0_90, %c0_91, %c0_92] : memref<1x32x32xbf16, #tpu.memory_space<vmem>>, vector<1x32x32xbf16>
    %227 = vector.shape_cast %226 : vector<1x32x32xbf16> to vector<32x32xbf16>
    %cst_93 = arith.constant dense<0.000000e+00> : vector<16x32xf32>
    %228 = tpu.matmul %225, %227, %cst_93 {dimension_numbers = #tpu.dot_dimension_numbers<[1], [0], [0], [1], [0, 0, 1, 1], [], []>} : vector<16x32xbf16>, vector<32x32xbf16>, vector<16x32xf32> -> vector<16x32xf32>
    %c0_94 = arith.constant 0 : index
    %c0_95 = arith.constant 0 : index
    %c0_96 = arith.constant 0 : index
    %229 = vector.load %arg12[%c0_94, %c0_95, %c0_96] : memref<1x1x32xf32, #tpu.memory_space<vmem>>, vector<1x1x32xf32>
    %230 = vector.shape_cast %229 : vector<1x1x32xf32> to vector<1x32xf32>
    %231 = vector.broadcast %230 : vector<1x32xf32> to vector<16x32xf32>
    %232 = arith.addf %228, %231 : vector<16x32xf32>
    %233 = arith.truncf %232 : vector<16x32xf32> to vector<16x32xbf16>
    %c0_97 = arith.constant 0 : index
    %c0_98 = arith.constant 0 : index
    %c0_99 = arith.constant 0 : index
    %234 = vector.load %arg13[%c0_97, %c0_98, %c0_99] : memref<1x32x64xbf16, #tpu.memory_space<vmem>>, vector<1x32x64xbf16>
    %235 = vector.shape_cast %234 : vector<1x32x64xbf16> to vector<32x64xbf16>
    %cst_100 = arith.constant dense<0.000000e+00> : vector<16x64xf32>
    %236 = tpu.matmul %5, %235, %cst_100 {dimension_numbers = #tpu.dot_dimension_numbers<[1], [0], [0], [1], [0, 0, 1, 1], [], []>} : vector<16x32xbf16>, vector<32x64xbf16>, vector<16x64xf32> -> vector<16x64xf32>
    %c0_101 = arith.constant 0 : index
    %c0_102 = arith.constant 0 : index
    %c0_103 = arith.constant 0 : index
    %237 = vector.load %arg14[%c0_101, %c0_102, %c0_103] : memref<1x1x64xf32, #tpu.memory_space<vmem>>, vector<1x1x64xf32>
    %238 = vector.shape_cast %237 : vector<1x1x64xf32> to vector<1x64xf32>
    %239 = vector.broadcast %238 : vector<1x64xf32> to vector<16x64xf32>
    %240 = arith.addf %236, %239 : vector<16x64xf32>
    %241 = arith.truncf %240 : vector<16x64xf32> to vector<16x64xbf16>
    %242 = vector.extract_strided_slice %241 {offsets = [0, 0], sizes = [16, 32], strides = [1, 1]} : vector<16x64xbf16> to vector<16x32xbf16>
    %243 = vector.extract_strided_slice %241 {offsets = [0, 32], sizes = [16, 32], strides = [1, 1]} : vector<16x64xbf16> to vector<16x32xbf16>
    %c0_104 = arith.constant 0 : index
    %c0_105 = arith.constant 0 : index
    %c0_106 = arith.constant 0 : index
    %244 = vector.load %arg15[%c0_104, %c0_105, %c0_106] : memref<1x32x32xbf16, #tpu.memory_space<vmem>>, vector<1x32x32xbf16>
    %245 = vector.shape_cast %244 : vector<1x32x32xbf16> to vector<32x32xbf16>
    %c0_107 = arith.constant 0 : index
    %c0_108 = arith.constant 0 : index
    %c0_109 = arith.constant 0 : index
    %246 = vector.load %arg16[%c0_107, %c0_108, %c0_109] : memref<1x1x32xf32, #tpu.memory_space<vmem>>, vector<1x1x32xf32>
    %247 = vector.shape_cast %246 : vector<1x1x32xf32> to vector<1x32xf32>
    %c0_110 = arith.constant 0 : index
    %c0_111 = arith.constant 0 : index
    %c0_112 = arith.constant 0 : index
    %248 = vector.load %arg6[%c0_110, %c0_111, %c0_112] : memref<2x1x8xf32, #tpu.memory_space<vmem>>, vector<1x1x8xf32>
    %249 = vector.shape_cast %248 : vector<1x1x8xf32> to vector<1x8xf32>
    %250 = vector.extract_strided_slice %233 {offsets = [0, 0], sizes = [8, 32], strides = [1, 1]} : vector<16x32xbf16> to vector<8x32xbf16>
    %251 = vector.extract_strided_slice %242 {offsets = [0, 0], sizes = [8, 32], strides = [1, 1]} : vector<16x32xbf16> to vector<8x32xbf16>
    %252 = vector.extract_strided_slice %243 {offsets = [0, 0], sizes = [8, 32], strides = [1, 1]} : vector<16x32xbf16> to vector<8x32xbf16>
    %253 = vector.extract_strided_slice %250 {offsets = [0, 0], sizes = [8, 8], strides = [1, 1]} : vector<8x32xbf16> to vector<8x8xbf16>
    %254 = vector.extract_strided_slice %251 {offsets = [0, 0], sizes = [8, 8], strides = [1, 1]} : vector<8x32xbf16> to vector<8x8xbf16>
    "tpu.trace_start"() <{level = 10 : i32, message = "qc,kc->qk"}> : () -> ()
    %cst_113 = arith.constant dense<0.000000e+00> : vector<8x8xf32>
    %255 = tpu.matmul %253, %254, %cst_113 {dimension_numbers = #tpu.dot_dimension_numbers<[1], [1], [0], [0], [0, 0, 1, 0], [], []>} : vector<8x8xbf16>, vector<8x8xbf16>, vector<8x8xf32> -> vector<8x8xf32>
    "tpu.trace_stop"() : () -> ()
    %256 = vector.broadcast %249 : vector<1x8xf32> to vector<8x8xf32>
    %257 = arith.addf %255, %256 : vector<8x8xf32>
    %cst_114 = arith.constant dense<0xFF800000> : vector<8xf32>
    %258 = vector.multi_reduction <maximumf>, %257, %cst_114 [1] : vector<8x8xf32> to vector<8xf32>
    %259 = vector.shape_cast %258 : vector<8xf32> to vector<8x1xf32>
    %260 = vector.broadcast %259 : vector<8x1xf32> to vector<8x8xf32>
    %261 = arith.subf %257, %260 : vector<8x8xf32>
    %262 = math.exp %261 : vector<8x8xf32>
    %cst_115 = arith.constant dense<0.000000e+00> : vector<8xf32>
    %263 = vector.multi_reduction <add>, %262, %cst_115 [1] : vector<8x8xf32> to vector<8xf32>
    %264 = vector.shape_cast %263 : vector<8xf32> to vector<8x1xf32>
    %265 = tpu.reciprocal %264 {approx = true} : vector<8x1xf32> -> vector<8x1xf32>
    %266 = vector.broadcast %265 : vector<8x1xf32> to vector<8x8xf32>
    %267 = arith.mulf %262, %266 : vector<8x8xf32>
    %268 = arith.truncf %267 : vector<8x8xf32> to vector<8x8xbf16>
    %269 = vector.extract_strided_slice %252 {offsets = [0, 0], sizes = [8, 8], strides = [1, 1]} : vector<8x32xbf16> to vector<8x8xbf16>
    %cst_116 = arith.constant dense<0.000000e+00> : vector<8x8xf32>
    %270 = tpu.matmul %268, %269, %cst_116 {dimension_numbers = #tpu.dot_dimension_numbers<[1], [0], [0], [1], [0, 0, 1, 1], [], []>} : vector<8x8xbf16>, vector<8x8xbf16>, vector<8x8xf32> -> vector<8x8xf32>
    %c0_117 = arith.constant 0 : index
    %c0_118 = arith.constant 0 : index
    %c0_119 = arith.constant 0 : index
    %271 = vector.load %arg25[%c0_117, %c0_118, %c0_119] : memref<2x8x32xf32, #tpu.memory_space<vmem>>, vector<1x8x8xf32>
    %272 = vector.shape_cast %271 : vector<1x8x8xf32> to vector<8x8xf32>
    %273 = vector.shape_cast %270 : vector<8x8xf32> to vector<1x8x8xf32>
    tpu.vector_store %arg25[%c0_117, %c0_118, %c0_119], %273 {strides = array<i32>} : memref<2x8x32xf32, #tpu.memory_space<vmem>>, vector<1x8x8xf32>,
    %274 = vector.extract_strided_slice %250 {offsets = [0, 8], sizes = [8, 8], strides = [1, 1]} : vector<8x32xbf16> to vector<8x8xbf16>
    %275 = vector.extract_strided_slice %251 {offsets = [0, 8], sizes = [8, 8], strides = [1, 1]} : vector<8x32xbf16> to vector<8x8xbf16>
    "tpu.trace_start"() <{level = 10 : i32, message = "qc,kc->qk"}> : () -> ()
    %cst_120 = arith.constant dense<0.000000e+00> : vector<8x8xf32>
    %276 = tpu.matmul %274, %275, %cst_120 {dimension_numbers = #tpu.dot_dimension_numbers<[1], [1], [0], [0], [0, 0, 1, 0], [], []>} : vector<8x8xbf16>, vector<8x8xbf16>, vector<8x8xf32> -> vector<8x8xf32>
    "tpu.trace_stop"() : () -> ()
    %277 = vector.broadcast %249 : vector<1x8xf32> to vector<8x8xf32>
    %278 = arith.addf %276, %277 : vector<8x8xf32>
    %cst_121 = arith.constant dense<0xFF800000> : vector<8xf32>
    %279 = vector.multi_reduction <maximumf>, %278, %cst_121 [1] : vector<8x8xf32> to vector<8xf32>
    %280 = vector.shape_cast %279 : vector<8xf32> to vector<8x1xf32>
    %281 = vector.broadcast %280 : vector<8x1xf32> to vector<8x8xf32>
    %282 = arith.subf %278, %281 : vector<8x8xf32>
    %283 = math.exp %282 : vector<8x8xf32>
    %cst_122 = arith.constant dense<0.000000e+00> : vector<8xf32>
    %284 = vector.multi_reduction <add>, %283, %cst_122 [1] : vector<8x8xf32> to vector<8xf32>
    %285 = vector.shape_cast %284 : vector<8xf32> to vector<8x1xf32>
    %286 = tpu.reciprocal %285 {approx = true} : vector<8x1xf32> -> vector<8x1xf32>
    %287 = vector.broadcast %286 : vector<8x1xf32> to vector<8x8xf32>
    %288 = arith.mulf %283, %287 : vector<8x8xf32>
    %289 = arith.truncf %288 : vector<8x8xf32> to vector<8x8xbf16>
    %290 = vector.extract_strided_slice %252 {offsets = [0, 8], sizes = [8, 8], strides = [1, 1]} : vector<8x32xbf16> to vector<8x8xbf16>
    %cst_123 = arith.constant dense<0.000000e+00> : vector<8x8xf32>
    %291 = tpu.matmul %289, %290, %cst_123 {dimension_numbers = #tpu.dot_dimension_numbers<[1], [0], [0], [1], [0, 0, 1, 1], [], []>} : vector<8x8xbf16>, vector<8x8xbf16>, vector<8x8xf32> -> vector<8x8xf32>
    %c0_124 = arith.constant 0 : index
    %c0_125 = arith.constant 0 : index
    %c8_126 = arith.constant 8 : index
    %292 = vector.load %arg25[%c0_124, %c0_125, %c8_126] : memref<2x8x32xf32, #tpu.memory_space<vmem>>, vector<1x8x8xf32>
    %293 = vector.shape_cast %292 : vector<1x8x8xf32> to vector<8x8xf32>
    %294 = vector.shape_cast %291 : vector<8x8xf32> to vector<1x8x8xf32>
    tpu.vector_store %arg25[%c0_124, %c0_125, %c8_126], %294 {strides = array<i32>} : memref<2x8x32xf32, #tpu.memory_space<vmem>>, vector<1x8x8xf32>,
    %295 = vector.extract_strided_slice %250 {offsets = [0, 16], sizes = [8, 8], strides = [1, 1]} : vector<8x32xbf16> to vector<8x8xbf16>
    %296 = vector.extract_strided_slice %251 {offsets = [0, 16], sizes = [8, 8], strides = [1, 1]} : vector<8x32xbf16> to vector<8x8xbf16>
    "tpu.trace_start"() <{level = 10 : i32, message = "qc,kc->qk"}> : () -> ()
    %cst_127 = arith.constant dense<0.000000e+00> : vector<8x8xf32>
    %297 = tpu.matmul %295, %296, %cst_127 {dimension_numbers = #tpu.dot_dimension_numbers<[1], [1], [0], [0], [0, 0, 1, 0], [], []>} : vector<8x8xbf16>, vector<8x8xbf16>, vector<8x8xf32> -> vector<8x8xf32>
    "tpu.trace_stop"() : () -> ()
    %298 = vector.broadcast %249 : vector<1x8xf32> to vector<8x8xf32>
    %299 = arith.addf %297, %298 : vector<8x8xf32>
    %cst_128 = arith.constant dense<0xFF800000> : vector<8xf32>
    %300 = vector.multi_reduction <maximumf>, %299, %cst_128 [1] : vector<8x8xf32> to vector<8xf32>
    %301 = vector.shape_cast %300 : vector<8xf32> to vector<8x1xf32>
    %302 = vector.broadcast %301 : vector<8x1xf32> to vector<8x8xf32>
    %303 = arith.subf %299, %302 : vector<8x8xf32>
    %304 = math.exp %303 : vector<8x8xf32>
    %cst_129 = arith.constant dense<0.000000e+00> : vector<8xf32>
    %305 = vector.multi_reduction <add>, %304, %cst_129 [1] : vector<8x8xf32> to vector<8xf32>
    %306 = vector.shape_cast %305 : vector<8xf32> to vector<8x1xf32>
    %307 = tpu.reciprocal %306 {approx = true} : vector<8x1xf32> -> vector<8x1xf32>
    %308 = vector.broadcast %307 : vector<8x1xf32> to vector<8x8xf32>
    %309 = arith.mulf %304, %308 : vector<8x8xf32>
    %310 = arith.truncf %309 : vector<8x8xf32> to vector<8x8xbf16>
    %311 = vector.extract_strided_slice %252 {offsets = [0, 16], sizes = [8, 8], strides = [1, 1]} : vector<8x32xbf16> to vector<8x8xbf16>
    %cst_130 = arith.constant dense<0.000000e+00> : vector<8x8xf32>
    %312 = tpu.matmul %310, %311, %cst_130 {dimension_numbers = #tpu.dot_dimension_numbers<[1], [0], [0], [1], [0, 0, 1, 1], [], []>} : vector<8x8xbf16>, vector<8x8xbf16>, vector<8x8xf32> -> vector<8x8xf32>
    %c0_131 = arith.constant 0 : index
    %c0_132 = arith.constant 0 : index
    %c16_133 = arith.constant 16 : index
    %313 = vector.load %arg25[%c0_131, %c0_132, %c16_133] : memref<2x8x32xf32, #tpu.memory_space<vmem>>, vector<1x8x8xf32>
    %314 = vector.shape_cast %313 : vector<1x8x8xf32> to vector<8x8xf32>
    %315 = vector.shape_cast %312 : vector<8x8xf32> to vector<1x8x8xf32>
    tpu.vector_store %arg25[%c0_131, %c0_132, %c16_133], %315 {strides = array<i32>} : memref<2x8x32xf32, #tpu.memory_space<vmem>>, vector<1x8x8xf32>,
    %316 = vector.extract_strided_slice %250 {offsets = [0, 24], sizes = [8, 8], strides = [1, 1]} : vector<8x32xbf16> to vector<8x8xbf16>
    %317 = vector.extract_strided_slice %251 {offsets = [0, 24], sizes = [8, 8], strides = [1, 1]} : vector<8x32xbf16> to vector<8x8xbf16>
    "tpu.trace_start"() <{level = 10 : i32, message = "qc,kc->qk"}> : () -> ()
    %cst_134 = arith.constant dense<0.000000e+00> : vector<8x8xf32>
    %318 = tpu.matmul %316, %317, %cst_134 {dimension_numbers = #tpu.dot_dimension_numbers<[1], [1], [0], [0], [0, 0, 1, 0], [], []>} : vector<8x8xbf16>, vector<8x8xbf16>, vector<8x8xf32> -> vector<8x8xf32>
    "tpu.trace_stop"() : () -> ()
    %319 = vector.broadcast %249 : vector<1x8xf32> to vector<8x8xf32>
    %320 = arith.addf %318, %319 : vector<8x8xf32>
    %cst_135 = arith.constant dense<0xFF800000> : vector<8xf32>
    %321 = vector.multi_reduction <maximumf>, %320, %cst_135 [1] : vector<8x8xf32> to vector<8xf32>
    %322 = vector.shape_cast %321 : vector<8xf32> to vector<8x1xf32>
    %323 = vector.broadcast %322 : vector<8x1xf32> to vector<8x8xf32>
    %324 = arith.subf %320, %323 : vector<8x8xf32>
    %325 = math.exp %324 : vector<8x8xf32>
    %cst_136 = arith.constant dense<0.000000e+00> : vector<8xf32>
    %326 = vector.multi_reduction <add>, %325, %cst_136 [1] : vector<8x8xf32> to vector<8xf32>
    %327 = vector.shape_cast %326 : vector<8xf32> to vector<8x1xf32>
    %328 = tpu.reciprocal %327 {approx = true} : vector<8x1xf32> -> vector<8x1xf32>
    %329 = vector.broadcast %328 : vector<8x1xf32> to vector<8x8xf32>
    %330 = arith.mulf %325, %329 : vector<8x8xf32>
    %331 = arith.truncf %330 : vector<8x8xf32> to vector<8x8xbf16>
    %332 = vector.extract_strided_slice %252 {offsets = [0, 24], sizes = [8, 8], strides = [1, 1]} : vector<8x32xbf16> to vector<8x8xbf16>
    %cst_137 = arith.constant dense<0.000000e+00> : vector<8x8xf32>
    %333 = tpu.matmul %331, %332, %cst_137 {dimension_numbers = #tpu.dot_dimension_numbers<[1], [0], [0], [1], [0, 0, 1, 1], [], []>} : vector<8x8xbf16>, vector<8x8xbf16>, vector<8x8xf32> -> vector<8x8xf32>
    %c0_138 = arith.constant 0 : index
    %c0_139 = arith.constant 0 : index
    %c24_140 = arith.constant 24 : index
    %334 = vector.load %arg25[%c0_138, %c0_139, %c24_140] : memref<2x8x32xf32, #tpu.memory_space<vmem>>, vector<1x8x8xf32>
    %335 = vector.shape_cast %334 : vector<1x8x8xf32> to vector<8x8xf32>
    %336 = vector.shape_cast %333 : vector<8x8xf32> to vector<1x8x8xf32>
    tpu.vector_store %arg25[%c0_138, %c0_139, %c24_140], %336 {strides = array<i32>} : memref<2x8x32xf32, #tpu.memory_space<vmem>>, vector<1x8x8xf32>,
    %c1_141 = arith.constant 1 : index
    %c0_142 = arith.constant 0 : index
    %c0_143 = arith.constant 0 : index
    %337 = vector.load %arg6[%c1_141, %c0_142, %c0_143] : memref<2x1x8xf32, #tpu.memory_space<vmem>>, vector<1x1x8xf32>
    %338 = vector.shape_cast %337 : vector<1x1x8xf32> to vector<1x8xf32>
    %339 = vector.extract_strided_slice %233 {offsets = [8, 0], sizes = [8, 32], strides = [1, 1]} : vector<16x32xbf16> to vector<8x32xbf16>
    %340 = vector.extract_strided_slice %242 {offsets = [8, 0], sizes = [8, 32], strides = [1, 1]} : vector<16x32xbf16> to vector<8x32xbf16>
    %341 = vector.extract_strided_slice %243 {offsets = [8, 0], sizes = [8, 32], strides = [1, 1]} : vector<16x32xbf16> to vector<8x32xbf16>
    %342 = vector.extract_strided_slice %339 {offsets = [0, 0], sizes = [8, 8], strides = [1, 1]} : vector<8x32xbf16> to vector<8x8xbf16>
    %343 = vector.extract_strided_slice %340 {offsets = [0, 0], sizes = [8, 8], strides = [1, 1]} : vector<8x32xbf16> to vector<8x8xbf16>
    "tpu.trace_start"() <{level = 10 : i32, message = "qc,kc->qk"}> : () -> ()
    %cst_144 = arith.constant dense<0.000000e+00> : vector<8x8xf32>
    %344 = tpu.matmul %342, %343, %cst_144 {dimension_numbers = #tpu.dot_dimension_numbers<[1], [1], [0], [0], [0, 0, 1, 0], [], []>} : vector<8x8xbf16>, vector<8x8xbf16>, vector<8x8xf32> -> vector<8x8xf32>
    "tpu.trace_stop"() : () -> ()
    %345 = vector.broadcast %338 : vector<1x8xf32> to vector<8x8xf32>
    %346 = arith.addf %344, %345 : vector<8x8xf32>
    %cst_145 = arith.constant dense<0xFF800000> : vector<8xf32>
    %347 = vector.multi_reduction <maximumf>, %346, %cst_145 [1] : vector<8x8xf32> to vector<8xf32>
    %348 = vector.shape_cast %347 : vector<8xf32> to vector<8x1xf32>
    %349 = vector.broadcast %348 : vector<8x1xf32> to vector<8x8xf32>
    %350 = arith.subf %346, %349 : vector<8x8xf32>
    %351 = math.exp %350 : vector<8x8xf32>
    %cst_146 = arith.constant dense<0.000000e+00> : vector<8xf32>
    %352 = vector.multi_reduction <add>, %351, %cst_146 [1] : vector<8x8xf32> to vector<8xf32>
    %353 = vector.shape_cast %352 : vector<8xf32> to vector<8x1xf32>
    %354 = tpu.reciprocal %353 {approx = true} : vector<8x1xf32> -> vector<8x1xf32>
    %355 = vector.broadcast %354 : vector<8x1xf32> to vector<8x8xf32>
    %356 = arith.mulf %351, %355 : vector<8x8xf32>
    %357 = arith.truncf %356 : vector<8x8xf32> to vector<8x8xbf16>
    %358 = vector.extract_strided_slice %341 {offsets = [0, 0], sizes = [8, 8], strides = [1, 1]} : vector<8x32xbf16> to vector<8x8xbf16>
    %cst_147 = arith.constant dense<0.000000e+00> : vector<8x8xf32>
    %359 = tpu.matmul %357, %358, %cst_147 {dimension_numbers = #tpu.dot_dimension_numbers<[1], [0], [0], [1], [0, 0, 1, 1], [], []>} : vector<8x8xbf16>, vector<8x8xbf16>, vector<8x8xf32> -> vector<8x8xf32>
    %c1_148 = arith.constant 1 : index
    %c0_149 = arith.constant 0 : index
    %c0_150 = arith.constant 0 : index
    %360 = vector.load %arg25[%c1_148, %c0_149, %c0_150] : memref<2x8x32xf32, #tpu.memory_space<vmem>>, vector<1x8x8xf32>
    %361 = vector.shape_cast %360 : vector<1x8x8xf32> to vector<8x8xf32>
    %362 = vector.shape_cast %359 : vector<8x8xf32> to vector<1x8x8xf32>
    tpu.vector_store %arg25[%c1_148, %c0_149, %c0_150], %362 {strides = array<i32>} : memref<2x8x32xf32, #tpu.memory_space<vmem>>, vector<1x8x8xf32>,
    %363 = vector.extract_strided_slice %339 {offsets = [0, 8], sizes = [8, 8], strides = [1, 1]} : vector<8x32xbf16> to vector<8x8xbf16>
    %364 = vector.extract_strided_slice %340 {offsets = [0, 8], sizes = [8, 8], strides = [1, 1]} : vector<8x32xbf16> to vector<8x8xbf16>
    "tpu.trace_start"() <{level = 10 : i32, message = "qc,kc->qk"}> : () -> ()
    %cst_151 = arith.constant dense<0.000000e+00> : vector<8x8xf32>
    %365 = tpu.matmul %363, %364, %cst_151 {dimension_numbers = #tpu.dot_dimension_numbers<[1], [1], [0], [0], [0, 0, 1, 0], [], []>} : vector<8x8xbf16>, vector<8x8xbf16>, vector<8x8xf32> -> vector<8x8xf32>
    "tpu.trace_stop"() : () -> ()
    %366 = vector.broadcast %338 : vector<1x8xf32> to vector<8x8xf32>
    %367 = arith.addf %365, %366 : vector<8x8xf32>
    %cst_152 = arith.constant dense<0xFF800000> : vector<8xf32>
    %368 = vector.multi_reduction <maximumf>, %367, %cst_152 [1] : vector<8x8xf32> to vector<8xf32>
    %369 = vector.shape_cast %368 : vector<8xf32> to vector<8x1xf32>
    %370 = vector.broadcast %369 : vector<8x1xf32> to vector<8x8xf32>
    %371 = arith.subf %367, %370 : vector<8x8xf32>
    %372 = math.exp %371 : vector<8x8xf32>
    %cst_153 = arith.constant dense<0.000000e+00> : vector<8xf32>
    %373 = vector.multi_reduction <add>, %372, %cst_153 [1] : vector<8x8xf32> to vector<8xf32>
    %374 = vector.shape_cast %373 : vector<8xf32> to vector<8x1xf32>
    %375 = tpu.reciprocal %374 {approx = true} : vector<8x1xf32> -> vector<8x1xf32>
    %376 = vector.broadcast %375 : vector<8x1xf32> to vector<8x8xf32>
    %377 = arith.mulf %372, %376 : vector<8x8xf32>
    %378 = arith.truncf %377 : vector<8x8xf32> to vector<8x8xbf16>
    %379 = vector.extract_strided_slice %341 {offsets = [0, 8], sizes = [8, 8], strides = [1, 1]} : vector<8x32xbf16> to vector<8x8xbf16>
    %cst_154 = arith.constant dense<0.000000e+00> : vector<8x8xf32>
    %380 = tpu.matmul %378, %379, %cst_154 {dimension_numbers = #tpu.dot_dimension_numbers<[1], [0], [0], [1], [0, 0, 1, 1], [], []>} : vector<8x8xbf16>, vector<8x8xbf16>, vector<8x8xf32> -> vector<8x8xf32>
    %c1_155 = arith.constant 1 : index
    %c0_156 = arith.constant 0 : index
    %c8_157 = arith.constant 8 : index
    %381 = vector.load %arg25[%c1_155, %c0_156, %c8_157] : memref<2x8x32xf32, #tpu.memory_space<vmem>>, vector<1x8x8xf32>
    %382 = vector.shape_cast %381 : vector<1x8x8xf32> to vector<8x8xf32>
    %383 = vector.shape_cast %380 : vector<8x8xf32> to vector<1x8x8xf32>
    tpu.vector_store %arg25[%c1_155, %c0_156, %c8_157], %383 {strides = array<i32>} : memref<2x8x32xf32, #tpu.memory_space<vmem>>, vector<1x8x8xf32>,
    %384 = vector.extract_strided_slice %339 {offsets = [0, 16], sizes = [8, 8], strides = [1, 1]} : vector<8x32xbf16> to vector<8x8xbf16>
    %385 = vector.extract_strided_slice %340 {offsets = [0, 16], sizes = [8, 8], strides = [1, 1]} : vector<8x32xbf16> to vector<8x8xbf16>
    "tpu.trace_start"() <{level = 10 : i32, message = "qc,kc->qk"}> : () -> ()
    %cst_158 = arith.constant dense<0.000000e+00> : vector<8x8xf32>
    %386 = tpu.matmul %384, %385, %cst_158 {dimension_numbers = #tpu.dot_dimension_numbers<[1], [1], [0], [0], [0, 0, 1, 0], [], []>} : vector<8x8xbf16>, vector<8x8xbf16>, vector<8x8xf32> -> vector<8x8xf32>
    "tpu.trace_stop"() : () -> ()
    %387 = vector.broadcast %338 : vector<1x8xf32> to vector<8x8xf32>
    %388 = arith.addf %386, %387 : vector<8x8xf32>
    %cst_159 = arith.constant dense<0xFF800000> : vector<8xf32>
    %389 = vector.multi_reduction <maximumf>, %388, %cst_159 [1] : vector<8x8xf32> to vector<8xf32>
    %390 = vector.shape_cast %389 : vector<8xf32> to vector<8x1xf32>
    %391 = vector.broadcast %390 : vector<8x1xf32> to vector<8x8xf32>
    %392 = arith.subf %388, %391 : vector<8x8xf32>
    %393 = math.exp %392 : vector<8x8xf32>
    %cst_160 = arith.constant dense<0.000000e+00> : vector<8xf32>
    %394 = vector.multi_reduction <add>, %393, %cst_160 [1] : vector<8x8xf32> to vector<8xf32>
    %395 = vector.shape_cast %394 : vector<8xf32> to vector<8x1xf32>
    %396 = tpu.reciprocal %395 {approx = true} : vector<8x1xf32> -> vector<8x1xf32>
    %397 = vector.broadcast %396 : vector<8x1xf32> to vector<8x8xf32>
    %398 = arith.mulf %393, %397 : vector<8x8xf32>
    %399 = arith.truncf %398 : vector<8x8xf32> to vector<8x8xbf16>
    %400 = vector.extract_strided_slice %341 {offsets = [0, 16], sizes = [8, 8], strides = [1, 1]} : vector<8x32xbf16> to vector<8x8xbf16>
    %cst_161 = arith.constant dense<0.000000e+00> : vector<8x8xf32>
    %401 = tpu.matmul %399, %400, %cst_161 {dimension_numbers = #tpu.dot_dimension_numbers<[1], [0], [0], [1], [0, 0, 1, 1], [], []>} : vector<8x8xbf16>, vector<8x8xbf16>, vector<8x8xf32> -> vector<8x8xf32>
    %c1_162 = arith.constant 1 : index
    %c0_163 = arith.constant 0 : index
    %c16_164 = arith.constant 16 : index
    %402 = vector.load %arg25[%c1_162, %c0_163, %c16_164] : memref<2x8x32xf32, #tpu.memory_space<vmem>>, vector<1x8x8xf32>
    %403 = vector.shape_cast %402 : vector<1x8x8xf32> to vector<8x8xf32>
    %404 = vector.shape_cast %401 : vector<8x8xf32> to vector<1x8x8xf32>
    tpu.vector_store %arg25[%c1_162, %c0_163, %c16_164], %404 {strides = array<i32>} : memref<2x8x32xf32, #tpu.memory_space<vmem>>, vector<1x8x8xf32>,
    %405 = vector.extract_strided_slice %339 {offsets = [0, 24], sizes = [8, 8], strides = [1, 1]} : vector<8x32xbf16> to vector<8x8xbf16>
    %406 = vector.extract_strided_slice %340 {offsets = [0, 24], sizes = [8, 8], strides = [1, 1]} : vector<8x32xbf16> to vector<8x8xbf16>
    "tpu.trace_start"() <{level = 10 : i32, message = "qc,kc->qk"}> : () -> ()
    %cst_165 = arith.constant dense<0.000000e+00> : vector<8x8xf32>
    %407 = tpu.matmul %405, %406, %cst_165 {dimension_numbers = #tpu.dot_dimension_numbers<[1], [1], [0], [0], [0, 0, 1, 0], [], []>} : vector<8x8xbf16>, vector<8x8xbf16>, vector<8x8xf32> -> vector<8x8xf32>
    "tpu.trace_stop"() : () -> ()
    %408 = vector.broadcast %338 : vector<1x8xf32> to vector<8x8xf32>
    %409 = arith.addf %407, %408 : vector<8x8xf32>
    %cst_166 = arith.constant dense<0xFF800000> : vector<8xf32>
    %410 = vector.multi_reduction <maximumf>, %409, %cst_166 [1] : vector<8x8xf32> to vector<8xf32>
    %411 = vector.shape_cast %410 : vector<8xf32> to vector<8x1xf32>
    %412 = vector.broadcast %411 : vector<8x1xf32> to vector<8x8xf32>
    %413 = arith.subf %409, %412 : vector<8x8xf32>
    %414 = math.exp %413 : vector<8x8xf32>
    %cst_167 = arith.constant dense<0.000000e+00> : vector<8xf32>
    %415 = vector.multi_reduction <add>, %414, %cst_167 [1] : vector<8x8xf32> to vector<8xf32>
    %416 = vector.shape_cast %415 : vector<8xf32> to vector<8x1xf32>
    %417 = tpu.reciprocal %416 {approx = true} : vector<8x1xf32> -> vector<8x1xf32>
    %418 = vector.broadcast %417 : vector<8x1xf32> to vector<8x8xf32>
    %419 = arith.mulf %414, %418 : vector<8x8xf32>
    %420 = arith.truncf %419 : vector<8x8xf32> to vector<8x8xbf16>
    %421 = vector.extract_strided_slice %341 {offsets = [0, 24], sizes = [8, 8], strides = [1, 1]} : vector<8x32xbf16> to vector<8x8xbf16>
    %cst_168 = arith.constant dense<0.000000e+00> : vector<8x8xf32>
    %422 = tpu.matmul %420, %421, %cst_168 {dimension_numbers = #tpu.dot_dimension_numbers<[1], [0], [0], [1], [0, 0, 1, 1], [], []>} : vector<8x8xbf16>, vector<8x8xbf16>, vector<8x8xf32> -> vector<8x8xf32>
    %c1_169 = arith.constant 1 : index
    %c0_170 = arith.constant 0 : index
    %c24_171 = arith.constant 24 : index
    %423 = vector.load %arg25[%c1_169, %c0_170, %c24_171] : memref<2x8x32xf32, #tpu.memory_space<vmem>>, vector<1x8x8xf32>
    %424 = vector.shape_cast %423 : vector<1x8x8xf32> to vector<8x8xf32>
    %425 = vector.shape_cast %422 : vector<8x8xf32> to vector<1x8x8xf32>
    tpu.vector_store %arg25[%c1_169, %c0_170, %c24_171], %425 {strides = array<i32>} : memref<2x8x32xf32, #tpu.memory_space<vmem>>, vector<1x8x8xf32>,
    %c0_172 = arith.constant 0 : index
    %c0_173 = arith.constant 0 : index
    %c0_174 = arith.constant 0 : index
    %426 = vector.load %arg25[%c0_172, %c0_173, %c0_174] : memref<2x8x32xf32, #tpu.memory_space<vmem>>, vector<2x8x32xf32>
    %427 = vector.shape_cast %426 : vector<2x8x32xf32> to vector<16x32xf32>
    %428 = arith.truncf %427 : vector<16x32xf32> to vector<16x32xbf16>
    %cst_175 = arith.constant dense<0.000000e+00> : vector<16x32xf32>
    %429 = tpu.matmul %428, %245, %cst_175 {dimension_numbers = #tpu.dot_dimension_numbers<[1], [0], [0], [1], [0, 0, 1, 1], [], []>} : vector<16x32xbf16>, vector<32x32xbf16>, vector<16x32xf32> -> vector<16x32xf32>
    %430 = vector.broadcast %247 : vector<1x32xf32> to vector<16x32xf32>
    %431 = arith.addf %429, %430 : vector<16x32xf32>
    %432 = arith.addf %224, %431 : vector<16x32xf32>
    %c0_176 = arith.constant 0 : index
    %c1_177 = arith.constant 1 : index
    %c0_178 = arith.constant 0 : index
    %433 = vector.load %arg21[%c0_176, %c1_177, %c0_178] : memref<1x3x32xf32, #tpu.memory_space<vmem>>, vector<1x1x32xf32>
    %434 = vector.shape_cast %433 : vector<1x1x32xf32> to vector<1x32xf32>
    %c0_179 = arith.constant 0 : index
    %c1_180 = arith.constant 1 : index
    %c0_181 = arith.constant 0 : index
    %435 = vector.load %arg22[%c0_179, %c1_180, %c0_181] : memref<1x3x32xf32, #tpu.memory_space<vmem>>, vector<1x1x32xf32>
    %436 = vector.shape_cast %435 : vector<1x1x32xf32> to vector<1x32xf32>
    %cst_182 = arith.constant dense<0.000000e+00> : vector<16xf32>
    %437 = vector.multi_reduction <add>, %432, %cst_182 [1] : vector<16x32xf32> to vector<16xf32>
    %438 = vector.shape_cast %437 : vector<16xf32> to vector<16x1xf32>
    %cst_183 = arith.constant 3.200000e+01 : f32
    %439 = vector.broadcast %cst_183 : f32 to vector<16x1xf32>
    %440 = arith.divf %438, %439 : vector<16x1xf32>
    %441 = vector.broadcast %440 : vector<16x1xf32> to vector<16x32xf32>
    %442 = arith.subf %432, %441 : vector<16x32xf32>
    %443 = arith.mulf %442, %442 : vector<16x32xf32>
    %cst_184 = arith.constant dense<0.000000e+00> : vector<16xf32>
    %444 = vector.multi_reduction <add>, %443, %cst_184 [1] : vector<16x32xf32> to vector<16xf32>
    %445 = vector.shape_cast %444 : vector<16xf32> to vector<16x1xf32>
    %cst_185 = arith.constant 3.200000e+01 : f32
    %446 = vector.broadcast %cst_185 : f32 to vector<16x1xf32>
    %447 = arith.divf %445, %446 : vector<16x1xf32>
    %448 = vector.broadcast %440 : vector<16x1xf32> to vector<16x32xf32>
    %449 = arith.subf %432, %448 : vector<16x32xf32>
    %cst_186 = arith.constant 9.99999974E-6 : f32
    %450 = vector.broadcast %cst_186 : f32 to vector<16x1xf32>
    %451 = arith.addf %447, %450 : vector<16x1xf32>
    %452 = math.rsqrt %451 : vector<16x1xf32>
    %453 = vector.broadcast %452 : vector<16x1xf32> to vector<16x32xf32>
    %454 = arith.mulf %449, %453 : vector<16x32xf32>
    %455 = vector.broadcast %434 : vector<1x32xf32> to vector<16x32xf32>
    %456 = arith.mulf %454, %455 : vector<16x32xf32>
    %457 = vector.broadcast %436 : vector<1x32xf32> to vector<16x32xf32>
    %458 = arith.addf %456, %457 : vector<16x32xf32>
    %459 = arith.truncf %458 : vector<16x32xf32> to vector<16x32xbf16>
    %c0_187 = arith.constant 0 : index
    %c0_188 = arith.constant 0 : index
    %c0_189 = arith.constant 0 : index
    %460 = vector.load %arg17[%c0_187, %c0_188, %c0_189] : memref<1x32x64xbf16, #tpu.memory_space<vmem>>, vector<1x32x64xbf16>
    %461 = vector.shape_cast %460 : vector<1x32x64xbf16> to vector<32x64xbf16>
    %cst_190 = arith.constant dense<0.000000e+00> : vector<16x64xf32>
    %462 = tpu.matmul %459, %461, %cst_190 {dimension_numbers = #tpu.dot_dimension_numbers<[1], [0], [0], [1], [0, 0, 1, 1], [], []>} : vector<16x32xbf16>, vector<32x64xbf16>, vector<16x64xf32> -> vector<16x64xf32>
    %c0_191 = arith.constant 0 : index
    %c0_192 = arith.constant 0 : index
    %c0_193 = arith.constant 0 : index
    %463 = vector.load %arg18[%c0_191, %c0_192, %c0_193] : memref<1x1x64xf32, #tpu.memory_space<vmem>>, vector<1x1x64xf32>
    %464 = vector.shape_cast %463 : vector<1x1x64xf32> to vector<1x64xf32>
    %465 = vector.broadcast %464 : vector<1x64xf32> to vector<16x64xf32>
    %466 = arith.addf %462, %465 : vector<16x64xf32>
    %cst_194 = arith.constant 0.000000e+00 : f32
    %467 = vector.broadcast %cst_194 : f32 to vector<16x64xf32>
    %468 = arith.maximumf %466, %467 : vector<16x64xf32>
    %469 = arith.truncf %468 : vector<16x64xf32> to vector<16x64xbf16>
    %c0_195 = arith.constant 0 : index
    %c0_196 = arith.constant 0 : index
    %c0_197 = arith.constant 0 : index
    %470 = vector.load %arg19[%c0_195, %c0_196, %c0_197] : memref<1x64x32xbf16, #tpu.memory_space<vmem>>, vector<1x64x32xbf16>
    %471 = vector.shape_cast %470 : vector<1x64x32xbf16> to vector<64x32xbf16>
    %cst_198 = arith.constant dense<0.000000e+00> : vector<16x32xf32>
    %472 = tpu.matmul %469, %471, %cst_198 {dimension_numbers = #tpu.dot_dimension_numbers<[1], [0], [0], [1], [0, 0, 1, 1], [], []>} : vector<16x64xbf16>, vector<64x32xbf16>, vector<16x32xf32> -> vector<16x32xf32>
    %c0_199 = arith.constant 0 : index
    %c0_200 = arith.constant 0 : index
    %c0_201 = arith.constant 0 : index
    %473 = vector.load %arg20[%c0_199, %c0_200, %c0_201] : memref<1x1x32xf32, #tpu.memory_space<vmem>>, vector<1x1x32xf32>
    %474 = vector.shape_cast %473 : vector<1x1x32xf32> to vector<1x32xf32>
    %475 = vector.broadcast %474 : vector<1x32xf32> to vector<16x32xf32>
    %476 = arith.addf %472, %475 : vector<16x32xf32>
    %477 = arith.addf %458, %476 : vector<16x32xf32>
    %c0_202 = arith.constant 0 : index
    %c2 = arith.constant 2 : index
    %c0_203 = arith.constant 0 : index
    %478 = vector.load %arg21[%c0_202, %c2, %c0_203] : memref<1x3x32xf32, #tpu.memory_space<vmem>>, vector<1x1x32xf32>
    %479 = vector.shape_cast %478 : vector<1x1x32xf32> to vector<1x32xf32>
    %c0_204 = arith.constant 0 : index
    %c2_205 = arith.constant 2 : index
    %c0_206 = arith.constant 0 : index
    %480 = vector.load %arg22[%c0_204, %c2_205, %c0_206] : memref<1x3x32xf32, #tpu.memory_space<vmem>>, vector<1x1x32xf32>
    %481 = vector.shape_cast %480 : vector<1x1x32xf32> to vector<1x32xf32>
    %cst_207 = arith.constant dense<0.000000e+00> : vector<16xf32>
    %482 = vector.multi_reduction <add>, %477, %cst_207 [1] : vector<16x32xf32> to vector<16xf32>
    %483 = vector.shape_cast %482 : vector<16xf32> to vector<16x1xf32>
    %cst_208 = arith.constant 3.200000e+01 : f32
    %484 = vector.broadcast %cst_208 : f32 to vector<16x1xf32>
    %485 = arith.divf %483, %484 : vector<16x1xf32>
    %486 = vector.broadcast %485 : vector<16x1xf32> to vector<16x32xf32>
    %487 = arith.subf %477, %486 : vector<16x32xf32>
    %488 = arith.mulf %487, %487 : vector<16x32xf32>
    %cst_209 = arith.constant dense<0.000000e+00> : vector<16xf32>
    %489 = vector.multi_reduction <add>, %488, %cst_209 [1] : vector<16x32xf32> to vector<16xf32>
    %490 = vector.shape_cast %489 : vector<16xf32> to vector<16x1xf32>
    %cst_210 = arith.constant 3.200000e+01 : f32
    %491 = vector.broadcast %cst_210 : f32 to vector<16x1xf32>
    %492 = arith.divf %490, %491 : vector<16x1xf32>
    %493 = vector.broadcast %485 : vector<16x1xf32> to vector<16x32xf32>
    %494 = arith.subf %477, %493 : vector<16x32xf32>
    %cst_211 = arith.constant 9.99999974E-6 : f32
    %495 = vector.broadcast %cst_211 : f32 to vector<16x1xf32>
    %496 = arith.addf %492, %495 : vector<16x1xf32>
    %497 = math.rsqrt %496 : vector<16x1xf32>
    %498 = vector.broadcast %497 : vector<16x1xf32> to vector<16x32xf32>
    %499 = arith.mulf %494, %498 : vector<16x32xf32>
    %500 = vector.broadcast %479 : vector<1x32xf32> to vector<16x32xf32>
    %501 = arith.mulf %499, %500 : vector<16x32xf32>
    %502 = vector.broadcast %481 : vector<1x32xf32> to vector<16x32xf32>
    %503 = arith.addf %501, %502 : vector<16x32xf32>
    %c0_212 = arith.constant 0 : index
    %c0_213 = arith.constant 0 : index
    %504 = vector.load %arg24[%c0_212, %c0_213] : memref<16x32xf32, #tpu.memory_space<vmem>>, vector<16x32xf32>
    tpu.vector_store %arg24[%c0_212, %c0_213], %503 {strides = array<i32>} : memref<16x32xf32, #tpu.memory_space<vmem>>, vector<16x32xf32>,
    %c1_i32 = arith.constant 1 : i32
    %505 = arith.cmpi eq, %arg1, %c1_i32 : i32
    %506 = arith.extui %505 : i1 to i32
    %c0_i32_214 = arith.constant 0 : i32
    %507 = arith.cmpi ne, %506, %c0_i32_214 : i32
    scf.if %507 {
      %508 = vector.shape_cast %503 : vector<16x32xf32> to vector<2x8x32xf32>
      %c0_215 = arith.constant 0 : index
      %c0_216 = arith.constant 0 : index
      %c0_217 = arith.constant 0 : index
      %509 = vector.load %arg23[%c0_215, %c0_216, %c0_217] : memref<2x8x32xf32, #tpu.memory_space<vmem>>, vector<2x8x32xf32>
      tpu.vector_store %arg23[%c0_215, %c0_216, %c0_217], %508 {strides = array<i32>} : memref<2x8x32xf32, #tpu.memory_space<vmem>>, vector<2x8x32xf32>,
    } else {
    }
    return
  }
  func.func @transform_0(%arg0: i32, %arg1: i32) -> (i32, i32, i32) {
    %c0_i32 = arith.constant 0 : i32
    %c0_i32_0 = arith.constant 0 : i32
    %c0_i32_1 = arith.constant 0 : i32
    return %arg0, %c0_i32, %c0_i32_0 : i32, i32, i32
  }
  func.func @transform_1(%arg0: i32, %arg1: i32) -> (i32, i32, i32) {
    %c0_i32 = arith.constant 0 : i32
    %c0_i32_0 = arith.constant 0 : i32
    %c0_i32_1 = arith.constant 0 : i32
    return %arg0, %c0_i32, %c0_i32_0 : i32, i32, i32
  }
  func.func @transform_2(%arg0: i32, %arg1: i32) -> (i32, i32) {
    %c0_i32 = arith.constant 0 : i32
    %c0_i32_0 = arith.constant 0 : i32
    %c0_i32_1 = arith.constant 0 : i32
    return %c0_i32, %c0_i32_0 : i32, i32
  }
  func.func @transform_3(%arg0: i32, %arg1: i32) -> (i32, i32, i32) {
    %c0_i32 = arith.constant 0 : i32
    %c0_i32_0 = arith.constant 0 : i32
    %c0_i32_1 = arith.constant 0 : i32
    return %arg0, %c0_i32, %c0_i32_0 : i32, i32, i32
  }
  func.func @transform_4(%arg0: i32, %arg1: i32) -> (i32, i32, i32) {
    %c0_i32 = arith.constant 0 : i32
    %c0_i32_0 = arith.constant 0 : i32
    %c0_i32_1 = arith.constant 0 : i32
    return %arg0, %c0_i32, %c0_i32_0 : i32, i32, i32
  }
  func.func @transform_5(%arg0: i32, %arg1: i32) -> (i32, i32, i32) {
    %c0_i32 = arith.constant 0 : i32
    %c0_i32_0 = arith.constant 0 : i32
    %c0_i32_1 = arith.constant 0 : i32
    return %arg1, %c0_i32, %c0_i32_0 : i32, i32, i32
  }
  func.func @transform_6(%arg0: i32, %arg1: i32) -> (i32, i32, i32) {
    %c0_i32 = arith.constant 0 : i32
    %c0_i32_0 = arith.constant 0 : i32
    %c0_i32_1 = arith.constant 0 : i32
    return %arg1, %c0_i32, %c0_i32_0 : i32, i32, i32
  }
  func.func @transform_7(%arg0: i32, %arg1: i32) -> (i32, i32, i32) {
    %c0_i32 = arith.constant 0 : i32
    %c0_i32_0 = arith.constant 0 : i32
    %c0_i32_1 = arith.constant 0 : i32
    return %arg1, %c0_i32, %c0_i32_0 : i32, i32, i32
  }
  func.func @transform_8(%arg0: i32, %arg1: i32) -> (i32, i32, i32) {
    %c0_i32 = arith.constant 0 : i32
    %c0_i32_0 = arith.constant 0 : i32
    %c0_i32_1 = arith.constant 0 : i32
    return %arg1, %c0_i32, %c0_i32_0 : i32, i32, i32
  }
  func.func @transform_9(%arg0: i32, %arg1: i32) -> (i32, i32, i32) {
    %c0_i32 = arith.constant 0 : i32
    %c0_i32_0 = arith.constant 0 : i32
    %c0_i32_1 = arith.constant 0 : i32
    return %arg1, %c0_i32, %c0_i32_0 : i32, i32, i32
  }
  func.func @transform_10(%arg0: i32, %arg1: i32) -> (i32, i32, i32) {
    %c0_i32 = arith.constant 0 : i32
    %c0_i32_0 = arith.constant 0 : i32
    %c0_i32_1 = arith.constant 0 : i32
    return %arg1, %c0_i32, %c0_i32_0 : i32, i32, i32
  }
  func.func @transform_11(%arg0: i32, %arg1: i32) -> (i32, i32, i32) {
    %c0_i32 = arith.constant 0 : i32
    %c0_i32_0 = arith.constant 0 : i32
    %c0_i32_1 = arith.constant 0 : i32
    return %arg1, %c0_i32, %c0_i32_0 : i32, i32, i32
  }
  func.func @transform_12(%arg0: i32, %arg1: i32) -> (i32, i32, i32) {
    %c0_i32 = arith.constant 0 : i32
    %c0_i32_0 = arith.constant 0 : i32
    %c0_i32_1 = arith.constant 0 : i32
    return %arg1, %c0_i32, %c0_i32_0 : i32, i32, i32
  }
  func.func @transform_13(%arg0: i32, %arg1: i32) -> (i32, i32, i32) {
    %c0_i32 = arith.constant 0 : i32
    %c0_i32_0 = arith.constant 0 : i32
    %c0_i32_1 = arith.constant 0 : i32
    return %arg1, %c0_i32, %c0_i32_0 : i32, i32, i32
  }
  func.func @transform_14(%arg0: i32, %arg1: i32) -> (i32, i32, i32) {
    %c0_i32 = arith.constant 0 : i32
    %c0_i32_0 = arith.constant 0 : i32
    %c0_i32_1 = arith.constant 0 : i32
    return %arg1, %c0_i32, %c0_i32_0 : i32, i32, i32
  }
  func.func @transform_15(%arg0: i32, %arg1: i32) -> (i32, i32, i32) {
    %c0_i32 = arith.constant 0 : i32
    %c0_i32_0 = arith.constant 0 : i32
    %c0_i32_1 = arith.constant 0 : i32
    return %arg1, %c0_i32, %c0_i32_0 : i32, i32, i32
  }
  func.func @transform_16(%arg0: i32, %arg1: i32) -> (i32, i32, i32) {
    %c0_i32 = arith.constant 0 : i32
    %c0_i32_0 = arith.constant 0 : i32
    %c0_i32_1 = arith.constant 0 : i32
    return %arg1, %c0_i32, %c0_i32_0 : i32, i32, i32
  }
  func.func @transform_17(%arg0: i32, %arg1: i32) -> (i32, i32, i32) {
    %c0_i32 = arith.constant 0 : i32
    %c0_i32_0 = arith.constant 0 : i32
    %c0_i32_1 = arith.constant 0 : i32
    return %arg1, %c0_i32, %c0_i32_0 : i32, i32, i32
  }
  func.func @transform_18(%arg0: i32, %arg1: i32) -> (i32, i32, i32) {
    %c0_i32 = arith.constant 0 : i32
    %c0_i32_0 = arith.constant 0 : i32
    %c0_i32_1 = arith.constant 0 : i32
    return %arg1, %c0_i32, %c0_i32_0 : i32, i32, i32
  }
  func.func @transform_19(%arg0: i32, %arg1: i32) -> (i32, i32, i32) {
    %c0_i32 = arith.constant 0 : i32
    %c0_i32_0 = arith.constant 0 : i32
    %c0_i32_1 = arith.constant 0 : i32
    return %arg1, %c0_i32, %c0_i32_0 : i32, i32, i32
  }
  func.func @transform_20(%arg0: i32, %arg1: i32) -> (i32, i32, i32) {
    %c0_i32 = arith.constant 0 : i32
    %c0_i32_0 = arith.constant 0 : i32
    %c0_i32_1 = arith.constant 0 : i32
    return %arg1, %c0_i32, %c0_i32_0 : i32, i32, i32
  }
  func.func @transform_21(%arg0: i32, %arg1: i32) -> (i32, i32, i32) {
    %c0_i32 = arith.constant 0 : i32
    %c0_i32_0 = arith.constant 0 : i32
    %c0_i32_1 = arith.constant 0 : i32
    return %arg0, %c0_i32, %c0_i32_0 : i32, i32, i32
  }
}

</mosaic_0001>

<bundles_post_ra>
// kernel: tpu_custom_call.1
= control target key start
LH: loop header
LB: loop body
LE: loop exit
PB: predicated region body
PF: predicated region fallthrough
CT: control target
= control target key end

     0   :  { %s6331_s0 = inlined_call_operand.hbm [shape: f32[2,8,32], index: 0, kind: input, shape index: {}]   ;;  %s6332_s1 = inlined_call_operand.hbm [shape: bf16[2,8,32], index: 1, kind: input, shape index: {}]   ;;  %s6333_s2 = inlined_call_operand.hbm [shape: f32[8,8], index: 2, kind: input, shape index: {}]   ;;  %s6334_s3 = inlined_call_operand.hbm [shape: f32[2,1,8], index: 3, kind: input, shape index: {}]   ;;  %s6335_s4 = inlined_call_operand.hbm [shape: f32[2,1,8], index: 4, kind: input, shape index: {}]   ;;  %s6336_s5 = inlined_call_operand.vmem [shape: bf16[2,32,96], index: 5, kind: input, shape index: {}]   ;;  %s6337_s6 = inlined_call_operand.hbm [shape: f32[2,1,96], index: 6, kind: input, shape index: {}]   ;;  %s6338_s7 = inlined_call_operand.vmem [shape: bf16[2,32,32], index: 7, kind: input, shape index: {}]   ;;  %s6339_s8 = inlined_call_operand.hbm [shape: f32[2,1,32], index: 8, kind: input, shape index: {}]   ;;  %s6340_s9 = inlined_call_operand.vmem [shape: bf16[2,32,32], index: 9, kind: input, shape index: {}]   ;;  %s6341_s10 = inlined_call_operand.hbm [shape: f32[2,1,32], index: 10, kind: input, shape index: {}]   ;;  %s6342_s11 = inlined_call_operand.vmem [shape: bf16[2,32,64], index: 11, kind: input, shape index: {}]   ;;  %s6343_s12 = inlined_call_operand.hbm [shape: f32[2,1,64], index: 12, kind: input, shape index: {}]   ;;  %s6344_s13 = inlined_call_operand.hbm [shape: bf16[2,32,32], index: 13, kind: input, shape index: {}]   ;;  %s6345_s14 = inlined_call_operand.vmem [shape: f32[2,1,32], index: 14, kind: input, shape index: {}]   ;;  %s6346_s15 = inlined_call_operand.hbm [shape: bf16[2,32,64], index: 15, kind: input, shape index: {}]   ;;  %s6347_s16 = inlined_call_operand.vmem [shape: f32[2,1,64], index: 16, kind: input, shape index: {}]   ;;  %s6348_s17 = inlined_call_operand.vmem [shape: bf16[2,64,32], index: 17, kind: input, shape index: {}]   ;;  %s6349_s18 = inlined_call_operand.vmem [shape: f32[2,1,32], index: 18, kind: input, shape index: {}]   ;;  %s6350_s19 = inlined_call_operand.vmem [shape: f32[2,3,32], index: 19, kind: input, shape index: {}]   ;;  %s6351_s20 = inlined_call_operand.vmem [shape: f32[2,3,32], index: 20, kind: input, shape index: {}]   ;;  %s6352_s21 = inlined_call_operand.hbm [shape: f32[2,8,32], index: 21, kind: output, shape index: {}]  }
   0x1   :  { %6393 = sst [smem:[#allocation40_spill]] %s6331_s0 }
   0x2   :  { %6394 = sst [smem:[#allocation41_spill]] %s6332_s1 }
   0x3   :  { %6395 = sst [smem:[#allocation42_spill]] %s6333_s2 }
   0x4   :  { %6396 = sst [smem:[#allocation43_spill]] %s6334_s3 }
   0x5   :  { %6397 = sst [smem:[#allocation44_spill]] %s6335_s4 }
   0x6   :  { %6398 = sst [smem:[#allocation45_spill]] %s6336_s5 }
   0x7   :  { %6399 = sst [smem:[#allocation46_spill]] %s6337_s6 }
   0x8   :  { %6400 = sst [smem:[#allocation47_spill]] %s6338_s7 }
   0x9   :  { %6401 = sst [smem:[#allocation48_spill]] %s6339_s8 }
   0xa   :  { %6402 = sst [smem:[#allocation49_spill]] %s6340_s9 }
   0xb   :  { %6403 = sst [smem:[#allocation50_spill]] %s6341_s10 }
   0xc   :  { %6404 = sst [smem:[#allocation51_spill]] %s6342_s11 }
   0xd   :  { %6405 = sst [smem:[#allocation52_spill]] %s6343_s12 }
   0xe   :  { %6406 = sst [smem:[#allocation53_spill]] %s6344_s13 }
   0xf   :  { %6407 = sst [smem:[#allocation54_spill]] %s6345_s14 }
  0x10   :  { %6408 = sst [smem:[#allocation55_spill]] %s6347_s16 }
  0x11   :  { %6409 = sst [smem:[#allocation56_spill]] %s6348_s17 }
  0x12   :  { %6410 = sst [smem:[#allocation57_spill]] %s6349_s18 }
  0x13   :  { %6411 = sst [smem:[#allocation58_spill]] %s6350_s19 }
  0x14   :  { %6412 = sst [smem:[#allocation59_spill]] %s6351_s20 }
  0x15   :  { %6413 = sst [smem:[#allocation60_spill]] %s6352_s21 }
  0x16   :  { %26 = vsyncpa [#allocation6], 0 }
  0x17   :  { %27 = vsyncpa [#allocation9], 0 }
  0x18   :  { %28 = vsyncpa [#allocation12], 0 }
  0x19   :  { %29 = vsyncpa [#allocation15], 0 }
  0x1a   :  { %31 = vsyncpa [#allocation15 + $0x1], 0 }
  0x1b   :  { %32 = vsyncpa [#allocation18], 0 }
  0x1c   :  { %34 = vsyncpa [#allocation18 + $0x1], 0 }
  0x1d   :  { %35 = vsyncpa [#allocation21], 0 }
  0x1e   :  { %37 = vsyncpa [#allocation21 + $0x1], 0 }
  0x1f   :  { %38 = vsyncpa [#allocation7], 0  ;;  %s5269_s2 = smov 0   ;;  %s5271_s25 = smov 0  }
  0x20   :  { %s5273_s26 = smov 0   ;;  %s5275_s27 = smov 0  }
  0x21   :  { %s5277_s3 = smov 0   ;;  %s5279_s28 = smov 0  }
  0x22 LB: > { %6414 = sst [smem:[#allocation31_spill]] %s5106_s25  ;;  %s5124_s29 = smov [#allocation8]   ;;  %s5122_s28 = sphi %s5279_s28, %s44_s28   ;;  %s5118_s3 = sphi %s5277_s3, %s6494_s3   ;;  %s5114_s27 = sphi %s5275_s27, %s6493_s27   ;;  %s5110_s26 = sphi %s5273_s26, %s6492_s26   ;;  %s5106_s25 = sphi %s5271_s25, %s6491_s25   ;;  %s5102_s2 = sphi %s5269_s2, %s6490_s2  }
  0x23   : > { %6415 = sst [smem:[#allocation32_spill]] %s5110_s26  ;;  %s659_s0 = sshll.u32 %s5124_s29, 4  ;;  %s5305_s0 = int_to_ptr.vmem [resolvable:$true] %s659_s0 }
  0x24   : > { %6416 = sst [smem:[#allocation33_spill]] %s5114_s27  ;;  %s5300_s4 = sadd.s32 4294967295, %s5122_s28  }
  0x25   : > { %6417 = sst [smem:[#allocation34_spill]] %s5118_s3  ;;  %p3986_p0 = scmp.ge.s32.totalorder %s5122_s28, 1 }
  0x26   : > { %6418 = sst [smem:[#allocation35_spill]] %s5122_s28  ;;  %p6368_p1 = scmp.eq.s32.totalorder %s5300_s4, 0 }
  0x27   : > { %6419 = sst [smem:[#allocation36_spill]] %s5300_s4  ;;  %p628_p2 = scmp.lt.s32.totalorder %s5122_s28, 3 }
  0x28   : > { %s5125_s5 = smov [#allocation11]   ;;  %s6422_s29 = sld [smem:[#allocation41_spill]] }
  0x29   : > { %p5307_p3 = pnand %p3986_p0, %p628_p2  ;;  %s686_s22 = sshll.u32 %s5125_s5, 4  ;;  %s5319_s22 = int_to_ptr.vmem [resolvable:$true] %s686_s22 }
  0x2b   : > { %s6420_s30 = scalar_select %p5307_p3, 1, 0 }
  0x2c   : > { %p4484_p4 = pneg %p5307_p3 }
  0x2e   : > { %p5315_p5 = pnand %p4484_p4, %p6368_p1  ;;  %s4702_s21 = scalar_lea.hbm %s6422_s29, 128 }
  0x2f   : > { %p4703_p6 = scmp.ne.s32.totalorder %s6422_s29, %s4702_s21  ;;  %p4709_p10 = scmp.lt.u32.totalorder %s4702_s21, %s6422_s29 }
  0x30   : > { %s6421_s23 = scalar_select %p5315_p5, 1, 0 }
  0x31   : > { %p5329_p7 = pneg %p5315_p5 }
  0x33   : > { %s6423_s18 = scalar_select %p5329_p7, 1, 0 }
  0x34   : > { %p4705_p8 = pnand %p5329_p7, %p4703_p6 }
  0x36   : > { %p4706_p9 = pneg %p4705_p8 }
  0x38   : > { %p4711_p11 = pnand %p4709_p10, %p4706_p9 }
  0x3a   : > { %4714 = shalt.err (!%p4711_p11)
}
  0x3b   : > { %s4715_s19 = scalar_lea.vmem %s5305_s0, 128  ;;  %p4723_p2 = scmp.lt.s32.totalorder %s5305_s0, %s5305_s0 }
  0x3c   : > { %p4716_p12 = scmp.ne.s32.totalorder %s5305_s0, %s4715_s19  ;;  %p4724_p4 = scmp.lt.s32.totalorder %s4715_s19, %s4715_s19 }
  0x3e   : > { %p4718_p13 = pnand %p4716_p12, %p5329_p7  ;;  %p4725_p6 = por %p4724_p4, %p4723_p2 }
  0x40   : > { %p4719_p0 = pneg %p4718_p13 }
  0x42   : > { %p4726_p8 = pnand %p4725_p6, %p4719_p0 }
  0x44   : > { %4729 = shalt.err (!%p4726_p8)
}
  0x45   : > { %s6361_s20 = smov 64   ;;  %s6363_s17 = smov 4  }
  0x46   : > { %4490 = dma.hbm_to_vmem [thread:$0]  (!%p5315_p5), %s6422_s29, 128, %s5305_s0, [#allocation9], %s6361_s20, %s6361_s20, %s6363_s17  }
  0x47   : > { %s6424_s16 = sld [smem:[#allocation43_spill]] }
  0x4d   : > { %s4730_s19 = scalar_lea.hbm %s6424_s16, 32 }
  0x4e   : > { %p4731_p9 = scmp.ne.s32.totalorder %s6424_s16, %s4730_s19  ;;  %p4737_p12 = scmp.lt.u32.totalorder %s4730_s19, %s6424_s16 }
  0x50   : > { %p4733_p10 = pnand %p4731_p9, %p5329_p7 }
  0x52   : > { %p4734_p11 = pneg %p4733_p10 }
  0x54   : > { %p4739_p13 = pnand %p4737_p12, %p4734_p11 }
  0x56   : > { %4742 = shalt.err (!%p4739_p13)
}
  0x57   : > { %s4743_s0 = scalar_lea.vmem %s5319_s22, 32  ;;  %p4751_p6 = scmp.lt.s32.totalorder %s5319_s22, %s5319_s22 }
  0x58   : > { %p4744_p0 = scmp.ne.s32.totalorder %s5319_s22, %s4743_s0  ;;  %p4752_p8 = scmp.lt.s32.totalorder %s4743_s0, %s4743_s0 }
  0x5a   : > { %p4746_p2 = pnand %p4744_p0, %p5329_p7  ;;  %p4753_p9 = por %p4752_p8, %p4751_p6 }
  0x5c   : > { %p4747_p4 = pneg %p4746_p2 }
  0x5e   : > { %p4754_p10 = pnand %p4753_p9, %p4747_p4 }
  0x60   : > { %4757 = shalt.err (!%p4754_p10)
}
  0x61   : > { %s6359_s9 = smov 16   ;;  %s6360_s7 = smov 1  }
  0x62   : > { %4496 = dma.hbm_to_vmem [thread:$0]  (!%p5315_p5), %s6424_s16, 32, %s5319_s22, [#allocation12], %s6359_s9, %s6359_s9, %s6360_s7  }
  0x63   : > { %s53_s21 = sadd.s32 1, %s5118_s3  ;;  %s214_s1 = sadd.s32 1, %s5110_s26 }
  0x64   : > { %p54_p11 = scmp.ge.s32.totalorder %s53_s21, 2  ;;  %p221_p12 = scmp.ne.s32.totalorder %s5110_s26, %s5106_s25 }
  0x65   : > { %p222_p13 = scmp.eq.s32.totalorder %s5122_s28, 0  ;;  %p227_p0 = scmp.ne.s32.totalorder %s5106_s25, %s5102_s2 }
  0x66   : > { %s6496_s21 = smov (%p54_p11, %s53_s21), 0  ;;  %p4524_p6 = scmp.lt.s32.totalorder %s5122_s28, 2 }
  0x67   : > { %6425 = sst [smem:[#allocation37_spill]] %s6496_s21  ;;  %p5388_p2 = por %p222_p13, %p221_p12 }
  0x68   : > { %p5394_p4 = por %p6368_p1, %p227_p0  ;;  %s211_s22 = ssub.s32 %s5118_s3, %s6496_s21 }
  0x69   : > { %p212_p8 = scmp.eq.s32.totalorder %s211_s22, 0  ;;  %s5402_s19 = sand.u32 1, %s5122_s28  }
  0x6a   : > { %s6427_s5 = scalar_select %p5394_p4, 1, 0 }
  0x6b   : > { %s5405_s2 = sand.u32 1, %s5110_s26   ;;  %s5411_s11 = sshll.u32 %s5118_s3, 4 }
  0x6c   : > { %6428 = sst [smem:[#allocation38_spill]] %s6427_s5  ;;  %s6430_s6 = sld [smem:[#allocation46_spill]] }
  0x6d   : > { %s5408_s0 = scalar_select %p212_p8, %s5110_s26, %s214_s1  }
  0x6e   : > { %s727_s22 = scalar_lea.vmem [#allocation14], %s5405_s2  ;;  %p5424_p9 = pnand %p4524_p6, %p5388_p2 }
  0x6f   : > { %6429 = sst [smem:[#allocation39_spill]] %s5408_s0  ;;  %s734_s20 = sshll.u32 %s727_s22, 4  ;;  %s5420_s20 = int_to_ptr.vmem [resolvable:$true] %s734_s20 }
  0x70   : > { %s6431_s1 = scalar_select %p5424_p9, 1, 0 }
  0x71   : > { %p5433_p11 = pneg %p5424_p9 }
  0x72   : > { %s5417_s7 = scalar_lea.hbm %s6430_s6, %s5411_s11  ;;  %s4763_s24 = scalar_lea.hbm %s6430_s6, 32 }
  0x73   : > { %s4758_s16 = scalar_lea.hbm %s5417_s7, 16  ;;  %p4764_p0 = scmp.lt.u32.totalorder %s5417_s7, %s6430_s6 }
  0x74   : > { %p4759_p10 = scmp.ne.s32.totalorder %s5417_s7, %s4758_s16  ;;  %p4765_p2 = scmp.lt.u32.totalorder %s4763_s24, %s4758_s16 }
  0x75   : > { %s6432_s9 = scalar_select %p5433_p11, 1, 0 }
  0x76   : > { %p4761_p12 = pnand %p5433_p11, %p4759_p10  ;;  %p4766_p6 = por %p4765_p2, %p4764_p0 }
  0x77   : > { %p4767_p8 = scmp.lt.u32.totalorder %s4758_s16, %s5417_s7 }
  0x78   : > { %p4762_p13 = pneg %p4761_p12 }
  0x79   : > { %p4768_p1 = por %p4767_p8, %p4766_p6 }
  0x7b   : > { %p4769_p4 = pnand %p4768_p1, %p4762_p13 }
  0x7d   : > { %4772 = shalt.err (!%p4769_p4)
}
  0x7e   : > { %s4773_s17 = scalar_lea.vmem %s5420_s20, 16  ;;  %s5130_s14 = smov [#allocation14]  }
  0x7f   : > { %p4774_p10 = scmp.ne.s32.totalorder %s5420_s20, %s4773_s17  ;;  %s4778_s22 = sshll.u32 %s5130_s14, 4  ;;  %s4779_s22 = int_to_ptr.vmem [resolvable:$false] %s4778_s22 }
  0x80   : > { %s4780_s29 = scalar_lea.vmem %s4779_s22, 32  ;;  %p4781_p5 = scmp.lt.s32.totalorder %s5420_s20, %s4779_s22 }
  0x81   : > { %p4776_p12 = pnand %p4774_p10, %p5433_p11  ;;  %p4782_p7 = scmp.lt.s32.totalorder %s4780_s29, %s4773_s17 }
  0x83   : > { %p4777_p3 = pneg %p4776_p12  ;;  %p4783_p0 = por %p4782_p7, %p4781_p5 }
  0x85   : > { %p4784_p2 = pnand %p4783_p0, %p4777_p3 }
  0x87   : > { %4787 = shalt.err (!%p4784_p2)
}
  0x88   : > { %s6433_s16 = scalar_lea.sflag [#allocation15], %s5402_s19  ;;  %s6434_s10 = sld [smem:[#allocation50_spill]] }
  0x89   : > { %4503 = dma.hbm_to_vmem [thread:$0]  (!%p5424_p9), %s5417_s7, 16, %s5420_s20, %s6433_s16  }
  0x8a   : > { %s777_s17 = scalar_lea.vmem [#allocation17], %s5405_s2  ;;  %s3997_s29 = sshll.u32 %s5405_s2, 4 }
  0x8b   : > { %s784_s22 = sshll.u32 %s777_s17, 4  ;;  %s6375_s6 = scalar_lea.sflag [#allocation18], %s5402_s19  ;;  %s5465_s22 = int_to_ptr.vmem [resolvable:$true] %s784_s22 }
  0x8e   : > { %s5462_s14 = scalar_lea.hbm %s6434_s10, %s5411_s11  ;;  %s4793_s16 = scalar_lea.hbm %s6434_s10, 32 }
  0x8f   : > { %s4788_s0 = scalar_lea.hbm %s5462_s14, 16  ;;  %p4794_p7 = scmp.lt.u32.totalorder %s5462_s14, %s6434_s10 }
  0x90   : > { %p4789_p1 = scmp.ne.s32.totalorder %s5462_s14, %s4788_s0  ;;  %p4795_p4 = scmp.lt.u32.totalorder %s4793_s16, %s4788_s0 }
  0x91   : > { %p4797_p6 = scmp.lt.u32.totalorder %s4788_s0, %s5462_s14 }
  0x92   : > { %p4791_p3 = pnand %p4789_p1, %p5433_p11  ;;  %p4796_p13 = por %p4795_p4, %p4794_p7 }
  0x94   : > { %p4792_p5 = pneg %p4791_p3  ;;  %p4798_p8 = por %p4797_p6, %p4796_p13 }
  0x96   : > { %p4799_p10 = pnand %p4798_p8, %p4792_p5 }
  0x98   : > { %4802 = shalt.err (!%p4799_p10)
}
  0x99   : > { %s4803_s17 = scalar_lea.vmem %s5465_s22, 16  ;;  %s5131_s20 = smov [#allocation17]  }
  0x9a   : > { %p4804_p12 = scmp.ne.s32.totalorder %s5465_s22, %s4803_s17  ;;  %s4808_s7 = sshll.u32 %s5131_s20, 4  ;;  %s4809_s7 = int_to_ptr.vmem [resolvable:$false] %s4808_s7 }
  0x9b   : > { %s4810_s21 = scalar_lea.vmem %s4809_s7, 32  ;;  %p4811_p1 = scmp.lt.s32.totalorder %s5465_s22, %s4809_s7 }
  0x9c   : > { %p4806_p0 = pnand %p4804_p12, %p5433_p11  ;;  %p4812_p3 = scmp.lt.s32.totalorder %s4810_s21, %s4803_s17 }
  0x9e   : > { %p4807_p2 = pneg %p4806_p0  ;;  %p4813_p7 = por %p4812_p3, %p4811_p1 }
  0xa0   : > { %p4814_p4 = pnand %p4813_p7, %p4807_p2 }
  0xa2   : > { %4817 = shalt.err (!%p4814_p4)
}
  0xa3   : > { %4509 = dma.hbm_to_vmem [thread:$0]  (!%p5424_p9), %s5462_s14, 16, %s5465_s22, %s6375_s6  }
  0xa4   : > { %s4102_s0 = sshll.u32 %s5118_s3, 8  ;;  %s6435_s13 = sld [smem:[#allocation53_spill]] }
  0xa5   : > { %s820_s20 = scalar_lea.vmem [#allocation20], %s3997_s29  ;;  %s6387_s21 = scalar_lea.sflag [#allocation21], %s5402_s19 }
  0xa6   : > { %s827_s7 = sshll.u32 %s820_s20, 4  ;;  %s5502_s7 = int_to_ptr.vmem [resolvable:$true] %s827_s7 }
  0xaa   : > { %s5498_s17 = scalar_lea.hbm %s6435_s13, %s4102_s0  ;;  %s4823_s16 = scalar_lea.hbm %s6435_s13, 512 }
  0xab   : > { %s4818_s10 = scalar_lea.hbm %s5498_s17, 256  ;;  %p4824_p8 = scmp.lt.u32.totalorder %s5498_s17, %s6435_s13 }
  0xac   : > { %p4819_p5 = scmp.ne.s32.totalorder %s5498_s17, %s4818_s10  ;;  %p4825_p10 = scmp.lt.u32.totalorder %s4823_s16, %s4818_s10 }
  0xad   : > { %p4827_p0 = scmp.lt.u32.totalorder %s4818_s10, %s5498_s17 }
  0xae   : > { %p4821_p13 = pnand %p4819_p5, %p5433_p11  ;;  %p4826_p12 = por %p4825_p10, %p4824_p8 }
  0xb0   : > { %p4822_p6 = pneg %p4821_p13  ;;  %p4828_p2 = por %p4827_p0, %p4826_p12 }
  0xb2   : > { %p4829_p1 = pnand %p4828_p2, %p4822_p6 }
  0xb4   : > { %4832 = shalt.err (!%p4829_p1)
}
  0xb5   : > { %s4833_s20 = scalar_lea.vmem %s5502_s7, 256  ;;  %s5132_s14 = smov [#allocation20]  }
  0xb6   : > { %p4834_p3 = scmp.ne.s32.totalorder %s5502_s7, %s4833_s20  ;;  %s4838_s22 = sshll.u32 %s5132_s14, 4  ;;  %s4839_s22 = int_to_ptr.vmem [resolvable:$false] %s4838_s22 }
  0xb7   : > { %s4840_s6 = scalar_lea.vmem %s4839_s22, 512  ;;  %p4841_p5 = scmp.lt.s32.totalorder %s5502_s7, %s4839_s22 }
  0xb8   : > { %p4836_p7 = pnand %p4834_p3, %p5433_p11  ;;  %p4842_p13 = scmp.lt.s32.totalorder %s4840_s6, %s4833_s20 }
  0xba   : > { %p4837_p4 = pneg %p4836_p7  ;;  %p4843_p8 = por %p4842_p13, %p4841_p5 }
  0xbc   : > { %p4844_p10 = pnand %p4843_p8, %p4837_p4 }
  0xbe   : > { %4847 = shalt.err (!%p4844_p10)
}
  0xbf   : > { %s6436_s10 = smov 4   ;;  %s6437_s16 = smov 64  }
  0xc0   : > { %4515 = dma.hbm_to_vmem [thread:$0]  (!%p5424_p9), %s5498_s17, 256, %s5502_s7, %s6387_s21, %s6437_s16, %s6437_s16, %s6436_s10  }
  0xc1   : > { %s5536_s20 = scalar_lea.hbm %s6346_s15, %s4102_s0  ;;  %s5540_s22 = scalar_lea.vmem [#allocation22], %s3997_s29 }
  0xc2   : > { %s5133_s13 = smov [#allocation5]   ;;  %s6438_s5 = sld [smem:[#allocation40_spill]] }
  0xc3   : > { %s643_s26 = sshll.u32 %s5133_s13, 4  ;;  %p6439_p12 = scmp.ne.s32.totalorder %s6423_s18, 0  ;;  %s644_s26 = int_to_ptr.vmem [resolvable:$true] %s643_s26 }
  0xc8   : > { %s4848_s25 = scalar_lea.hbm %s6438_s5, 256 }
  0xc9   : > { %p4849_p6 = scmp.ne.s32.totalorder %s6438_s5, %s4848_s25  ;;  %p4855_p1 = scmp.lt.u32.totalorder %s4848_s25, %s6438_s5 }
  0xcb   : > { %p4851_p0 = pnand %p4849_p6, %p6439_p12 }
  0xcd   : > { %p4852_p2 = pneg %p4851_p0 }
  0xcf   : > { %p4857_p3 = pnand %p4855_p1, %p4852_p2 }
  0xd1   : > { %4860 = shalt.err (!%p4857_p3)
}
  0xd2   : > { %s4861_s29 = scalar_lea.vmem %s644_s26, 256  ;;  %p4869_p13 = scmp.lt.s32.totalorder %s644_s26, %s644_s26 }
  0xd3   : > { %p4862_p7 = scmp.ne.s32.totalorder %s644_s26, %s4861_s29  ;;  %p4870_p8 = scmp.lt.s32.totalorder %s4861_s29, %s4861_s29 }
  0xd5   : > { %p4864_p4 = pnand %p4862_p7, %p6439_p12  ;;  %p4871_p10 = por %p4870_p8, %p4869_p13 }
  0xd7   : > { %p4865_p5 = pneg %p4864_p4 }
  0xd9   : > { %p4872_p9 = pnand %p4871_p10, %p4865_p5 }
  0xdb   : > { %4875 = shalt.err (!%p4872_p9)
}
  0xdc   : > { %s5134_s13 = smov 128   ;;  %s5135_s27 = smov 8  }
  0xdd   : > { %p6440_p6 = scmp.ne.s32.totalorder %s6421_s23, 0  ;;  %s5136_s4 = smov [#allocation10]  }
  0xde   : > { %s673_s24 = sshll.u32 %s5136_s4, 4  ;;  %s5137_s14 = smov [#allocation13]   ;;  %s674_s24 = int_to_ptr.vmem [resolvable:$true] %s673_s24 }
  0xdf   : > { %4487 = dma.hbm_to_vmem [thread:$0]  (!%p6440_p6), %s6438_s5, 256, %s644_s26, [#allocation6], %s5134_s13, %s5134_s13, %s5135_s27  }
  0xe0   : > { %s702_s17 = sshll.u32 %s5137_s14, 4  ;;  %s6441_s29 = sld [smem:[#allocation42_spill]]  ;;  %s5561_s17 = int_to_ptr.vmem [resolvable:$true] %s702_s17 }
  0xe6   : > { %s4876_s21 = scalar_lea.hbm %s6441_s29, 128 }
  0xe7   : > { %p4877_p9 = scmp.ne.s32.totalorder %s6441_s29, %s4876_s21  ;;  %p4883_p1 = scmp.lt.u32.totalorder %s4876_s21, %s6441_s29 }
  0xe9   : > { %p4879_p0 = pnand %p4877_p9, %p6439_p12 }
  0xeb   : > { %p4880_p2 = pneg %p4879_p0 }
  0xed   : > { %p4885_p3 = pnand %p4883_p1, %p4880_p2 }
  0xef   : > { %4888 = shalt.err (!%p4885_p3)
}
  0xf0   : > { %s4889_s13 = scalar_lea.vmem %s674_s24, 128  ;;  %p4897_p13 = scmp.lt.s32.totalorder %s674_s24, %s674_s24 }
  0xf1   : > { %p4890_p7 = scmp.ne.s32.totalorder %s674_s24, %s4889_s13  ;;  %p4898_p8 = scmp.lt.s32.totalorder %s4889_s13, %s4889_s13 }
  0xf3   : > { %p4892_p4 = pnand %p4890_p7, %p6439_p12  ;;  %p4899_p10 = por %p4898_p8, %p4897_p13 }
  0xf5   : > { %p4893_p5 = pneg %p4892_p4 }
  0xf7   : > { %p4900_p11 = pnand %p4899_p10, %p4893_p5 }
  0xf9   : > { %4903 = shalt.err (!%p4900_p11)
}
  0xfa   : > { %4493 = dma.hbm_to_vmem [thread:$0]  (!%p6440_p6), %s6441_s29, 128, %s674_s24, [#allocation9]  }
  0xfb   : > { %s6442_s25 = sld [smem:[#allocation44_spill]] }
 0x101   : > { %s6443_s4 = smov %s6442_s25  ;;  %s4904_s14 = scalar_lea.hbm %s6442_s25, 32 }
 0x102   : > { %p4905_p9 = scmp.ne.s32.totalorder %s6443_s4, %s4904_s14  ;;  %p4911_p11 = scmp.lt.u32.totalorder %s4904_s14, %s6443_s4 }
 0x104   : > { %p4907_p0 = pnand %p4905_p9, %p6439_p12 }
 0x106   : > { %p4908_p2 = pneg %p4907_p0 }
 0x108   : > { %p4913_p1 = pnand %p4911_p11, %p4908_p2 }
 0x10a   : > { %4916 = shalt.err (!%p4913_p1)
}
 0x10b   : > { %s4917_s24 = scalar_lea.vmem %s5561_s17, 32  ;;  %p4925_p5 = scmp.lt.s32.totalorder %s5561_s17, %s5561_s17 }
 0x10c   : > { %p4918_p3 = scmp.ne.s32.totalorder %s5561_s17, %s4917_s24  ;;  %p4926_p13 = scmp.lt.s32.totalorder %s4917_s24, %s4917_s24 }
 0x10e   : > { %p4920_p7 = pnand %p4918_p3, %p6439_p12  ;;  %p4927_p8 = por %p4926_p13, %p4925_p5 }
 0x110   : > { %p4921_p4 = pneg %p4920_p7 }
 0x112   : > { %p4928_p10 = pnand %p4927_p8, %p4921_p4 }
 0x114   : > { %4931 = shalt.err (!%p4928_p10)
}
 0x115   : > { %s6444_s13 = smov 1   ;;  %s6445_s3 = smov 16  }
 0x116   : > { %4499 = dma.hbm_to_vmem [thread:$0]  (!%p6440_p6), %s6443_s4, 32, %s5561_s17, [#allocation12], %s6445_s3, %s6445_s3, %s6444_s13  }
 0x117   : > { %s6446_s8 = sld [smem:[#allocation48_spill]]  ;;  %s752_s23 = scalar_lea.vmem [#allocation16], %s5405_s2 }
 0x118   : > { %s759_s14 = sshll.u32 %s752_s23, 4  ;;  %s6447_s12 = sld [smem:[#allocation52_spill]]  ;;  %s760_s14 = int_to_ptr.vmem [resolvable:$true] %s759_s14 }
 0x119   : > { %p6448_p6 = scmp.ne.s32.totalorder %s6432_s9, 0 }
 0x11d   : > { %s5611_s25 = scalar_lea.hbm %s6446_s8, %s5411_s11  ;;  %s4937_s13 = scalar_lea.hbm %s6446_s8, 32 }
 0x11e   : > { %s5618_s28 = scalar_lea.hbm %s6447_s12, %s5411_s11  ;;  %s4932_s26 = scalar_lea.hbm %s5611_s25, 16 }
 0x11f   : > { %p4933_p12 = scmp.ne.s32.totalorder %s5611_s25, %s4932_s26  ;;  %p4938_p2 = scmp.lt.u32.totalorder %s5611_s25, %s6446_s8 }
 0x120   : > { %p4939_p11 = scmp.lt.u32.totalorder %s4937_s13, %s4932_s26  ;;  %p4941_p3 = scmp.lt.u32.totalorder %s4932_s26, %s5611_s25 }
 0x121   : > { %p4935_p9 = pnand %p4933_p12, %p6448_p6 }
 0x122   : > { %p4940_p1 = por %p4939_p11, %p4938_p2 }
 0x123   : > { %p4936_p0 = pneg %p4935_p9 }
 0x124   : > { %p4942_p7 = por %p4941_p3, %p4940_p1 }
 0x126   : > { %p4943_p4 = pnand %p4942_p7, %p4936_p0 }
 0x128   : > { %4946 = shalt.err (!%p4943_p4)
}
 0x129   : > { %s4947_s11 = scalar_lea.vmem %s760_s14, 16  ;;  %s5138_s21 = smov [#allocation16]  }
 0x12a   : > { %p4948_p5 = scmp.ne.s32.totalorder %s760_s14, %s4947_s11  ;;  %s4952_s18 = sshll.u32 %s5138_s21, 4  ;;  %s4953_s18 = int_to_ptr.vmem [resolvable:$false] %s4952_s18 }
 0x12b   : > { %s4954_s27 = scalar_lea.vmem %s4953_s18, 32  ;;  %p4955_p10 = scmp.lt.s32.totalorder %s760_s14, %s4953_s18 }
 0x12c   : > { %p4950_p13 = pnand %p4948_p5, %p6448_p6  ;;  %p4956_p12 = scmp.lt.s32.totalorder %s4954_s27, %s4947_s11 }
 0x12e   : > { %p4951_p8 = pneg %p4950_p13  ;;  %p4957_p9 = por %p4956_p12, %p4955_p10 }
 0x130   : > { %p4958_p2 = pnand %p4957_p9, %p4951_p8 }
 0x132   : > { %4961 = shalt.err (!%p4958_p2)
}
 0x133   : > { %p6449_p11 = scmp.ne.s32.totalorder %s6431_s1, 0  ;;  %s6450_s23 = scalar_lea.sflag [#allocation15], %s5402_s19 }
 0x134   : > { %s6451_s0 = sshll.u32 %s5540_s22, 4  ;;  %s802_s7 = scalar_lea.vmem [#allocation19], %s5405_s2  ;;  %s5641_s0 = int_to_ptr.vmem [resolvable:$true] %s6451_s0 }
 0x135   : > { %4506 = dma.hbm_to_vmem [thread:$0]  (!%p6449_p11), %s5611_s25, 16, %s760_s14, %s6450_s23  }
 0x136   : > { %s809_s26 = sshll.u32 %s802_s7, 4  ;;  %s4962_s17 = scalar_lea.hbm %s5618_s28, 16  ;;  %s810_s26 = int_to_ptr.vmem [resolvable:$true] %s809_s26 }
 0x137   : > { %p4963_p0 = scmp.ne.s32.totalorder %s5618_s28, %s4962_s17  ;;  %s4967_s3 = scalar_lea.hbm %s6447_s12, 32 }
 0x138   : > { %p4968_p7 = scmp.lt.u32.totalorder %s5618_s28, %s6447_s12  ;;  %p4969_p4 = scmp.lt.u32.totalorder %s4967_s3, %s4962_s17 }
 0x139   : > { %p4965_p1 = pnand %p4963_p0, %p6448_p6  ;;  %p4971_p13 = scmp.lt.u32.totalorder %s4962_s17, %s5618_s28 }
 0x13a   : > { %p4970_p5 = por %p4969_p4, %p4968_p7 }
 0x13b   : > { %p4966_p3 = pneg %p4965_p1 }
 0x13c   : > { %p4972_p8 = por %p4971_p13, %p4970_p5 }
 0x13e   : > { %p4973_p10 = pnand %p4972_p8, %p4966_p3 }
 0x140   : > { %4976 = shalt.err (!%p4973_p10)
}
 0x141   : > { %s4977_s2 = scalar_lea.vmem %s810_s26, 16  ;;  %s5139_s22 = smov [#allocation19]  }
 0x142   : > { %p4978_p12 = scmp.ne.s32.totalorder %s810_s26, %s4977_s2  ;;  %s4982_s25 = sshll.u32 %s5139_s22, 4  ;;  %s4983_s25 = int_to_ptr.vmem [resolvable:$false] %s4982_s25 }
 0x143   : > { %s4984_s14 = scalar_lea.vmem %s4983_s25, 32  ;;  %p4985_p0 = scmp.lt.s32.totalorder %s810_s26, %s4983_s25 }
 0x144   : > { %p4980_p9 = pnand %p4978_p12, %p6448_p6  ;;  %p4986_p1 = scmp.lt.s32.totalorder %s4984_s14, %s4977_s2 }
 0x146   : > { %p4981_p2 = pneg %p4980_p9  ;;  %p4987_p11 = por %p4986_p1, %p4985_p0 }
 0x148   : > { %p4988_p4 = pnand %p4987_p11, %p4981_p2 }
 0x14a   : > { %4991 = shalt.err (!%p4988_p4)
}
 0x14b   : > { %p6452_p7 = scmp.ne.s32.totalorder %s6431_s1, 0  ;;  %s6453_s21 = scalar_lea.sflag [#allocation18], %s5402_s19 }
 0x14c   : > { %s4992_s18 = scalar_lea.hbm %s5536_s20, 256  ;;  %s4997_s7 = scalar_lea.hbm %s6346_s15, 512 }
 0x14d   : > { %4512 = dma.hbm_to_vmem [thread:$0]  (!%p6452_p7), %s5618_s28, 16, %s810_s26, %s6453_s21  }
 0x14e   : > { %p4993_p3 = scmp.ne.s32.totalorder %s5536_s20, %s4992_s18  ;;  %p4998_p11 = scmp.lt.u32.totalorder %s5536_s20, %s6346_s15 }
 0x14f   : > { %p4999_p8 = scmp.lt.u32.totalorder %s4997_s7, %s4992_s18  ;;  %p5001_p12 = scmp.lt.u32.totalorder %s4992_s18, %s5536_s20 }
 0x150   : > { %p4995_p5 = pnand %p4993_p3, %p6448_p6 }
 0x151   : > { %p5000_p10 = por %p4999_p8, %p4998_p11 }
 0x152   : > { %p4996_p13 = pneg %p4995_p5 }
 0x153   : > { %p5002_p9 = por %p5001_p12, %p5000_p10 }
 0x155   : > { %p5003_p2 = pnand %p5002_p9, %p4996_p13 }
 0x157   : > { %5006 = shalt.err (!%p5003_p2)
}
 0x158   : > { %s5007_s28 = scalar_lea.vmem %s5641_s0, 256  ;;  %s5140_s26 = smov [#allocation22]  }
 0x159   : > { %p5008_p0 = scmp.ne.s32.totalorder %s5641_s0, %s5007_s28  ;;  %s5012_s13 = sshll.u32 %s5140_s26, 4  ;;  %s5013_s13 = int_to_ptr.vmem [resolvable:$false] %s5012_s13 }
 0x15a   : > { %s5014_s3 = scalar_lea.vmem %s5013_s13, 512  ;;  %p5015_p3 = scmp.lt.s32.totalorder %s5641_s0, %s5013_s13 }
 0x15b   : > { %p5010_p1 = pnand %p5008_p0, %p6448_p6  ;;  %p5016_p5 = scmp.lt.s32.totalorder %s5014_s3, %s5007_s28 }
 0x15d   : > { %p5011_p4 = pneg %p5010_p1  ;;  %p5017_p11 = por %p5016_p5, %p5015_p3 }
 0x15f   : > { %p5018_p8 = pnand %p5017_p11, %p5011_p4 }
 0x161   : > { %5021 = shalt.err (!%p5018_p8)
}
 0x162   : > { %s6454_s6 = scalar_lea.sflag [#allocation21], %s5402_s19  ;;  %p6455_p6 = scmp.ne.s32.totalorder %s6420_s30, 0 }
 0x163   : > { %4518 = dma.hbm_to_vmem [thread:$0]  (!%p6452_p7), %s5536_s20, 256, %s5641_s0, %s6454_s6, %s6437_s16, %s6437_s16, %s6436_s10  }
 0x164   : > { %900 = sbr.rel (%p6455_p6) target bundleno = 4896 (0x1320), region = 104  ;;  %s6456_s9 = sld [smem:[#allocation36_spill]] (!%p6455_p6) }
 0x16a   : > { %p6457_p13 = scmp.eq.s32.totalorder (!%p6455_p6), %s6456_s9, 0 }
 0x16c   : > { %5073 = dma.done.wait (%p6457_p13), [#allocation6], 256   ;;  %p6458_p10 = pmov %p6457_p13 }
 0x16e   : > { %5075 = vsyncadd (%p6458_p10), [#allocation6], 4294967040  ;;  %p6459_p12 = pmov %p6458_p10 }
 0x16f   : > { %p6460_p9 = pmov %p6458_p10 }
 0x170   : > { %5077 = dma.done.wait (%p6459_p12), [#allocation9], 256  }
 0x171   : > { %5079 = vsyncadd (%p6460_p9), [#allocation9], 4294967040  ;;  %p6461_p2 = pmov %p6460_p9 }
 0x173   : > { %5081 = dma.done.wait (%p6461_p2), [#allocation12], 64   ;;  %p6462_p7 = pmov %p6461_p2 }
 0x174   : > { %s6463_s30 = sld [smem:[#allocation31_spill]]  ;;  %s922_s1 = sand.u32 1, %s6456_s9  }
 0x175   : > { %5083 = vsyncadd (%p6462_p7), [#allocation12], 4294967232  ;;  %s6464_s19 = sld [smem:[#allocation38_spill]]  ;;  %s923_s16 = scalar_lea.sflag [#allocation15], %s922_s1 }
 0x17a   : > { %s5705_s10 = sand.u32 1, %s6463_s30  }
 0x17b   : > { %p6465_p0 = scmp.ne.s32.totalorder %s6464_s19, 0 }
 0x17d   : > { %5085 = dma.done.wait (%p6465_p0), %s923_s16, 32  }
 0x17e   : > { %5087 = vsyncadd (%p6465_p0), %s923_s16, 4294967264  ;;  %s939_s11 = scalar_lea.sflag [#allocation18], %s922_s1 }
 0x17f   : > { %5089 = dma.done.wait (%p6465_p0), %s939_s11, 32  }
 0x180   : > { %5091 = vsyncadd (%p6465_p0), %s939_s11, 4294967264  ;;  %s4009_s22 = sshll.u32 %s5705_s10, 4  ;;  %s955_s14 = scalar_lea.sflag [#allocation21], %s922_s1 }
 0x181   : > { %s5720_s21 = scalar_lea.vmem [#allocation20], %s4009_s22 }
 0x182   : > { %5093 = dma.done.wait (%p6465_p0), %s955_s14, 512  }
 0x183   : > { %5095 = vsyncadd (%p6465_p0), %s955_s14, 4294966784  ;;  %s6466_s18 = sld [smem:[#allocation33_spill]]  ;;  %s6468_s3 = sld [smem:[#allocation45_spill]] }
 0x184   : > { %s6469_s19 = sld [smem:[#allocation47_spill]]  ;;  %s6470_s14 = sld [smem:[#allocation49_spill]] }
 0x185   : > { %s6471_s20 = sld [smem:[#allocation51_spill]]  ;;  %s6472_s26 = sld [smem:[#allocation55_spill]] }
 0x186   : > { %s6473_s9 = sld [smem:[#allocation56_spill]]  ;;  %s6474_s16 = sld [smem:[#allocation57_spill]] }
 0x187   : > { %s6475_s0 = sld [smem:[#allocation58_spill]]  ;;  %s6476_s17 = sld [smem:[#allocation59_spill]] }
 0x189   : > { %p1088_p1 = scmp.lt.s32.totalorder %s6466_s18, 1  ;;  %p4023_p4 = scmp.ne.s32.totalorder %s6466_s18, 0 }
 0x18a   : > { %v1136_v0 = vld [vmem:[#allocation5] sm:$0xff] (!%p4023_p4)  ;;  %vm1138_vm0 = vcmask (!%p4023_p4), 261120   ;;  %v1137_v1 = vld [vmem:[#allocation5 + $0x8] sm:$0xff] (!%p4023_p4)  ;;  %v1141_v2 = vld [vmem:[#allocation10] sm:$0xff] (!%p4023_p4)  ;;  %vm1158_vm1 = vcmask (!%p4023_p4), 64512  }
 0x18b   : > { %s5728_s27 = scalar_select %p1088_p1, %s6466_s18, 1 }
 0x18c   : > { %1139 = vst.msk [vmem:[#allocation2] sm:$0xff] (!%p4023_p4), %vm1138_vm0, %v1136_v0  ;;  %1140 = vst.msk [vmem:[#allocation2 + $0x8] sm:$0xff] (!%p4023_p4), %vm1138_vm0, %v1137_v1  ;;  %v4024_v3 = vld [vmem:[#allocation11] ss:$0 sm:$0xff] (!%p4023_p4)  ;;  %v4025_v4 = vld [vmem:[#allocation11 + $0x1] ss:$0 sm:$0xff] (!%p4023_p4) }
 0x18d   : > { %s4104_s23 = sshll.u32 %s5728_s27, 4  ;;  %s1113_s13 = scalar_lea.vmem %s6472_s26, %s5728_s27  ;;  %v1156_v5 = vadd.f32 (!%p4023_p4), %v4024_v3, %v1141_v2  ;;  %v1157_v6 = vadd.f32 (!%p4023_p4), %v4025_v4, %v1141_v2 }
 0x18e   : > { %s5738_s6 = scalar_lea.vmem %s6468_s3, %s4104_s23  ;;  %s5743_s1 = scalar_lea.vmem %s6469_s19, %s4104_s23 }
 0x18f   : > { %s5748_s2 = scalar_lea.vmem %s6470_s14, %s4104_s23  ;;  %s5753_s7 = scalar_lea.vmem %s6471_s20, %s4104_s23  ;;  %1159 = vst.msk [vmem:[#allocation4] sm:$0xff] (!%p4023_p4), %vm1158_vm1, %v1156_v5  ;;  %1160 = vst.msk [vmem:[#allocation4 + $0x8] sm:$0xff] (!%p4023_p4), %vm1158_vm1, %v1157_v6 }
 0x190   : > { %s4108_s3 = sshll.u32 %s5728_s27, 5  ;;  %s1121_s11 = scalar_lea.vmem %s6474_s16, %s5728_s27 }
 0x191   : > { %s5763_s30 = scalar_lea.vmem %s6473_s9, %s4108_s3  ;;  %s4021_s14 = sshll.u32 %s5728_s27, 2 }
 0x192   : > { %s5773_s20 = scalar_lea.vmem %s6475_s0, %s4021_s14  ;;  %s5778_s24 = scalar_lea.vmem %s6476_s17, %s4021_s14 }
 0x193   : > { %s5780_s26 = scalar_lea.vmem [#allocation22], %s4009_s22  ;;  %1135 = sbr.rel (%p4023_p4) target bundleno = 410 (0x19a), region = 152 }
 0x19a PF: > { %v4609_v7 = vld [vmem:[%s5738_s6] sm:$0xff]   ;;  %v5141_v8 = vmov 0.0   ;;  %v4610_v9 = vld [vmem:[%s5738_s6 + $0x8] sm:$0xff]   ;;  %vm5142_vm2 = vmmov 0   ;;  %vm1189_vm3 = vcmask 261120   ;;  %s6477_s8 = scalar_lea.vmem [#allocation14], %s5705_s10 }
 0x19b   : > { %4196 = vmatprep.subr.bf16.mxu1 %v5141_v8  ;;  %4210 = vmatprep.subr.bf16.mxu0 %v5141_v8  ;;  %v5789_v10 = vld [vmem:[#allocation2] sm:$0xff]  ;;  %v5791_v11 = vld [vmem:[#allocation2 + $0x8] sm:$0xff]  ;;  %s5143_s12 = smov 120   ;;  %s5144_s5 = smov 96   ;;  %vm1244_vm4 = vcmask 64512   ;;  %vm1308_vm5 = vcmask 1043456  }
 0x19c   : > { %4197 = vmatpush3.bf16.msra.mxu1 %v4609_v7  ;;  %4200 = vmatprep.mubr.msk.bf16.mxu1 %vm5142_vm2, %v5141_v8  ;;  %v1165_v12 = vpack.c.bf16 %v5791_v11, %v5789_v10  ;;  %v4026_v13 = vld [vmem:[%s6477_s8] ss:$0 sm:$0xff]  ;;  %s5145_s4 = smov 80   ;;  %s5146_s22 = smov 88   ;;  %v1702_v5 = vld [vmem:[#allocation4 + $0x8] sm:$0xff]  ;;  %vm1467_vm6 = vcmask 130112  }
 0x19d   : > { %4198 = vmatprep.subr.bf16.mxu1 %v5141_v8  ;;  %4212 = vmatprep.mubr.msk.bf16.mxu0 %vm5142_vm2, %v5141_v8  ;;  %s5147_s18 = smov 72   ;;  %s5148_s28 = smov 112   ;;  %v1240_v44 = vld [vmem:[#allocation4] sm:$0xff]  ;;  %vm1583_vm7 = vcmask 195712   ;;  %vm1699_vm8 = vcmask 261312   ;;  %vm3554_vm9 = vcmask 523264  }
 0x19e   : > { %s5149_s6 = smov 104   ;;  %s5150_s3 = smov 56  }
 0x19f   : > { %s5151_s9 = smov 64   ;;  %s5152_s19 = smov 48  }
 0x1a0   : > { %4199 = vmatpush3.bf16.msra.mxu1 %v4610_v9  ;;  %s5153_s16 = smov 40   ;;  %s5154_s14 = smov 8  }
 0x1a1   : > { %4204 = vmatprep.subr.bf16.mxu1 %v5141_v8  ;;  %s5155_s0 = smov 16   ;;  %s5156_s25 = smov 24  }
 0x1a2   : > { %s6481_s23 = sld [smem:[#allocation54_spill]] }
 0x1a3   : > { %4201 = vmatmul.mubr.msk.bf16.vlgmr.msra.gmra.mrb[0].mxu1 %vm1189_vm3, %v1165_v12 }
 0x1a4   : > { %4206 = vmatprep.mubr.msk.bf16.mxu1 %vm5142_vm2, %v5141_v8 }
 0x1a8   : > { %s6482_s17 = scalar_lea.vmem %s6481_s23, %s5728_s27  ;;  %s6485_s27 = sld [smem:[#allocation33_spill]] }
 0x1ae   : > { %p4097_p3 = scmp.ne.s32.totalorder %s6485_s27, 1 }
 0x276   : > { %v1227_v14 = vpop.f32.mrb[0].mxu1 }
 0x277   : > { %v4202_v15 = vpop.f32.mrb[1].mxu1  ;;  %v1228_v17 = vadd.f32 %v4026_v13, %v1227_v14 }
 0x278   : > { %v1230_v16 = vpop.f32.mrb[2].mxu1 }
 0x279   : > { %v1231_v18 = vadd.f32 %v4026_v13, %v1230_v16  ;;  %v4203_v19 = vpop.f32.mrb[3].mxu1 }
 0x27b   : > { %v5804_v20 = vpack.c.bf16 %v1231_v18, %v1228_v17 }
 0x27d   : > { %1353 = vrot.lane.b32.xlu1 %v5804_v20, %s5143_s12  ;;  %1242 = vrot.lane.b32.xlu0 %v5804_v20, %s5144_s5  ;;  %v5819_v21 = vrot.slane %v5804_v20, 4 }
 0x281   : > { %1471 = vrot.lane.b32.xlu1 %v5804_v20, %s5145_s4  ;;  %1355 = vrot.lane.b32.xlu0 %v5804_v20, %s5146_s22 }
 0x285   : > { %1587 = vrot.lane.b32.xlu1 %v5804_v20, %s5147_s18  ;;  %1469 = vrot.lane.b32.xlu0 %v5804_v20, %s5148_s28 }
 0x289   : > { %1585 = vrot.lane.b32.xlu0 %v5804_v20, %s5149_s6  ;;  %1704 = vrot.lane.b32.xlu1 %v5819_v21, %s5144_s5 }
 0x28d   : > { %1816 = vrot.lane.b32.xlu0 %v5819_v21, %s5146_s22  ;;  %1814 = vrot.lane.b32.xlu1 %v5819_v21, %s5143_s12 }
 0x291   : > { %1931 = vrot.lane.b32.xlu0 %v5819_v21, %s5145_s4  ;;  %1929 = vrot.lane.b32.xlu1 %v5819_v21, %s5148_s28 }
 0x295   : > { %2046 = vrot.lane.b32.xlu0 %v5819_v21, %s5147_s18  ;;  %2044 = vrot.lane.b32.xlu1 %v5819_v21, %s5149_s6 }
 0x2ef   : > { %v1243_v22 = vpop.permute.xlu0 %1242  ;;  %v1354_v25 = vpop.permute.xlu1 %1353 }
 0x2f0   : > { %v1249_v23 = vsel %vm1244_vm4, %v1243_v22, 0 }
 0x2f1   : > { %4205 = vmatpush3.bf16.xpose.msra.mxu1 %v1249_v23 }
 0x2f2   : > { %4216 = vmatprep.subr.bf16.mxu1 %v5141_v8 }
 0x2f3   : > { %v1356_v24 = vpop.permute.xlu0 %1355  ;;  %v1472_v27 = vpop.permute.xlu1 %1471 }
 0x2f4   : > { %v1361_v26 = vsel %vm1244_vm4, %v1356_v24, 0  ;;  %v1477_v28 = vsel %vm1244_vm4, %v1472_v27, 0 }
 0x2f7   : > { %v1588_v29 = vpop.permute.xlu1 %1587  ;;  %v1470_v30 = vpop.permute.xlu0 %1469 }
 0x2f8   : > { %4207 = vmatmul.mubr.msk.bf16.vlgmr.msra.gmra.mrb[4].mxu1 %vm1244_vm4, %v5804_v20  ;;  %v1593_v31 = vsel %vm1244_vm4, %v1588_v29, 0 }
 0x2f9   : > { %4217 = vmatpush3.bf16.xpose.msra.mxu1 %v1361_v26  ;;  %4218 = vmatprep.mubr.msk.bf16.mxu1 %vm5142_vm2, %v5141_v8 }
 0x2fa   : > { %4228 = vmatprep.subr.bf16.mxu1 %v5141_v8 }
 0x2fb   : > { %v1705_v32 = vpop.permute.xlu1 %1704  ;;  %v1586_v33 = vpop.permute.xlu0 %1585 }
 0x2fc   : > { %v1710_v34 = vsel %vm1244_vm4, %v1705_v32, 0 }
 0x2ff   : > { %v1817_v35 = vpop.permute.xlu0 %1816  ;;  %v1815_v38 = vpop.permute.xlu1 %1814 }
 0x300   : > { %4219 = vmatmul.mubr.msk.bf16.vlgmr.msra.gmra.mrb[8].mxu1 %vm1244_vm4, %v1354_v25  ;;  %v1822_v36 = vsel %vm1244_vm4, %v1817_v35, 0 }
 0x301   : > { %4229 = vmatpush3.bf16.xpose.msra.mxu1 %v1477_v28  ;;  %4230 = vmatprep.mubr.msk.bf16.mxu1 %vm5142_vm2, %v5141_v8 }
 0x302   : > { %4240 = vmatprep.subr.bf16.mxu1 %v5141_v8 }
 0x303   : > { %v1932_v37 = vpop.permute.xlu0 %1931  ;;  %v1930_v41 = vpop.permute.xlu1 %1929 }
 0x304   : > { %v1937_v39 = vsel %vm1244_vm4, %v1932_v37, 0 }
 0x307   : > { %v2047_v40 = vpop.permute.xlu0 %2046  ;;  %v2045_v43 = vpop.permute.xlu1 %2044 }
 0x308   : > { %4231 = vmatmul.mubr.msk.bf16.vlgmr.msra.gmra.mrb[12].mxu1 %vm1244_vm4, %v1470_v30  ;;  %v2052_v42 = vsel %vm1244_vm4, %v2047_v40, 0 }
 0x309   : > { %4241 = vmatpush3.bf16.xpose.msra.mxu1 %v1593_v31  ;;  %4242 = vmatprep.mubr.msk.bf16.mxu1 %vm5142_vm2, %v5141_v8 }
 0x30a   : > { %4252 = vmatprep.subr.bf16.mxu1 %v5141_v8 }
 0x310   : > { %4243 = vmatmul.mubr.msk.bf16.vlgmr.msra.gmra.mrb[16].mxu1 %vm1244_vm4, %v1586_v33 }
 0x311   : > { %4253 = vmatpush3.bf16.xpose.msra.mxu1 %v1710_v34  ;;  %4254 = vmatprep.mubr.msk.bf16.mxu1 %vm5142_vm2, %v5141_v8 }
 0x312   : > { %4264 = vmatprep.subr.bf16.mxu1 %v5141_v8 }
 0x318   : > { %4255 = vmatmul.mubr.msk.bf16.vlgmr.msra.gmra.mrb[20].mxu1 %vm1244_vm4, %v5819_v21 }
 0x319   : > { %4265 = vmatpush3.bf16.xpose.msra.mxu1 %v1822_v36  ;;  %4266 = vmatprep.mubr.msk.bf16.mxu1 %vm5142_vm2, %v5141_v8 }
 0x31a   : > { %4276 = vmatprep.subr.bf16.mxu1 %v5141_v8 }
 0x320   : > { %4267 = vmatmul.mubr.msk.bf16.vlgmr.msra.gmra.mrb[24].mxu1 %vm1244_vm4, %v1815_v38 }
 0x321   : > { %4277 = vmatpush3.bf16.xpose.msra.mxu1 %v1937_v39  ;;  %4278 = vmatprep.mubr.msk.bf16.mxu1 %vm5142_vm2, %v5141_v8 }
 0x322   : > { %4288 = vmatprep.subr.bf16.mxu1 %v5141_v8 }
 0x328   : > { %4279 = vmatmul.mubr.msk.bf16.vlgmr.msra.gmra.mrb[28].mxu1 %vm1244_vm4, %v1930_v41 }
 0x329   : > { %4289 = vmatpush3.bf16.xpose.msra.mxu1 %v2052_v42  ;;  %4290 = vmatprep.mubr.msk.bf16.mxu1 %vm5142_vm2, %v5141_v8 }
 0x32a   : > { %4300 = vmatprep.subr.bf16.mxu1 %v5141_v8 }
 0x330   : > { %4291 = vmatmul.mubr.msk.bf16.vlgmr.msra.gmra.mrb[32].mxu1 %vm1244_vm4, %v2045_v43 }
 0x331   : > { %4304 = vmatprep.mubr.msk.bf16.mxu1 %vm5142_vm2, %v5141_v8 }
 0x3cb   : > { %v1285_v45 = vpop.f32.mrb[4].mxu1 }
 0x3cc   : > { %v1286_v46 = vadd.f32 %v1285_v45, %v1240_v44  ;;  %v4208_v47 = vpop.f32.mrb[5].mxu1 }
 0x3cd   : > { %v1288_v48 = vpop.f32.mrb[6].mxu1 }
 0x3ce   : > { %v4209_v49 = vpop.f32.mrb[7].mxu1  ;;  %v1291_v50 = vsel %vm1244_vm4, %v1286_v46, -inf }
 0x3cf   : > { %1292 = vmax.xlane.f32.xlu0 %v1291_v50 }
 0x3d3   : > { %v1397_v51 = vpop.f32.mrb[8].mxu1 }
 0x3d4   : > { %v1398_v52 = vadd.f32 %v1397_v51, %v1240_v44  ;;  %v4220_v53 = vpop.f32.mrb[9].mxu1 }
 0x3d5   : > { %v1400_v54 = vpop.f32.mrb[10].mxu1 }
 0x3d6   : > { %v4221_v55 = vpop.f32.mrb[11].mxu1  ;;  %v1403_v56 = vsel %vm1244_vm4, %v1398_v52, -inf }
 0x3d7   : > { %1404 = vmax.xlane.f32.xlu1 %v1403_v56 }
 0x3db   : > { %v1513_v57 = vpop.f32.mrb[12].mxu1 }
 0x3dc   : > { %v1514_v58 = vadd.f32 %v1513_v57, %v1240_v44  ;;  %v4232_v59 = vpop.f32.mrb[13].mxu1 }
 0x3dd   : > { %v1516_v60 = vpop.f32.mrb[14].mxu1 }
 0x3de   : > { %v4233_v61 = vpop.f32.mrb[15].mxu1  ;;  %v1519_v62 = vsel %vm1244_vm4, %v1514_v58, -inf }
 0x3df   : > { %1520 = vmax.xlane.f32.xlu0 %v1519_v62 }
 0x3e3   : > { %v1629_v63 = vpop.f32.mrb[16].mxu1 }
 0x3e4   : > { %v5882_v0 = vadd.f32 %v1629_v63, %v1240_v44  ;;  %v4244_v1 = vpop.f32.mrb[17].mxu1 }
 0x3e5   : > { %v1632_v2 = vpop.f32.mrb[18].mxu1 }
 0x3e6   : > { %v4245_v3 = vpop.f32.mrb[19].mxu1  ;;  %v1635_v4 = vsel %vm1244_vm4, %v5882_v0, -inf }
 0x3e7   : > { %1636 = vmax.xlane.f32.xlu0 %v1635_v4 }
 0x3eb   : > { %v1746_v6 = vpop.f32.mrb[20].mxu1 }
 0x3ec   : > { %v5886_v7 = vadd.f32 %v1746_v6, %v1702_v5  ;;  %v4256_v9 = vpop.f32.mrb[21].mxu1 }
 0x3ed   : > { %v1749_v12 = vpop.f32.mrb[22].mxu1 }
 0x3ee   : > { %v4257_v13 = vpop.f32.mrb[23].mxu1  ;;  %v1752_v14 = vsel %vm1244_vm4, %v5886_v7, -inf }
 0x3ef   : > { %1753 = vmax.xlane.f32.xlu1 %v1752_v14 }
 0x3f3   : > { %v1858_v15 = vpop.f32.mrb[24].mxu1 }
 0x3f4   : > { %v5890_v16 = vadd.f32 %v1858_v15, %v1702_v5  ;;  %v4268_v17 = vpop.f32.mrb[25].mxu1 }
 0x3f5   : > { %v1861_v18 = vpop.f32.mrb[26].mxu1 }
 0x3f6   : > { %v4269_v19 = vpop.f32.mrb[27].mxu1  ;;  %v1864_v22 = vsel %vm1244_vm4, %v5890_v16, -inf }
 0x3f7   : > { %1865 = vmax.xlane.f32.xlu0 %v1864_v22 }
 0x3fb   : > { %v1973_v23 = vpop.f32.mrb[28].mxu1 }
 0x3fc   : > { %v1974_v24 = vadd.f32 %v1973_v23, %v1702_v5  ;;  %v4280_v25 = vpop.f32.mrb[29].mxu1 }
 0x3fd   : > { %v1976_v26 = vpop.f32.mrb[30].mxu1 }
 0x3fe   : > { %v4281_v27 = vpop.f32.mrb[31].mxu1  ;;  %v1979_v28 = vsel %vm1244_vm4, %v1974_v24, -inf }
 0x3ff   : > { %1980 = vmax.xlane.f32.xlu1 %v1979_v28 }
 0x403   : > { %v2088_v29 = vpop.f32.mrb[32].mxu1 }
 0x404   : > { %v4292_v30 = vpop.f32.mrb[33].mxu1  ;;  %v5899_v33 = vadd.f32 %v2088_v29, %v1702_v5 }
 0x405   : > { %v2091_v31 = vpop.f32.mrb[34].mxu1 }
 0x406   : > { %v4293_v32 = vpop.f32.mrb[35].mxu1  ;;  %v2094_v34 = vsel %vm1244_vm4, %v5899_v33, -inf }
 0x40d   : > { %1415 = vrot.lane.b32.xlu0 %v5804_v20, %s5150_s3 }
 0x410   : > { %1303 = vrot.lane.b32.xlu1 %v5804_v20, %s5151_s9 }
 0x42c   : > { %2095 = vmax.xlane.f32.xlu0 %v2094_v34 }
 0x45c   : > { %v1293_v35 = vpop.xlane.xlu0 %1292 }
 0x45d   : > { %v1294_v36 = vsub.f32 %v1286_v46, %v1293_v35 }
 0x45f   : > { %v1295_v37 = vmul.f32 1.442695, %v1294_v36 }
 0x461   : > { %4626 = vpow2.f32 %v1295_v37 }
 0x464   : > { %v1405_v38 = vpop.xlane.xlu1 %1404 }
 0x465   : > { %v1406_v39 = vsub.f32 %v1398_v52, %v1405_v38 }
 0x467   : > { %v1407_v40 = vmul.f32 1.442695, %v1406_v39 }
 0x469   : > { %4628 = vpow2.f32 %v1407_v40 }
 0x46b   : > { %v5903_v41 = vpop.eup %4626 }
 0x46c   : > { %v1521_v42 = vpop.xlane.xlu0 %1520  ;;  %v1297_v43 = vsel %vm1244_vm4, %v5903_v41, 0.0 }
 0x46d   : > { %v1522_v44 = vsub.f32 %v1514_v58, %v1521_v42  ;;  %1298 = vadd.xlane.f32.xlu1 %v1297_v43 }
 0x46f   : > { %v1523_v45 = vmul.f32 1.442695, %v1522_v44 }
 0x471   : > { %4630 = vpow2.f32 %v1523_v45 }
 0x473   : > { %v5907_v47 = vpop.eup %4628 }
 0x474   : > { %v1409_v46 = vsel %vm1244_vm4, %v5907_v47, 0.0  ;;  %v1637_v53 = vpop.xlane.xlu0 %1636 }
 0x475   : > { %1410 = vadd.xlane.f32.xlu0 %v1409_v46  ;;  %v1638_v55 = vsub.f32 %v5882_v0, %v1637_v53 }
 0x477   : > { %v1639_v56 = vmul.f32 1.442695, %v1638_v55 }
 0x479   : > { %4632 = vpow2.f32 %v1639_v56 }
 0x47b   : > { %v5911_v48 = vpop.eup %4630 }
 0x47c   : > { %v1525_v49 = vsel %vm1244_vm4, %v5911_v48, 0.0  ;;  %v1754_v50 = vpop.xlane.xlu1 %1753 }
 0x47d   : > { %1526 = vadd.xlane.f32.xlu1 %v1525_v49  ;;  %v1755_v57 = vsub.f32 %v5886_v7, %v1754_v50 }
 0x47f   : > { %v1756_v60 = vmul.f32 1.442695, %v1755_v57 }
 0x481   : > { %4634 = vpow2.f32 %v1756_v60 }
 0x483   : > { %v4633_v63 = vpop.eup %4632 }
 0x484   : > { %v1866_v58 = vpop.xlane.xlu0 %1865  ;;  %v1641_v1 = vsel %vm1244_vm4, %v4633_v63, 0.0 }
 0x485   : > { %v1867_v59 = vsub.f32 %v5890_v16, %v1866_v58 }
 0x488   : > { %v1416_v7 = vpop.permute.xlu0 %1415 }
 0x489   : > { %v1421_v23 = vsel %vm1308_vm5, %v1416_v7, 0 }
 0x48b   : > { %1531 = vrot.lane.b32.xlu0 %v5804_v20, %s5152_s19  ;;  %v5925_v2 = vpop.eup %4634 }
 0x48c   : > { %v1981_v51 = vpop.xlane.xlu1 %1980  ;;  %v1758_v3 = vsel %vm1244_vm4, %v5925_v2, 0.0 }
 0x48d   : > { %v1982_v61 = vsub.f32 %v1974_v24, %v1981_v51 }
 0x48e   : > { %1647 = vrot.lane.b32.xlu1 %v5804_v20, %s5153_s16  ;;  %v1868_v20 = vmul.f32 1.442695, %v1867_v59 }
 0x48f   : > { %v1983_v62 = vmul.f32 1.442695, %v1982_v61 }
 0x490   : > { %v1304_v52 = vpop.permute.xlu1 %1303  ;;  %4636 = vpow2.f32 %v1868_v20 }
 0x491   : > { %v1310_v54 = vsel %vm1308_vm5, %v1304_v52, 0  ;;  %4638 = vpow2.f32 %v1983_v62 }
 0x492   : > { %4211 = vmatpush3.bf16.msra.mxu0 %v1310_v54 }
 0x493   : > { %4222 = vmatprep.subr.bf16.mxu0 %v5141_v8 }
 0x49a   : > { %v5927_v0 = vpop.eup %4636 }
 0x49b   : > { %v5931_v4 = vpop.eup %4638  ;;  %v1870_v5 = vsel %vm1244_vm4, %v5927_v0, 0.0 }
 0x49c   : > { %v1985_v6 = vsel %vm1244_vm4, %v5931_v4, 0.0 }
 0x4aa   : > { %1642 = vadd.xlane.f32.xlu0 %v1641_v1 }
 0x4ae   : > { %1759 = vadd.xlane.f32.xlu0 %v1758_v3 }
 0x4b2   : > { %1871 = vadd.xlane.f32.xlu1 %v1870_v5  ;;  %1986 = vadd.xlane.f32.xlu0 %v1985_v6 }
 0x4b9   : > { %v2096_v9 = vpop.xlane.xlu0 %2095 }
 0x4ba   : > { %v2097_v12 = vsub.f32 %v5899_v33, %v2096_v9 }
 0x4bc   : > { %v2098_v13 = vmul.f32 1.442695, %v2097_v12 }
 0x4be   : > { %4640 = vpow2.f32 %v2098_v13 }
 0x4c3   : > { %1876 = vrot.lane.b32.xlu1 %v5819_v21, %s5150_s3 }
 0x4c7   : > { %1991 = vrot.lane.b32.xlu1 %v5819_v21, %s5152_s19 }
 0x4c8   : > { %v5942_v14 = vpop.eup %4640 }
 0x4c9   : > { %v2100_v15 = vsel %vm1244_vm4, %v5942_v14, 0.0 }
 0x4ca   : > { %2101 = vadd.xlane.f32.xlu0 %v2100_v15 }
 0x4cb   : > { %2106 = vrot.lane.b32.xlu1 %v5819_v21, %s5153_s16 }
 0x4e0   : > { %1764 = vrot.lane.b32.xlu0 %v5819_v21, %s5151_s9 }
 0x4fa   : > { %v1299_v16 = vpop.xlane.xlu1 %1298 }
 0x4fb   : > { %4642 = vrcp.f32 %v1299_v16 }
 0x502   : > { %v1411_v17 = vpop.xlane.xlu0 %1410 }
 0x503   : > { %4644 = vrcp.f32 %v1411_v17 }
 0x505   : > { %v4643_v18 = vpop.eup %4642 }
 0x506   : > { %v1301_v19 = vmul.f32 %v4643_v18, %v5903_v41  ;;  %v1532_v26 = vpop.permute.xlu0 %1531 }
 0x507   : > { %v1537_v28 = vsel %vm1308_vm5, %v1532_v26, 0  ;;  %v4612_v26 = vld [vmem:[%s5743_s1 + $0x8] sm:$0xff]  }
 0x508   : > { %v1302_v22 = vpack.c.bf16 %v1301_v19, %v1301_v19 }
 0x50a   : > { %4213 = vmatmul.mubr.msk.bf16.vlgmr.msra.gmra.mrb[0].mxu0 %vm1244_vm4, %v1302_v22  ;;  %v1527_v24 = vpop.xlane.xlu1 %1526 }
 0x50b   : > { %4223 = vmatpush3.bf16.msra.mxu0 %v1421_v23  ;;  %4646 = vrcp.f32 %v1527_v24  ;;  %4224 = vmatprep.mubr.msk.bf16.mxu0 %vm5142_vm2, %v5141_v8 }
 0x50c   : > { %4234 = vmatprep.subr.bf16.mxu0 %v5141_v8 }
 0x50d   : > { %v4645_v21 = vpop.eup %4644 }
 0x50e   : > { %v1413_v25 = vmul.f32 %v4645_v21, %v5907_v47  ;;  %v1648_v31 = vpop.permute.xlu1 %1647 }
 0x50f   : > { %v1653_v33 = vsel %vm1308_vm5, %v1648_v31, 0 }
 0x510   : > { %v1414_v27 = vpack.c.bf16 %v1413_v25, %v1413_v25  ;;  %v4611_v25 = vld [vmem:[%s5743_s1] sm:$0xff]   ;;  %s6478_s1 = scalar_lea.vmem [#allocation16], %s5705_s10 }
 0x511   : > { %4301 = vmatpush3.bf16.msra.mxu1 %v4611_v25 }
 0x512   : > { %4225 = vmatmul.mubr.msk.bf16.vlgmr.msra.gmra.mrb[4].mxu0 %vm1244_vm4, %v1414_v27  ;;  %4302 = vmatprep.subr.bf16.mxu1 %v5141_v8 }
 0x513   : > { %4235 = vmatpush3.bf16.msra.mxu0 %v1537_v28  ;;  %4236 = vmatprep.mubr.msk.bf16.mxu0 %vm5142_vm2, %v5141_v8 }
 0x514   : > { %4246 = vmatprep.subr.bf16.mxu0 %v5141_v8 }
 0x515   : > { %v4647_v29 = vpop.eup %4646  ;;  %4303 = vmatpush3.bf16.msra.mxu1 %v4612_v26 }
 0x516   : > { %v1529_v30 = vmul.f32 %v4647_v29, %v5911_v48  ;;  %4316 = vmatprep.subr.bf16.mxu1 %v5141_v8 }
 0x518   : > { %v1530_v32 = vpack.c.bf16 %v1529_v30, %v1529_v30 }
 0x51a   : > { %4237 = vmatmul.mubr.msk.bf16.vlgmr.msra.gmra.mrb[8].mxu0 %vm1244_vm4, %v1530_v32 }
 0x51b   : > { %4247 = vmatpush3.bf16.msra.mxu0 %v1653_v33  ;;  %4248 = vmatprep.mubr.msk.bf16.mxu0 %vm5142_vm2, %v5141_v8 }
 0x51c   : > { %4258 = vmatprep.subr.bf16.mxu0 %v5141_v8 }
 0x537   : > { %v1643_v34 = vpop.xlane.xlu0 %1642 }
 0x538   : > { %4648 = vrcp.f32 %v1643_v34 }
 0x53b   : > { %v1760_v38 = vpop.xlane.xlu0 %1759 }
 0x53c   : > { %4650 = vrcp.f32 %v1760_v38 }
 0x53f   : > { %v1872_v39 = vpop.xlane.xlu1 %1871  ;;  %v1987_v40 = vpop.xlane.xlu0 %1986 }
 0x540   : > { %4652 = vrcp.f32 %v1872_v39 }
 0x541   : > { %4654 = vrcp.f32 %v1987_v40 }
 0x542   : > { %v4649_v35 = vpop.eup %4648 }
 0x543   : > { %v1645_v36 = vmul.f32 %v4649_v35, %v4633_v63  ;;  %v1877_v47 = vpop.permute.xlu1 %1876 }
 0x544   : > { %v1882_v49 = vsel %vm1308_vm5, %v1877_v47, 0 }
 0x545   : > { %v1646_v37 = vpack.c.bf16 %v1645_v36, %v1645_v36 }
 0x546   : > { %v4651_v41 = vpop.eup %4650 }
 0x547   : > { %4249 = vmatmul.mubr.msk.bf16.vlgmr.msra.gmra.mrb[12].mxu0 %vm1244_vm4, %v1646_v37  ;;  %v1762_v43 = vmul.f32 %v4651_v41, %v5925_v2  ;;  %v1992_v51 = vpop.permute.xlu1 %1991 }
 0x548   : > { %4260 = vmatprep.mubr.msk.bf16.mxu0 %vm5142_vm2, %v5141_v8  ;;  %v1997_v54 = vsel %vm1308_vm5, %v1992_v51, 0 }
 0x549   : > { %v1763_v46 = vpack.c.bf16 %v1762_v43, %v1762_v43 }
 0x54a   : > { %v4653_v48 = vpop.eup %4652 }
 0x54b   : > { %v1874_v50 = vmul.f32 %v4653_v48, %v5927_v0  ;;  %v4655_v53 = vpop.eup %4654  ;;  %v2107_v56 = vpop.permute.xlu1 %2106 }
 0x54c   : > { %v1989_v55 = vmul.f32 %v4655_v53, %v5931_v4  ;;  %v2112_v59 = vsel %vm1308_vm5, %v2107_v56, 0 }
 0x54d   : > { %v1875_v52 = vpack.c.bf16 %v1874_v50, %v1874_v50 }
 0x54e   : > { %v1990_v57 = vpack.c.bf16 %v1989_v55, %v1989_v55 }
 0x557   : > { %v2102_v42 = vpop.xlane.xlu0 %2101 }
 0x558   : > { %4656 = vrcp.f32 %v2102_v42 }
 0x55b   : > { %v1765_v44 = vpop.permute.xlu0 %1764 }
 0x55c   : > { %v1770_v45 = vsel %vm1308_vm5, %v1765_v44, 0  ;;  %v4046_v44 = vld [vmem:[%s6478_s1] ss:$0 sm:$0xff] }
 0x55d   : > { %4259 = vmatpush3.bf16.msra.mxu0 %v1770_v45 }
 0x55e   : > { %4270 = vmatprep.subr.bf16.mxu0 %v5141_v8 }
 0x560   : > { %4261 = vmatmul.mubr.msk.bf16.vlgmr.msra.gmra.mrb[16].mxu0 %vm1244_vm4, %v1763_v46 }
 0x561   : > { %4271 = vmatpush3.bf16.msra.mxu0 %v1882_v49  ;;  %4272 = vmatprep.mubr.msk.bf16.mxu0 %vm5142_vm2, %v5141_v8 }
 0x562   : > { %4282 = vmatprep.subr.bf16.mxu0 %v5141_v8  ;;  %v4657_v58 = vpop.eup %4656 }
 0x563   : > { %v2104_v60 = vmul.f32 %v4657_v58, %v5942_v14 }
 0x565   : > { %v2105_v61 = vpack.c.bf16 %v2104_v60, %v2104_v60 }
 0x568   : > { %4273 = vmatmul.mubr.msk.bf16.vlgmr.msra.gmra.mrb[20].mxu0 %vm1244_vm4, %v1875_v52 }
 0x569   : > { %4283 = vmatpush3.bf16.msra.mxu0 %v1997_v54  ;;  %4284 = vmatprep.mubr.msk.bf16.mxu0 %vm5142_vm2, %v5141_v8 }
 0x56a   : > { %4294 = vmatprep.subr.bf16.mxu0 %v5141_v8 }
 0x570   : > { %4285 = vmatmul.mubr.msk.bf16.vlgmr.msra.gmra.mrb[24].mxu0 %vm1244_vm4, %v1990_v57 }
 0x571   : > { %4295 = vmatpush3.bf16.msra.mxu0 %v2112_v59  ;;  %4296 = vmatprep.mubr.msk.bf16.mxu0 %vm5142_vm2, %v5141_v8 }
 0x572   : > { %4308 = vmatprep.subr.bf16.mxu0 %v5141_v8 }
 0x578   : > { %4297 = vmatmul.mubr.msk.bf16.vlgmr.msra.gmra.mrb[28].mxu0 %vm1244_vm4, %v2105_v61 }
 0x579   : > { %4312 = vmatprep.mubr.msk.bf16.mxu0 %vm5142_vm2, %v5141_v8 }
 0x5dd   : > { %v1346_v20 = vpop.f32.mrb[0].mxu0 }
 0x5de   : > { %1352 = vst.msk [vmem:[#allocation3] sm:$0xff] %vm1244_vm4, %v1346_v20  ;;  %v4214_v62 = vpop.f32.mrb[1].mxu0 }
 0x5df   : > { %v1349_v63 = vpop.f32.mrb[2].mxu0  ;;  %v4613_v62 = vld [vmem:[%s5753_s7] sm:$0xff]  }
 0x5e0   : > { %v4215_v1 = vpop.f32.mrb[3].mxu0  ;;  %v4614_v63 = vld [vmem:[%s5753_s7 + $0x8] sm:$0xff]   ;;  %s6480_s7 = scalar_lea.vmem [#allocation17], %s5705_s10 }
 0x5e1   : > { %v4615_v1 = vld [vmem:[#allocation8] sm:$0xff]  }
 0x5e5   : > { %v1457_v2 = vpop.f32.mrb[4].mxu0 }
 0x5e6   : > { %1464 = vrot.lane.b32.xlu1 %v1457_v2, %s5154_s14  ;;  %v4226_v0 = vpop.f32.mrb[5].mxu0  ;;  %v4616_v2 = vld [vmem:[%s5748_s2] sm:$0xff]  }
 0x5e7   : > { %v1460_v3 = vpop.f32.mrb[6].mxu0  ;;  %4309 = vmatpush3.bf16.msra.mxu0 %v4616_v2  ;;  %v4617_v0 = vld [vmem:[%s5748_s2 + $0x8] sm:$0xff]   ;;  %s6479_s2 = scalar_lea.vmem [#allocation19], %s5705_s10 }
 0x5e8   : > { %v4227_v4 = vpop.f32.mrb[7].mxu0  ;;  %4310 = vmatprep.subr.bf16.mxu0 %v5141_v8 }
 0x5eb   : > { %4311 = vmatpush3.bf16.msra.mxu0 %v4617_v0 }
 0x5ec   : > { %4324 = vmatprep.subr.bf16.mxu0 %v5141_v8 }
 0x5ed   : > { %v1573_v5 = vpop.f32.mrb[8].mxu0 }
 0x5ee   : > { %1580 = vrot.lane.b32.xlu0 %v1573_v5, %s5155_s0  ;;  %v4238_v6 = vpop.f32.mrb[9].mxu0 }
 0x5ef   : > { %v1576_v7 = vpop.f32.mrb[10].mxu0 }
 0x5f0   : > { %v4239_v9 = vpop.f32.mrb[11].mxu0 }
 0x61a   : > { %v1689_v12 = vpop.f32.mrb[12].mxu0 }
 0x61b   : > { %1696 = vrot.lane.b32.xlu0 %v1689_v12, %s5156_s25  ;;  %v4250_v13 = vpop.f32.mrb[13].mxu0 }
 0x61c   : > { %v1692_v14 = vpop.f32.mrb[14].mxu0 }
 0x61d   : > { %v4251_v15 = vpop.f32.mrb[15].mxu0  ;;  %v4050_v14 = vld [vmem:[%s5773_s20] ss:$0 sm:$0xff] }
 0x633   : > { %v1806_v16 = vpop.f32.mrb[16].mxu0 }
 0x634   : > { %1813 = vst.msk [vmem:[#allocation3 + $0x8] sm:$0xff] %vm1244_vm4, %v1806_v16  ;;  %v4262_v17 = vpop.f32.mrb[17].mxu0 }
 0x635   : > { %v1809_v18 = vpop.f32.mrb[18].mxu0 }
 0x636   : > { %v4263_v19 = vpop.f32.mrb[19].mxu0  ;;  %v4051_v18 = vld [vmem:[%s5778_s24] ss:$0 sm:$0xff] }
 0x63b   : > { %v1918_v22 = vpop.f32.mrb[20].mxu0 }
 0x63c   : > { %1925 = vrot.lane.b32.xlu1 %v1918_v22, %s5154_s14  ;;  %v4274_v23 = vpop.f32.mrb[21].mxu0 }
 0x63d   : > { %v1921_v24 = vpop.f32.mrb[22].mxu0 }
 0x63e   : > { %v4275_v21 = vpop.f32.mrb[23].mxu0 }
 0x63f   : > { %v4056_v21 = vld [vmem:[%s6479_s2] ss:$0 sm:$0xff] }
 0x643   : > { %v2033_v27 = vpop.f32.mrb[24].mxu0 }
 0x644   : > { %2040 = vrot.lane.b32.xlu1 %v2033_v27, %s5155_s0  ;;  %v4286_v28 = vpop.f32.mrb[25].mxu0 }
 0x645   : > { %v2036_v29 = vpop.f32.mrb[26].mxu0 }
 0x646   : > { %v4287_v30 = vpop.f32.mrb[27].mxu0 }
 0x64b   : > { %v2148_v31 = vpop.f32.mrb[28].mxu0 }
 0x64c   : > { %2155 = vrot.lane.b32.xlu1 %v2148_v31, %s5156_s25  ;;  %v4298_v32 = vpop.f32.mrb[29].mxu0 }
 0x64d   : > { %v2151_v33 = vpop.f32.mrb[30].mxu0 }
 0x64e   : > { %v4299_v34 = vpop.f32.mrb[31].mxu0  ;;  %v4052_v33 = vld [vmem:[%s6480_s7] ss:$0 sm:$0xff] }
 0x658   : > { %v1465_v35 = vpop.permute.xlu1 %1464 }
 0x659   : > { %1468 = vst.msk [vmem:[#allocation3] sm:$0xff] %vm1467_vm6, %v1465_v35 }
 0x660   : > { %v1581_v36 = vpop.permute.xlu0 %1580 }
 0x661   : > { %1584 = vst.msk [vmem:[#allocation3] sm:$0xff] %vm1583_vm7, %v1581_v36 }
 0x68d   : > { %v1697_v37 = vpop.permute.xlu0 %1696 }
 0x68e   : > { %1700 = vst.msk [vmem:[#allocation3] sm:$0xff] %vm1699_vm8, %v1697_v37 }
 0x695   : > { %v2159_v41 = vld [vmem:[#allocation3] sm:$0xff] }
 0x6ae   : > { %v1926_v38 = vpop.permute.xlu1 %1925 }
 0x6af   : > { %1928 = vst.msk [vmem:[#allocation3 + $0x8] sm:$0xff] %vm1467_vm6, %v1926_v38 }
 0x6b6   : > { %v2041_v39 = vpop.permute.xlu1 %2040 }
 0x6b7   : > { %2043 = vst.msk [vmem:[#allocation3 + $0x8] sm:$0xff] %vm1583_vm7, %v2041_v39 }
 0x6be   : > { %v2156_v40 = vpop.permute.xlu1 %2155 }
 0x6bf   : > { %2158 = vst.msk [vmem:[#allocation3 + $0x8] sm:$0xff] %vm1699_vm8, %v2156_v40 }
 0x6c6   : > { %v2160_v42 = vld [vmem:[#allocation3 + $0x8] sm:$0xff] }
 0x6c7   : > { %v2161_v43 = vpack.c.bf16 %v2160_v42, %v2159_v41 }
 0x6c9   : > { %4305 = vmatmul.mubr.msk.bf16.vlgmr.msra.gmra.mrb[36].mxu1 %vm1189_vm3, %v2161_v43 }
 0x6ca   : > { %4320 = vmatprep.mubr.msk.bf16.mxu1 %vm5142_vm2, %v5141_v8  ;;  %4317 = vmatpush3.bf16.msra.mxu1 %v4613_v62 }
 0x6cb   : > { %4318 = vmatprep.subr.bf16.mxu1 %v5141_v8 }
 0x6ce   : > { %4319 = vmatpush3.bf16.msra.mxu1 %v4614_v63 }
 0x6cf   : > { %4330 = vmatprep.subr.bf16.mxu1 %v5141_v8 }
 0x6d1   : > { %4321 = vmatmul.mubr.msk.bf16.vlgmr.msra.gmra.mrb[40].mxu1 %vm1189_vm3, %v4615_v1 }
 0x6d2   : > { %4332 = vmatprep.mubr.msk.bf16.mxu1 %vm5142_vm2, %v5141_v8 }
 0x79c   : > { %v2217_v45 = vpop.f32.mrb[36].mxu1 }
 0x79d   : > { %v2218_v47 = vadd.f32 %v4046_v44, %v2217_v45  ;;  %v4306_v46 = vpop.f32.mrb[37].mxu1 }
 0x79e   : > { %v2220_v48 = vpop.f32.mrb[38].mxu1 }
 0x79f   : > { %v2221_v49 = vadd.f32 %v4046_v44, %v2220_v48  ;;  %v4307_v50 = vpop.f32.mrb[39].mxu1  ;;  %v2224_v51 = vadd.f32 %v2218_v47, %v5789_v10 }
 0x7a1   : > { %v2228_v52 = vsel %vm1189_vm3, %v2224_v51, 0.0  ;;  %v2225_v53 = vadd.f32 %v2221_v49, %v5791_v11 }
 0x7a2   : > { %2229 = vadd.xlane.f32.xlu0 %v2228_v52 }
 0x7a3   : > { %v2231_v54 = vsel %vm1189_vm3, %v2225_v53, 0.0 }
 0x7a4   : > { %2232 = vadd.xlane.f32.xlu1 %v2231_v54  ;;  %v2401_v25 = vpop.f32.mrb[40].mxu1 }
 0x7a5   : > { %v2402_v26 = vadd.f32 %v4056_v21, %v2401_v25  ;;  %v4322_v27 = vpop.f32.mrb[41].mxu1 }
 0x7a6   : > { %v2404_v28 = vpop.f32.mrb[42].mxu1 }
 0x7a7   : > { %v2405_v29 = vadd.f32 %v4056_v21, %v2404_v28  ;;  %v4323_v30 = vpop.f32.mrb[43].mxu1 }
 0x7a9   : > { %v6048_v31 = vpack.c.bf16 %v2405_v29, %v2402_v26  ;;  %v4070_v26 = vld [vmem:[#allocation13 + $0x1] ss:$0 sm:$0xff] }
 0x7ab   : > { %v2425_v32 = vsel %vm1244_vm4, %v6048_v31, 0  ;;  %v6070_v44 = vrot.slane %v6048_v31, 4 }
 0x7ad   : > { %v2889_v52 = vsel %vm1244_vm4, %v6070_v44, 0 }
 0x7b5   : > { %2532 = vrot.lane.b32.xlu1 %v6048_v31, %s5143_s12 }
 0x7b9   : > { %2647 = vrot.lane.b32.xlu1 %v6048_v31, %s5148_s28 }
 0x82f   : > { %v2230_v55 = vpop.xlane.xlu0 %2229 }
 0x830   : > { %v2235_v56 = vmul.f32 0.03125, %v2230_v55 }
 0x831   : > { %v2233_v57 = vpop.xlane.xlu1 %2232 }
 0x832   : > { %v2237_v58 = vsub.f32 %v2224_v51, %v2235_v56  ;;  %v2236_v59 = vmul.f32 0.03125, %v2233_v57 }
 0x834   : > { %v2238_v60 = vsub.f32 %v2225_v53, %v2236_v59  ;;  %v2239_v61 = vmul.f32 %v2237_v58, %v2237_v58 }
 0x835   : > { %v2533_v41 = vpop.permute.xlu1 %2532 }
 0x836   : > { %v2241_v10 = vsel %vm1189_vm3, %v2239_v61, 0.0  ;;  %v2240_v20 = vmul.f32 %v2238_v60, %v2238_v60  ;;  %v2538_v42 = vsel %vm1244_vm4, %v2533_v41, 0 }
 0x837   : > { %2242 = vadd.xlane.f32.xlu0 %v2241_v10  ;;  %v4061_v10 = vld [vmem:[#allocation13] ss:$0 sm:$0xff] }
 0x838   : > { %v2244_v11 = vsel %vm1189_vm3, %v2240_v20, 0.0 }
 0x839   : > { %v2648_v45 = vpop.permute.xlu1 %2647 }
 0x83a   : > { %v2653_v46 = vsel %vm1244_vm4, %v2648_v45, 0 }
 0x83b   : > { %2245 = vadd.xlane.f32.xlu0 %v2244_v11 }
 0x8c4   : > { %v2243_v3 = vpop.xlane.xlu0 %2242 }
 0x8c5   : > { %v2247_v4 = vmul.f32 0.03125, %v2243_v3 }
 0x8c7   : > { %v2249_v5 = vadd.f32 1e-05, %v2247_v4 }
 0x8c8   : > { %v2246_v6 = vpop.xlane.xlu0 %2245 }
 0x8c9   : > { %4658 = vrsqrt.f32 %v2249_v5  ;;  %v2248_v7 = vmul.f32 0.03125, %v2246_v6 }
 0x8cb   : > { %v2250_v9 = vadd.f32 1e-05, %v2248_v7 }
 0x8cd   : > { %4660 = vrsqrt.f32 %v2250_v9 }
 0x8d3   : > { %v4659_v12 = vpop.eup %4658 }
 0x8d4   : > { %v2253_v13 = vmul.f32 %v4659_v12, %v2237_v58 }
 0x8d6   : > { %v2259_v16 = vmul.f32 %v4050_v14, %v2253_v13 }
 0x8d7   : > { %v4661_v15 = vpop.eup %4660 }
 0x8d8   : > { %v2254_v17 = vmul.f32 %v4661_v15, %v2238_v60  ;;  %v6037_v22 = vadd.f32 %v4051_v18, %v2259_v16 }
 0x8da   : > { %v2260_v19 = vmul.f32 %v4050_v14, %v2254_v17 }
 0x8dc   : > { %v6039_v23 = vadd.f32 %v4051_v18, %v2260_v19 }
 0x8de   : > { %v2267_v24 = vpack.c.bf16 %v6039_v23, %v6037_v22 }
 0x8e0   : > { %4313 = vmatmul.mubr.msk.bf16.vlgmr.msra.gmra.mrb[32].mxu0 %vm1189_vm3, %v2267_v24 }
 0x8e1   : > { %4326 = vmatprep.mubr.msk.bf16.mxu0 %vm5142_vm2, %v5141_v8  ;;  %4325 = vmatpush3.bf16.xpose.msra.mxu0 %v2425_v32 }
 0x8e2   : > { %4336 = vmatprep.subr.bf16.mxu0 %v5141_v8 }
 0x9b3   : > { %v2328_v34 = vpop.f32.mrb[32].mxu0 }
 0x9b4   : > { %v4314_v35 = vpop.f32.mrb[33].mxu0  ;;  %v2329_v37 = vadd.f32 %v4052_v33, %v2328_v34 }
 0x9b5   : > { %v2331_v36 = vpop.f32.mrb[34].mxu0 }
 0x9b6   : > { %v2332_v38 = vadd.f32 %v4052_v33, %v2331_v36  ;;  %v4315_v39 = vpop.f32.mrb[35].mxu0 }
 0x9b8   : > { %v2335_v40 = vpack.c.bf16 %v2332_v38, %v2329_v37 }
 0x9ba   : > { %2530 = vrot.lane.b32.xlu0 %v2335_v40, %s5143_s12  ;;  %2645 = vrot.lane.b32.xlu1 %v2335_v40, %s5148_s28  ;;  %v2883_v43 = vrot.slane %v2335_v40, 4 }
 0x9bb   : > { %4327 = vmatmul.mubr.msk.bf16.vlgmr.msra.gmra.mrb[36].mxu0 %vm1244_vm4, %v2335_v40 }
 0x9bc   : > { %4337 = vmatpush3.bf16.xpose.msra.mxu0 %v2538_v42  ;;  %4338 = vmatprep.mubr.msk.bf16.mxu0 %vm5142_vm2, %v5141_v8 }
 0x9bd   : > { %4348 = vmatprep.subr.bf16.mxu0 %v5141_v8 }
 0x9be   : > { %2762 = vrot.lane.b32.xlu0 %v6048_v31, %s5149_s6  ;;  %2760 = vrot.lane.b32.xlu1 %v2335_v40, %s5149_s6 }
 0x9c2   : > { %2992 = vrot.lane.b32.xlu1 %v2883_v43, %s5143_s12  ;;  %2994 = vrot.lane.b32.xlu0 %v6070_v44, %s5143_s12 }
 0x9c6   : > { %3107 = vrot.lane.b32.xlu1 %v2883_v43, %s5148_s28  ;;  %3109 = vrot.lane.b32.xlu0 %v6070_v44, %s5148_s28 }
 0x9ca   : > { %3222 = vrot.lane.b32.xlu1 %v2883_v43, %s5149_s6  ;;  %3224 = vrot.lane.b32.xlu0 %v6070_v44, %s5149_s6 }
 0xa2c   : > { %v2531_v47 = vpop.permute.xlu0 %2530  ;;  %v2646_v49 = vpop.permute.xlu1 %2645 }
 0xa2d   : > { %4339 = vmatmul.mubr.msk.bf16.vlgmr.msra.gmra.mrb[40].mxu0 %vm1244_vm4, %v2531_v47 }
 0xa2e   : > { %4349 = vmatpush3.bf16.xpose.msra.mxu0 %v2653_v46  ;;  %4350 = vmatprep.mubr.msk.bf16.mxu0 %vm5142_vm2, %v5141_v8 }
 0xa2f   : > { %4360 = vmatprep.subr.bf16.mxu0 %v5141_v8 }
 0xa30   : > { %v2763_v48 = vpop.permute.xlu0 %2762  ;;  %v2761_v51 = vpop.permute.xlu1 %2760 }
 0xa31   : > { %v2768_v50 = vsel %vm1244_vm4, %v2763_v48, 0 }
 0xa34   : > { %v2995_v53 = vpop.permute.xlu0 %2994  ;;  %v2993_v56 = vpop.permute.xlu1 %2992 }
 0xa35   : > { %4351 = vmatmul.mubr.msk.bf16.vlgmr.msra.gmra.mrb[44].mxu0 %vm1244_vm4, %v2646_v49  ;;  %v3000_v54 = vsel %vm1244_vm4, %v2995_v53, 0 }
 0xa36   : > { %4361 = vmatpush3.bf16.xpose.msra.mxu0 %v2768_v50  ;;  %4362 = vmatprep.mubr.msk.bf16.mxu0 %vm5142_vm2, %v5141_v8 }
 0xa37   : > { %4372 = vmatprep.subr.bf16.mxu0 %v5141_v8 }
 0xa38   : > { %v3110_v55 = vpop.permute.xlu0 %3109  ;;  %v3108_v59 = vpop.permute.xlu1 %3107 }
 0xa39   : > { %v3115_v57 = vsel %vm1244_vm4, %v3110_v55, 0 }
 0xa3c   : > { %v3225_v58 = vpop.permute.xlu0 %3224  ;;  %v3223_v61 = vpop.permute.xlu1 %3222 }
 0xa3d   : > { %4363 = vmatmul.mubr.msk.bf16.vlgmr.msra.gmra.mrb[48].mxu0 %vm1244_vm4, %v2761_v51  ;;  %v3230_v60 = vsel %vm1244_vm4, %v3225_v58, 0 }
 0xa3e   : > { %4373 = vmatpush3.bf16.xpose.msra.mxu0 %v2889_v52  ;;  %4374 = vmatprep.mubr.msk.bf16.mxu0 %vm5142_vm2, %v5141_v8 }
 0xa3f   : > { %4384 = vmatprep.subr.bf16.mxu0 %v5141_v8 }
 0xa45   : > { %4375 = vmatmul.mubr.msk.bf16.vlgmr.msra.gmra.mrb[52].mxu0 %vm1244_vm4, %v2883_v43 }
 0xa46   : > { %4385 = vmatpush3.bf16.xpose.msra.mxu0 %v3000_v54  ;;  %4386 = vmatprep.mubr.msk.bf16.mxu0 %vm5142_vm2, %v5141_v8 }
 0xa47   : > { %4396 = vmatprep.subr.bf16.mxu0 %v5141_v8 }
 0xa4d   : > { %4387 = vmatmul.mubr.msk.bf16.vlgmr.msra.gmra.mrb[56].mxu0 %vm1244_vm4, %v2993_v56 }
 0xa4e   : > { %4397 = vmatpush3.bf16.xpose.msra.mxu0 %v3115_v57  ;;  %4398 = vmatprep.mubr.msk.bf16.mxu0 %vm5142_vm2, %v5141_v8 }
 0xa4f   : > { %4408 = vmatprep.subr.bf16.mxu0 %v5141_v8 }
 0xa55   : > { %4399 = vmatmul.mubr.msk.bf16.vlgmr.msra.gmra.mrb[60].mxu0 %vm1244_vm4, %v3108_v59 }
 0xa56   : > { %4409 = vmatpush3.bf16.xpose.msra.mxu0 %v3230_v60  ;;  %4410 = vmatprep.mubr.msk.bf16.mxu0 %vm5142_vm2, %v5141_v8 }
 0xa57   : > { %4420 = vmatprep.subr.bf16.mxu0 %v5141_v8 }
 0xa5d   : > { %4411 = vmatmul.mubr.msk.bf16.vlgmr.msra.gmra.mrb[64].mxu0 %vm1244_vm4, %v3223_v61 }
 0xa5e   : > { %4424 = vmatprep.mubr.msk.bf16.mxu0 %vm5142_vm2, %v5141_v8 }
 0xa8e   : > { %v2461_v20 = vpop.f32.mrb[36].mxu0 }
 0xa8f   : > { %v2462_v11 = vadd.f32 %v4061_v10, %v2461_v20  ;;  %v4328_v62 = vpop.f32.mrb[37].mxu0 }
 0xa90   : > { %v2464_v63 = vpop.f32.mrb[38].mxu0 }
 0xa91   : > { %v4329_v1 = vpop.f32.mrb[39].mxu0  ;;  %v2467_v2 = vsel %vm1244_vm4, %v2462_v11, -inf }
 0xa92   : > { %2468 = vmax.xlane.f32.xlu0 %v2467_v2 }
 0xb00   : > { %v2574_v0 = vpop.f32.mrb[40].mxu0 }
 0xb01   : > { %v2575_v3 = vadd.f32 %v4061_v10, %v2574_v0  ;;  %v4340_v4 = vpop.f32.mrb[41].mxu0 }
 0xb02   : > { %v2577_v5 = vpop.f32.mrb[42].mxu0 }
 0xb03   : > { %v4341_v6 = vpop.f32.mrb[43].mxu0  ;;  %v2580_v7 = vsel %vm1244_vm4, %v2575_v3, -inf }
 0xb04   : > { %2581 = vmax.xlane.f32.xlu1 %v2580_v7 }
 0xb08   : > { %v2689_v9 = vpop.f32.mrb[44].mxu0 }
 0xb09   : > { %v2690_v12 = vadd.f32 %v4061_v10, %v2689_v9  ;;  %v4352_v13 = vpop.f32.mrb[45].mxu0 }
 0xb0a   : > { %v2692_v14 = vpop.f32.mrb[46].mxu0 }
 0xb0b   : > { %v4353_v15 = vpop.f32.mrb[47].mxu0  ;;  %v2695_v16 = vsel %vm1244_vm4, %v2690_v12, -inf }
 0xb0c   : > { %2696 = vmax.xlane.f32.xlu0 %v2695_v16 }
 0xb10   : > { %v2804_v17 = vpop.f32.mrb[48].mxu0 }
 0xb11   : > { %v6118_v18 = vadd.f32 %v4061_v10, %v2804_v17  ;;  %v4364_v19 = vpop.f32.mrb[49].mxu0 }
 0xb12   : > { %v2807_v24 = vpop.f32.mrb[50].mxu0 }
 0xb13   : > { %v4365_v21 = vpop.f32.mrb[51].mxu0  ;;  %v2810_v25 = vsel %vm1244_vm4, %v6118_v18, -inf }
 0xb14   : > { %2811 = vmax.xlane.f32.xlu0 %v2810_v25 }
 0xb18   : > { %v2925_v27 = vpop.f32.mrb[52].mxu0 }
 0xb19   : > { %v6122_v28 = vadd.f32 %v4070_v26, %v2925_v27  ;;  %v4376_v29 = vpop.f32.mrb[53].mxu0 }
 0xb1a   : > { %v2928_v30 = vpop.f32.mrb[54].mxu0 }
 0xb1b   : > { %v4377_v32 = vpop.f32.mrb[55].mxu0  ;;  %v2931_v33 = vsel %vm1244_vm4, %v6122_v28, -inf }
 0xb1c   : > { %2932 = vmax.xlane.f32.xlu1 %v2931_v33 }
 0xb1f   : > { %v2469_v51 = vpop.xlane.xlu0 %2468 }
 0xb20   : > { %v3036_v34 = vpop.f32.mrb[56].mxu0  ;;  %v2470_v52 = vsub.f32 %v2462_v11, %v2469_v51 }
 0xb21   : > { %v3037_v35 = vadd.f32 %v4070_v26, %v3036_v34  ;;  %v4388_v36 = vpop.f32.mrb[57].mxu0 }
 0xb22   : > { %v3039_v37 = vpop.f32.mrb[58].mxu0  ;;  %v2471_v53 = vmul.f32 1.442695, %v2470_v52 }
 0xb23   : > { %v4389_v38 = vpop.f32.mrb[59].mxu0  ;;  %v3042_v39 = vsel %vm1244_vm4, %v3037_v35, -inf }
 0xb24   : > { %3043 = vmax.xlane.f32.xlu0 %v3042_v39  ;;  %4662 = vpow2.f32 %v2471_v53 }
 0xb28   : > { %v3151_v40 = vpop.f32.mrb[60].mxu0 }
 0xb29   : > { %v3152_v41 = vadd.f32 %v4070_v26, %v3151_v40  ;;  %v4400_v42 = vpop.f32.mrb[61].mxu0 }
 0xb2a   : > { %v3154_v43 = vpop.f32.mrb[62].mxu0 }
 0xb2b   : > { %v4401_v45 = vpop.f32.mrb[63].mxu0  ;;  %v3157_v47 = vsel %vm1244_vm4, %v3152_v41, -inf }
 0xb2c   : > { %3158 = vmax.xlane.f32.xlu1 %v3157_v47 }
 0xb2e   : > { %v6133_v56 = vpop.eup %4662 }
 0xb2f   : > { %v2473_v57 = vsel %vm1244_vm4, %v6133_v56, 0.0 }
 0xb30   : > { %v3266_v46 = vpop.f32.mrb[64].mxu0 }
 0xb31   : > { %v4412_v48 = vpop.f32.mrb[65].mxu0  ;;  %v3267_v54 = vadd.f32 %v4070_v26, %v3266_v46 }
 0xb32   : > { %v3269_v49 = vpop.f32.mrb[66].mxu0 }
 0xb33   : > { %v4413_v50 = vpop.f32.mrb[67].mxu0  ;;  %v3272_v55 = vsel %vm1244_vm4, %v3267_v54, -inf }
 0xb3a   : > { %2592 = vrot.lane.b32.xlu0 %v6048_v31, %s5146_s22 }
 0xb3d   : > { %2480 = vrot.lane.b32.xlu1 %v6048_v31, %s5144_s5 }
 0xb59   : > { %3273 = vmax.xlane.f32.xlu0 %v3272_v55 }
 0xb61   : > { %2474 = vadd.xlane.f32.xlu1 %v2473_v57 }
 0xb91   : > { %v2582_v58 = vpop.xlane.xlu1 %2581 }
 0xb92   : > { %v2583_v59 = vsub.f32 %v2575_v3, %v2582_v58 }
 0xb94   : > { %v2584_v60 = vmul.f32 1.442695, %v2583_v59 }
 0xb96   : > { %4664 = vpow2.f32 %v2584_v60 }
 0xb99   : > { %v2697_v61 = vpop.xlane.xlu0 %2696 }
 0xb9a   : > { %v2698_v10 = vsub.f32 %v2690_v12, %v2697_v61 }
 0xb9c   : > { %v2699_v20 = vmul.f32 1.442695, %v2698_v10 }
 0xb9e   : > { %4666 = vpow2.f32 %v2699_v20 }
 0xba0   : > { %v6137_v11 = vpop.eup %4664 }
 0xba1   : > { %v2586_v62 = vsel %vm1244_vm4, %v6137_v11, 0.0  ;;  %v2812_v4 = vpop.xlane.xlu0 %2811 }
 0xba2   : > { %2587 = vadd.xlane.f32.xlu0 %v2586_v62  ;;  %v2813_v6 = vsub.f32 %v6118_v18, %v2812_v4 }
 0xba4   : > { %v2814_v7 = vmul.f32 1.442695, %v2813_v6 }
 0xba6   : > { %4668 = vpow2.f32 %v2814_v7 }
 0xba8   : > { %v6141_v63 = vpop.eup %4666 }
 0xba9   : > { %v2701_v1 = vsel %vm1244_vm4, %v6141_v63, 0.0  ;;  %v2933_v2 = vpop.xlane.xlu1 %2932 }
 0xbaa   : > { %2702 = vadd.xlane.f32.xlu1 %v2701_v1  ;;  %v2934_v9 = vsub.f32 %v6122_v28, %v2933_v2 }
 0xbac   : > { %v2935_v14 = vmul.f32 1.442695, %v2934_v9 }
 0xbae   : > { %4670 = vpow2.f32 %v2935_v14 }
 0xbb0   : > { %v4669_v17 = vpop.eup %4668 }
 0xbb1   : > { %v3044_v12 = vpop.xlane.xlu0 %3043  ;;  %v2816_v19 = vsel %vm1244_vm4, %v4669_v17, 0.0 }
 0xbb2   : > { %v3045_v13 = vsub.f32 %v3037_v35, %v3044_v12 }
 0xbb4   : > { %v3046_v16 = vmul.f32 1.442695, %v3045_v13 }
 0xbb5   : > { %v2593_v28 = vpop.permute.xlu0 %2592 }
 0xbb6   : > { %4672 = vpow2.f32 %v3046_v16  ;;  %v2598_v39 = vsel %vm1308_vm5, %v2593_v28, 0 }
 0xbb8   : > { %2707 = vrot.lane.b32.xlu0 %v6048_v31, %s5145_s4  ;;  %v6154_v24 = vpop.eup %4670 }
 0xbb9   : > { %v3159_v0 = vpop.xlane.xlu1 %3158  ;;  %v2937_v21 = vsel %vm1244_vm4, %v6154_v24, 0.0 }
 0xbba   : > { %v3160_v15 = vsub.f32 %v3152_v41, %v3159_v0 }
 0xbbb   : > { %2822 = vrot.lane.b32.xlu1 %v6048_v31, %s5147_s18 }
 0xbbc   : > { %v3161_v31 = vmul.f32 1.442695, %v3160_v15 }
 0xbbd   : > { %v2481_v3 = vpop.permute.xlu1 %2480 }
 0xbbe   : > { %v2486_v5 = vsel %vm1308_vm5, %v2481_v3, 0  ;;  %4674 = vpow2.f32 %v3161_v31 }
 0xbbf   : > { %4331 = vmatpush3.bf16.msra.mxu1 %v2486_v5 }
 0xbc0   : > { %4342 = vmatprep.subr.bf16.mxu1 %v5141_v8  ;;  %v6156_v18 = vpop.eup %4672 }
 0xbc1   : > { %v3048_v26 = vsel %vm1244_vm4, %v6156_v18, 0.0 }
 0xbc8   : > { %v6160_v25 = vpop.eup %4674 }
 0xbc9   : > { %v3163_v27 = vsel %vm1244_vm4, %v6160_v25, 0.0 }
 0xbd7   : > { %2817 = vadd.xlane.f32.xlu0 %v2816_v19 }
 0xbdb   : > { %2938 = vadd.xlane.f32.xlu0 %v2937_v21 }
 0xbdf   : > { %3049 = vadd.xlane.f32.xlu1 %v3048_v26  ;;  %3164 = vadd.xlane.f32.xlu0 %v3163_v27 }
 0xbe6   : > { %v3274_v29 = vpop.xlane.xlu0 %3273 }
 0xbe7   : > { %v3275_v30 = vsub.f32 %v3267_v54, %v3274_v29 }
 0xbe9   : > { %v3276_v32 = vmul.f32 1.442695, %v3275_v30 }
 0xbeb   : > { %4676 = vpow2.f32 %v3276_v32 }
 0xbee   : > { %v2475_v33 = vpop.xlane.xlu1 %2474 }
 0xbef   : > { %4678 = vrcp.f32 %v2475_v33 }
 0xbf0   : > { %3054 = vrot.lane.b32.xlu1 %v6070_v44, %s5146_s22 }
 0xbf4   : > { %3169 = vrot.lane.b32.xlu1 %v6070_v44, %s5145_s4 }
 0xbf5   : > { %v6170_v34 = vpop.eup %4676 }
 0xbf6   : > { %v3278_v35 = vsel %vm1244_vm4, %v6170_v34, 0.0 }
 0xbf7   : > { %3279 = vadd.xlane.f32.xlu0 %v3278_v35 }
 0xbf8   : > { %3284 = vrot.lane.b32.xlu1 %v6070_v44, %s5147_s18 }
 0xbf9   : > { %v4679_v36 = vpop.eup %4678 }
 0xbfa   : > { %v2477_v37 = vmul.f32 %v4679_v36, %v6133_v56 }
 0xbfc   : > { %v2478_v38 = vpack.c.bf16 %v2477_v37, %v2477_v37 }
 0xbfe   : > { %4333 = vmatmul.mubr.msk.bf16.vlgmr.msra.gmra.mrb[44].mxu1 %vm1244_vm4, %v2478_v38 }
 0xbff   : > { %4343 = vmatpush3.bf16.msra.mxu1 %v2598_v39  ;;  %4344 = vmatprep.mubr.msk.bf16.mxu1 %vm5142_vm2, %v5141_v8 }
 0xc00   : > { %4354 = vmatprep.subr.bf16.mxu1 %v5141_v8 }
 0xc0d   : > { %2943 = vrot.lane.b32.xlu0 %v6070_v44, %s5144_s5 }
 0xc2f   : > { %v2588_v40 = vpop.xlane.xlu0 %2587 }
 0xc30   : > { %4680 = vrcp.f32 %v2588_v40 }
 0xc33   : > { %v2708_v45 = vpop.permute.xlu0 %2707 }
 0xc34   : > { %v2713_v46 = vsel %vm1308_vm5, %v2708_v45, 0  ;;  %v4619_v45 = vld [vmem:[%s5720_s21 + $0x8] sm:$0xff]  }
 0xc37   : > { %v2703_v41 = vpop.xlane.xlu1 %2702 }
 0xc38   : > { %4682 = vrcp.f32 %v2703_v41 }
 0xc3a   : > { %v4681_v42 = vpop.eup %4680 }
 0xc3b   : > { %v2590_v43 = vmul.f32 %v4681_v42, %v6137_v11  ;;  %v2823_v49 = vpop.permute.xlu1 %2822 }
 0xc3c   : > { %v2828_v51 = vsel %vm1308_vm5, %v2823_v49, 0 }
 0xc3d   : > { %v2591_v47 = vpack.c.bf16 %v2590_v43, %v2590_v43  ;;  %v4618_v43 = vld [vmem:[%s5720_s21] sm:$0xff]  }
 0xc3e   : > { %4421 = vmatpush3.bf16.msra.mxu0 %v4618_v43  ;;  %v4085_v43 = vld [vmem:[%s1113_s13] ss:$0 sm:$0xff] }
 0xc3f   : > { %4345 = vmatmul.mubr.msk.bf16.vlgmr.msra.gmra.mrb[48].mxu1 %vm1244_vm4, %v2591_v47  ;;  %4422 = vmatprep.subr.bf16.mxu0 %v5141_v8 }
 0xc40   : > { %4355 = vmatpush3.bf16.msra.mxu1 %v2713_v46  ;;  %4356 = vmatprep.mubr.msk.bf16.mxu1 %vm5142_vm2, %v5141_v8 }
 0xc41   : > { %4366 = vmatprep.subr.bf16.mxu1 %v5141_v8 }
 0xc42   : > { %v4683_v44 = vpop.eup %4682  ;;  %4423 = vmatpush3.bf16.msra.mxu0 %v4619_v45 }
 0xc43   : > { %v2705_v48 = vmul.f32 %v4683_v44, %v6141_v63  ;;  %4436 = vmatprep.subr.bf16.mxu0 %v5141_v8 }
 0xc45   : > { %v2706_v50 = vpack.c.bf16 %v2705_v48, %v2705_v48 }
 0xc47   : > { %4357 = vmatmul.mubr.msk.bf16.vlgmr.msra.gmra.mrb[52].mxu1 %vm1244_vm4, %v2706_v50 }
 0xc48   : > { %4367 = vmatpush3.bf16.msra.mxu1 %v2828_v51  ;;  %4368 = vmatprep.mubr.msk.bf16.mxu1 %vm5142_vm2, %v5141_v8 }
 0xc49   : > { %4378 = vmatprep.subr.bf16.mxu1 %v5141_v8 }
 0xc64   : > { %v2818_v52 = vpop.xlane.xlu0 %2817 }
 0xc65   : > { %4684 = vrcp.f32 %v2818_v52 }
 0xc68   : > { %v2939_v56 = vpop.xlane.xlu0 %2938 }
 0xc69   : > { %4686 = vrcp.f32 %v2939_v56 }
 0xc6c   : > { %v3050_v57 = vpop.xlane.xlu1 %3049  ;;  %v3165_v58 = vpop.xlane.xlu0 %3164 }
 0xc6d   : > { %4688 = vrcp.f32 %v3050_v57 }
 0xc6e   : > { %4690 = vrcp.f32 %v3165_v58 }
 0xc6f   : > { %v4685_v53 = vpop.eup %4684 }
 0xc70   : > { %v2820_v54 = vmul.f32 %v4685_v53, %v4669_v17  ;;  %v3055_v11 = vpop.permute.xlu1 %3054 }
 0xc71   : > { %v3060_v1 = vsel %vm1308_vm5, %v3055_v11, 0 }
 0xc72   : > { %v2821_v55 = vpack.c.bf16 %v2820_v54, %v2820_v54 }
 0xc73   : > { %v4687_v59 = vpop.eup %4686 }
 0xc74   : > { %4369 = vmatmul.mubr.msk.bf16.vlgmr.msra.gmra.mrb[56].mxu1 %vm1244_vm4, %v2821_v55  ;;  %v2941_v61 = vmul.f32 %v4687_v59, %v6154_v24  ;;  %v3170_v0 = vpop.permute.xlu1 %3169 }
 0xc75   : > { %4380 = vmatprep.mubr.msk.bf16.mxu1 %vm5142_vm2, %v5141_v8  ;;  %v3175_v5 = vsel %vm1308_vm5, %v3170_v0, 0 }
 0xc76   : > { %v2942_v62 = vpack.c.bf16 %v2941_v61, %v2941_v61 }
 0xc77   : > { %v4689_v63 = vpop.eup %4688 }
 0xc78   : > { %v3052_v2 = vmul.f32 %v4689_v63, %v6156_v18  ;;  %v4691_v4 = vpop.eup %4690  ;;  %v3285_v7 = vpop.permute.xlu1 %3284 }
 0xc79   : > { %v3167_v6 = vmul.f32 %v4691_v4, %v6160_v25  ;;  %v3290_v13 = vsel %vm1308_vm5, %v3285_v7, 0 }
 0xc7a   : > { %v3053_v3 = vpack.c.bf16 %v3052_v2, %v3052_v2 }
 0xc7b   : > { %v3168_v9 = vpack.c.bf16 %v3167_v6, %v3167_v6 }
 0xc84   : > { %v3280_v60 = vpop.xlane.xlu0 %3279 }
 0xc85   : > { %4692 = vrcp.f32 %v3280_v60 }
 0xc88   : > { %v2944_v10 = vpop.permute.xlu0 %2943 }
 0xc89   : > { %v2949_v20 = vsel %vm1308_vm5, %v2944_v10, 0  ;;  %v4079_v10 = vld [vmem:[%s6482_s17] ss:$0 sm:$0xff] }
 0xc8a   : > { %4379 = vmatpush3.bf16.msra.mxu1 %v2949_v20 }
 0xc8b   : > { %4390 = vmatprep.subr.bf16.mxu1 %v5141_v8 }
 0xc8d   : > { %4381 = vmatmul.mubr.msk.bf16.vlgmr.msra.gmra.mrb[60].mxu1 %vm1244_vm4, %v2942_v62 }
 0xc8e   : > { %4391 = vmatpush3.bf16.msra.mxu1 %v3060_v1  ;;  %4392 = vmatprep.mubr.msk.bf16.mxu1 %vm5142_vm2, %v5141_v8 }
 0xc8f   : > { %4402 = vmatprep.subr.bf16.mxu1 %v5141_v8  ;;  %v4693_v12 = vpop.eup %4692 }
 0xc90   : > { %v3282_v14 = vmul.f32 %v4693_v12, %v6170_v34 }
 0xc92   : > { %v3283_v15 = vpack.c.bf16 %v3282_v14, %v3282_v14 }
 0xc95   : > { %4393 = vmatmul.mubr.msk.bf16.vlgmr.msra.gmra.mrb[64].mxu1 %vm1244_vm4, %v3053_v3 }
 0xc96   : > { %4403 = vmatpush3.bf16.msra.mxu1 %v3175_v5  ;;  %4404 = vmatprep.mubr.msk.bf16.mxu1 %vm5142_vm2, %v5141_v8 }
 0xc97   : > { %4414 = vmatprep.subr.bf16.mxu1 %v5141_v8 }
 0xc9d   : > { %4405 = vmatmul.mubr.msk.bf16.vlgmr.msra.gmra.mrb[68].mxu1 %vm1244_vm4, %v3168_v9 }
 0xc9e   : > { %4415 = vmatpush3.bf16.msra.mxu1 %v3290_v13  ;;  %4416 = vmatprep.mubr.msk.bf16.mxu1 %vm5142_vm2, %v5141_v8 }
 0xc9f   : > { %4428 = vmatprep.subr.bf16.mxu1 %v5141_v8 }
 0xca5   : > { %4417 = vmatmul.mubr.msk.bf16.vlgmr.msra.gmra.mrb[72].mxu1 %vm1244_vm4, %v3283_v15 }
 0xca6   : > { %4432 = vmatprep.mubr.msk.bf16.mxu1 %vm5142_vm2, %v5141_v8 }
 0xcd1   : > { %v2522_v16 = vpop.f32.mrb[44].mxu1 }
 0xcd2   : > { %2528 = vst.msk [vmem:[#allocation3] sm:$0xff] %vm1244_vm4, %v2522_v16  ;;  %v4334_v31 = vpop.f32.mrb[45].mxu1 }
 0xcd3   : > { %v2525_v17 = vpop.f32.mrb[46].mxu1  ;;  %v4620_v31 = vld [vmem:[%s5780_s26] sm:$0xff]  }
 0xcd4   : > { %v4335_v19 = vpop.f32.mrb[47].mxu1  ;;  %4429 = vmatpush3.bf16.msra.mxu1 %v4620_v31  ;;  %v4621_v17 = vld [vmem:[%s5780_s26 + $0x8] sm:$0xff]   ;;  %v4096_v31 = vld [vmem:[%s5778_s24 + $0x2] ss:$0 sm:$0xff] }
 0xcd5   : > { %4430 = vmatprep.subr.bf16.mxu1 %v5141_v8  ;;  %v4622_v19 = vld [vmem:[%s5763_s30] sm:$0xff]  }
 0xcd8   : > { %4431 = vmatpush3.bf16.msra.mxu1 %v4621_v17 }
 0xd12   : > { %v2634_v24 = vpop.f32.mrb[48].mxu1 }
 0xd13   : > { %2641 = vrot.lane.b32.xlu1 %v2634_v24, %s5154_s14  ;;  %v4346_v18 = vpop.f32.mrb[49].mxu1  ;;  %v4623_v24 = vld [vmem:[%s5763_s30 + $0x8] sm:$0xff]  }
 0xd14   : > { %v2637_v21 = vpop.f32.mrb[50].mxu1 }
 0xd15   : > { %v4347_v25 = vpop.f32.mrb[51].mxu1 }
 0xd1a   : > { %v2749_v26 = vpop.f32.mrb[52].mxu1 }
 0xd1b   : > { %2756 = vrot.lane.b32.xlu0 %v2749_v26, %s5155_s0  ;;  %v4358_v27 = vpop.f32.mrb[53].mxu1 }
 0xd1c   : > { %v2752_v28 = vpop.f32.mrb[54].mxu1 }
 0xd1d   : > { %v4359_v29 = vpop.f32.mrb[55].mxu1 }
 0xd47   : > { %v2864_v30 = vpop.f32.mrb[56].mxu1 }
 0xd48   : > { %2871 = vrot.lane.b32.xlu0 %v2864_v30, %s5156_s25  ;;  %v4370_v32 = vpop.f32.mrb[57].mxu1 }
 0xd49   : > { %v2867_v33 = vpop.f32.mrb[58].mxu1  ;;  %v4083_v32 = vld [vmem:[%s5773_s20 + $0x1] ss:$0 sm:$0xff] }
 0xd4a   : > { %v4371_v34 = vpop.f32.mrb[59].mxu1 }
 0xd60   : > { %v2985_v35 = vpop.f32.mrb[60].mxu1 }
 0xd61   : > { %2991 = vst.msk [vmem:[#allocation3 + $0x8] sm:$0xff] %vm1244_vm4, %v2985_v35  ;;  %v4382_v36 = vpop.f32.mrb[61].mxu1 }
 0xd62   : > { %v2988_v37 = vpop.f32.mrb[62].mxu1  ;;  %v4084_v36 = vld [vmem:[%s5778_s24 + $0x1] ss:$0 sm:$0xff] }
 0xd63   : > { %v4383_v38 = vpop.f32.mrb[63].mxu1 }
 0xd68   : > { %v3096_v39 = vpop.f32.mrb[64].mxu1 }
 0xd69   : > { %3103 = vrot.lane.b32.xlu1 %v3096_v39, %s5154_s14  ;;  %v4394_v40 = vpop.f32.mrb[65].mxu1 }
 0xd6a   : > { %v3099_v41 = vpop.f32.mrb[66].mxu1 }
 0xd6b   : > { %v4395_v42 = vpop.f32.mrb[67].mxu1  ;;  %v4624_v41 = vld [vmem:[%s5763_s30 + $0x10] sm:$0xff]  }
 0xd6c   : > { %v4625_v42 = vld [vmem:[%s5763_s30 + $0x18] sm:$0xff]  }
 0xd70   : > { %v3211_v47 = vpop.f32.mrb[68].mxu1 }
 0xd71   : > { %3218 = vrot.lane.b32.xlu1 %v3211_v47, %s5155_s0  ;;  %v4406_v46 = vpop.f32.mrb[69].mxu1 }
 0xd72   : > { %v3214_v44 = vpop.f32.mrb[70].mxu1 }
 0xd73   : > { %v4407_v48 = vpop.f32.mrb[71].mxu1 }
 0xd78   : > { %v3326_v49 = vpop.f32.mrb[72].mxu1 }
 0xd79   : > { %3333 = vrot.lane.b32.xlu1 %v3326_v49, %s5156_s25  ;;  %v4418_v50 = vpop.f32.mrb[73].mxu1 }
 0xd7a   : > { %v3329_v51 = vpop.f32.mrb[74].mxu1 }
 0xd7b   : > { %v4419_v52 = vpop.f32.mrb[75].mxu1 }
 0xd85   : > { %v2642_v53 = vpop.permute.xlu1 %2641 }
 0xd86   : > { %2644 = vst.msk [vmem:[#allocation3] sm:$0xff] %vm1467_vm6, %v2642_v53 }
 0xd8d   : > { %v2757_v54 = vpop.permute.xlu0 %2756 }
 0xd8e   : > { %2759 = vst.msk [vmem:[#allocation3] sm:$0xff] %vm1583_vm7, %v2757_v54 }
 0xdba   : > { %v2872_v55 = vpop.permute.xlu0 %2871 }
 0xdbb   : > { %2874 = vst.msk [vmem:[#allocation3] sm:$0xff] %vm1699_vm8, %v2872_v55 }
 0xdc2   : > { %v3337_v59 = vld [vmem:[#allocation3] sm:$0xff] }
 0xddb   : > { %v3104_v56 = vpop.permute.xlu1 %3103 }
 0xddc   : > { %3106 = vst.msk [vmem:[#allocation3 + $0x8] sm:$0xff] %vm1467_vm6, %v3104_v56 }
 0xde3   : > { %v3219_v57 = vpop.permute.xlu1 %3218 }
 0xde4   : > { %3221 = vst.msk [vmem:[#allocation3 + $0x8] sm:$0xff] %vm1583_vm7, %v3219_v57 }
 0xdeb   : > { %v3334_v58 = vpop.permute.xlu1 %3333 }
 0xdec   : > { %3336 = vst.msk [vmem:[#allocation3 + $0x8] sm:$0xff] %vm1699_vm8, %v3334_v58 }
 0xdf3   : > { %v3338_v60 = vld [vmem:[#allocation3 + $0x8] sm:$0xff] }
 0xdf4   : > { %v3339_v61 = vpack.c.bf16 %v3338_v60, %v3337_v59 }
 0xdf6   : > { %4425 = vmatmul.mubr.msk.bf16.vlgmr.msra.gmra.mrb[68].mxu0 %vm1189_vm3, %v3339_v61 }
 0xdf7   : > { %4444 = vmatprep.mubr.msk.bf16.mxu0 %vm5142_vm2, %v5141_v8  ;;  %4437 = vmatpush3.bf16.msra.mxu0 %v4622_v19 }
 0xdf8   : > { %4438 = vmatprep.subr.bf16.mxu0 %v5141_v8 }
 0xdfb   : > { %4439 = vmatpush3.bf16.msra.mxu0 %v4623_v24 }
 0xdfc   : > { %4440 = vmatprep.subr.bf16.mxu0 %v5141_v8 }
 0xdff   : > { %4441 = vmatpush3.bf16.msra.mxu0 %v4624_v41 }
 0xe00   : > { %4442 = vmatprep.subr.bf16.mxu0 %v5141_v8  ;;  %v4089_v8 = vld [vmem:[%s1121_s11] ss:$0 sm:$0xff] }
 0xe03   : > { %4443 = vmatpush3.bf16.msra.mxu0 %v4625_v42 }
 0xec9   : > { %v3395_v20 = vpop.f32.mrb[68].mxu0 }
 0xeca   : > { %v3396_v11 = vadd.f32 %v4079_v10, %v3395_v20  ;;  %v4426_v62 = vpop.f32.mrb[69].mxu0 }
 0xecb   : > { %v3398_v63 = vpop.f32.mrb[70].mxu0 }
 0xecc   : > { %v3399_v1 = vadd.f32 %v4079_v10, %v3398_v63  ;;  %v4427_v2 = vpop.f32.mrb[71].mxu0  ;;  %v3402_v0 = vadd.f32 %v3396_v11, %v6037_v22 }
 0xece   : > { %v3406_v3 = vsel %vm1189_vm3, %v3402_v0, 0.0  ;;  %v3403_v4 = vadd.f32 %v3399_v1, %v6039_v23 }
 0xecf   : > { %3407 = vadd.xlane.f32.xlu0 %v3406_v3 }
 0xed0   : > { %v3409_v5 = vsel %vm1189_vm3, %v3403_v4, 0.0 }
 0xed1   : > { %3410 = vadd.xlane.f32.xlu1 %v3409_v5 }
 0xf5c   : > { %v3408_v6 = vpop.xlane.xlu0 %3407 }
 0xf5d   : > { %v3412_v7 = vmul.f32 0.03125, %v3408_v6 }
 0xf5e   : > { %v3411_v9 = vpop.xlane.xlu1 %3410 }
 0xf5f   : > { %v3414_v12 = vsub.f32 %v3402_v0, %v3412_v7  ;;  %v3413_v13 = vmul.f32 0.03125, %v3411_v9 }
 0xf61   : > { %v3415_v14 = vsub.f32 %v3403_v4, %v3413_v13  ;;  %v3416_v15 = vmul.f32 %v3414_v12, %v3414_v12 }
 0xf63   : > { %v3418_v22 = vsel %vm1189_vm3, %v3416_v15, 0.0  ;;  %v3417_v16 = vmul.f32 %v3415_v14, %v3415_v14 }
 0xf64   : > { %3419 = vadd.xlane.f32.xlu0 %v3418_v22  ;;  %v4095_v22 = vld [vmem:[%s5773_s20 + $0x2] ss:$0 sm:$0xff] }
 0xf65   : > { %v3421_v23 = vsel %vm1189_vm3, %v3417_v16, 0.0 }
 0xf68   : > { %3422 = vadd.xlane.f32.xlu0 %v3421_v23 }
 0xff1   : > { %v3420_v18 = vpop.xlane.xlu0 %3419 }
 0xff2   : > { %v3424_v21 = vmul.f32 0.03125, %v3420_v18 }
 0xff4   : > { %v3426_v25 = vadd.f32 1e-05, %v3424_v21 }
 0xff5   : > { %v3423_v26 = vpop.xlane.xlu0 %3422 }
 0xff6   : > { %4694 = vrsqrt.f32 %v3426_v25  ;;  %v3425_v27 = vmul.f32 0.03125, %v3423_v26 }
 0xff8   : > { %v3427_v28 = vadd.f32 1e-05, %v3425_v27 }
 0xffa   : > { %4696 = vrsqrt.f32 %v3427_v28 }
0x1000   : > { %v4695_v29 = vpop.eup %4694 }
0x1001   : > { %v3430_v30 = vmul.f32 %v4695_v29, %v3414_v12 }
0x1003   : > { %v3436_v34 = vmul.f32 %v4083_v32, %v3430_v30 }
0x1004   : > { %v4697_v33 = vpop.eup %4696 }
0x1005   : > { %v3431_v35 = vmul.f32 %v4697_v33, %v3415_v14  ;;  %v3442_v38 = vadd.f32 %v4084_v36, %v3436_v34 }
0x1007   : > { %v3437_v37 = vmul.f32 %v4083_v32, %v3431_v35 }
0x1009   : > { %v3443_v39 = vadd.f32 %v4084_v36, %v3437_v37 }
0x100b   : > { %v3444_v40 = vpack.c.bf16 %v3443_v39, %v3442_v38 }
0x100d   : > { %4433 = vmatmul.mubr.msk.bf16.vlgmr.msra.gmra.mrb[76].mxu1 %vm1189_vm3, %v3444_v40 }
0x10e0   : > { %v3505_v45 = vpop.f32.mrb[76].mxu1 }
0x10e1   : > { %v3506_v47 = vadd.f32 %v4085_v43, %v3505_v45  ;;  %v4434_v46 = vpop.f32.mrb[77].mxu1 }
0x10e2   : > { %v3508_v44 = vpop.f32.mrb[78].mxu1 }
0x10e3   : > { %v3509_v48 = vadd.f32 %v4085_v43, %v3508_v44  ;;  %v4435_v49 = vpop.f32.mrb[79].mxu1  ;;  %v3512_v50 = vmax.f32 %v3506_v47, 0.0 }
0x10e5   : > { %v3513_v51 = vmax.f32 %v3509_v48, 0.0 }
0x10e7   : > { %v3514_v52 = vpack.c.bf16 %v3513_v51, %v3512_v50 }
0x10e9   : > { %4445 = vmatmul.mubr.msk.bf16.vlgmr.msra.gmra.mrb[72].mxu0 %vm3554_vm9, %v3514_v52 }
0x11bc   : > { %v3592_v53 = vpop.f32.mrb[72].mxu0 }
0x11bd   : > { %v3593_v54 = vadd.f32 %v4089_v8, %v3592_v53  ;;  %v4446_v55 = vpop.f32.mrb[73].mxu0 }
0x11be   : > { %v3595_v56 = vpop.f32.mrb[74].mxu0 }
0x11bf   : > { %v3596_v57 = vadd.f32 %v4089_v8, %v3595_v56  ;;  %v4447_v58 = vpop.f32.mrb[75].mxu0  ;;  %v3599_v59 = vadd.f32 %v3593_v54, %v3442_v38 }
0x11c1   : > { %v3603_v60 = vsel %vm1189_vm3, %v3599_v59, 0.0  ;;  %v3600_v61 = vadd.f32 %v3596_v57, %v3443_v39 }
0x11c2   : > { %3604 = vadd.xlane.f32.xlu1 %v3603_v60 }
0x11c3   : > { %v3606_v10 = vsel %vm1189_vm3, %v3600_v61, 0.0 }
0x11c4   : > { %3607 = vadd.xlane.f32.xlu0 %v3606_v10 }
0x124f   : > { %v3605_v20 = vpop.xlane.xlu1 %3604 }
0x1250   : > { %v3609_v11 = vmul.f32 0.03125, %v3605_v20 }
0x1251   : > { %v3608_v62 = vpop.xlane.xlu0 %3607 }
0x1252   : > { %v3611_v63 = vsub.f32 %v3599_v59, %v3609_v11  ;;  %v3610_v1 = vmul.f32 0.03125, %v3608_v62 }
0x1254   : > { %v3612_v2 = vsub.f32 %v3600_v61, %v3610_v1  ;;  %v3613_v0 = vmul.f32 %v3611_v63, %v3611_v63 }
0x1256   : > { %v3615_v3 = vsel %vm1189_vm3, %v3613_v0, 0.0  ;;  %v3614_v4 = vmul.f32 %v3612_v2, %v3612_v2 }
0x1257   : > { %3616 = vadd.xlane.f32.xlu1 %v3615_v3 }
0x1258   : > { %v3618_v5 = vsel %vm1189_vm3, %v3614_v4, 0.0 }
0x1259   : > { %3619 = vadd.xlane.f32.xlu0 %v3618_v5 }
0x12e4   : > { %v3617_v6 = vpop.xlane.xlu1 %3616 }
0x12e5   : > { %v3621_v7 = vmul.f32 0.03125, %v3617_v6 }
0x12e6   : > { %v3620_v9 = vpop.xlane.xlu0 %3619 }
0x12e7   : > { %v3623_v12 = vadd.f32 1e-05, %v3621_v7  ;;  %v3622_v13 = vmul.f32 0.03125, %v3620_v9 }
0x12e9   : > { %4698 = vrsqrt.f32 %v3623_v12  ;;  %v3624_v14 = vadd.f32 1e-05, %v3622_v13 }
0x12eb   : > { %4700 = vrsqrt.f32 %v3624_v14 }
0x12f3   : > { %v4699_v15 = vpop.eup %4698 }
0x12f4   : > { %v3627_v16 = vmul.f32 %v4699_v15, %v3611_v63 }
0x12f5   : > { %v4701_v23 = vpop.eup %4700 }
0x12f6   : > { %v3633_v17 = vmul.f32 %v4095_v22, %v3627_v16  ;;  %v3628_v19 = vmul.f32 %v4701_v23, %v3612_v2  ;;  %3646 = sbr.rel (%p4097_p3) target bundleno = 4861 (0x12fd), region = 156 }
0x12f8   : > { %v3639_v24 = vadd.f32 %v4096_v31, %v3633_v17  ;;  %v3634_v18 = vmul.f32 %v4095_v22, %v3628_v19 }
0x12fa   : > { %3641 = vst.msk [vmem:[#allocation2] sm:$0xff] %vm1189_vm3, %v3639_v24  ;;  %v3640_v21 = vadd.f32 %v4096_v31, %v3634_v18  ;;  %3647 = vst.msk [vmem:[#allocation23] sm:$0xff] (!%p4097_p3), %vm1189_vm3, %v3639_v24 }
0x12fc   : > { %3642 = vst.msk [vmem:[#allocation2 + $0x8] sm:$0xff] %vm1189_vm3, %v3640_v21  ;;  %3648 = vst.msk [vmem:[#allocation23 + $0x8] sm:$0xff] (!%p4097_p3), %vm1189_vm3, %v3640_v21 }
0x12fd PF: > { %s6486_s13 = sld [smem:[#allocation36_spill]]  ;;  %s5157_s11 = smov [#allocation23]  }
0x12fe   : > { %s3658_s20 = sshll.u32 %s5157_s11, 4  ;;  %s3659_s20 = int_to_ptr.vmem [resolvable:$true] %s3658_s20 }
0x12ff   : > { %s5022_s24 = scalar_lea.vmem %s3659_s20, 256  ;;  %p5029_p13 = scmp.lt.s32.totalorder %s3659_s20, %s3659_s20 }
0x1300   : > { %p5023_p11 = scmp.ne.s32.totalorder %s3659_s20, %s5022_s24  ;;  %p5030_p10 = scmp.lt.s32.totalorder %s5022_s24, %s5022_s24 }
0x1302   : > { %p5031_p12 = por %p5030_p10, %p5029_p13 }
0x1303   : > { %p4530_p5 = scmp.eq.s32.totalorder %s6486_s13, 1 }
0x1305   : > { %p5024_p8 = pnand %p5023_p11, %p4530_p5 }
0x1307   : > { %p5025_p6 = pneg %p5024_p8 }
0x1309   : > { %p5032_p9 = pnand %p5031_p12, %p5025_p6 }
0x130b   : > { %5035 = shalt.err (!%p5032_p9)
}
0x130c   : > { %s6487_s28 = sld [smem:[#allocation60_spill]] }
0x1312   : > { %s6488_s6 = smov %s6487_s28  ;;  %s5036_s3 = scalar_lea.hbm %s6487_s28, 256 }
0x1313   : > { %p5037_p2 = scmp.ne.s32.totalorder %s6488_s6, %s5036_s3  ;;  %p5042_p1 = scmp.lt.u32.totalorder %s5036_s3, %s6488_s6 }
0x1315   : > { %p5038_p7 = pnand %p5037_p2, %p4530_p5 }
0x1317   : > { %p5039_p0 = pneg %p5038_p7 }
0x1319   : > { %p5044_p4 = pnand %p5042_p1, %p5039_p0 }
0x131b   : > { %5047 = shalt.err (!%p5044_p4)
}
0x131c   : > { %s5158_s25 = smov 128  }
0x131d   : > { %4481 = dma.vmem_to_hbm [thread:$0]  (%p4530_p5), %s3659_s20, 256, %s6488_s6, [#allocation7], %s5158_s25, %s5158_s25, %s5154_s14  }
0x131e   : > { %5097 = dma.done.wait (%p4530_p5), [#allocation7], 256  }
0x131f   : > { %5099 = vsyncadd (%p4530_p5), [#allocation7], 4294967040 }
0x1320 PF: > { %s6489_s7 = sld [smem:[#allocation35_spill]]  ;;  %s6490_s2 = sld [smem:[#allocation31_spill]] }
0x1321   : > { %s6491_s25 = sld [smem:[#allocation32_spill]]  ;;  %s6492_s26 = sld [smem:[#allocation39_spill]] }
0x1322   : > { %s6493_s27 = sld [smem:[#allocation34_spill]]  ;;  %s6494_s3 = sld [smem:[#allocation37_spill]] }
0x1326   : > { %s44_s28 = sadd.s32 1, %s6489_s7  }
0x1327   : > { %p41_p3 = scmp.ge.s32.totalorder %s44_s28, 4  }
0x1329   :  { %43 = sbr.rel (!%p41_p3) target bundleno = 34 (0x22), region = 267 }
0x1330   :  { %3674 = vsyncpa [#allocation6], 1 }
0x1331   :  { %3676 = vsyncpa [#allocation6 + $0x1], 1 }
0x1332   :  { %3677 = vsyncpa [#allocation9], 1 }
0x1333   :  { %3678 = vsyncpa [#allocation12], 1 }
0x1334   :  { %3679 = vsyncpa [#allocation15], 1 }
0x1335   :  { %3681 = vsyncpa [#allocation15 + $0x1], 1 }
0x1336   :  { %3682 = vsyncpa [#allocation18], 1 }
0x1337   :  { %3684 = vsyncpa [#allocation18 + $0x1], 1 }
0x1338   :  { %3685 = vsyncpa [#allocation21], 1 }
0x1339   :  { %3687 = vsyncpa [#allocation21 + $0x1], 1 }
0x133a   :  { %3688 = vsyncpa [#allocation7], 1 }
0x133b   :  { %3690 = vsyncpa [#allocation7 + $0x1], 1 }

</bundles_post_ra>
